<compile_context>
chip_gen: v7x
topology: tpu7x:2x2x1
jax: 0.10.0
libtpu: 0.0.40
codegen_flags: <defaults>
</compile_context>

<pallas_src>
import functools

import jax
import jax.numpy as jnp
from jax.experimental import pallas as pl
from jax.experimental.pallas import tpu as pltpu


def _round_up(x, m):
    return ((x + m - 1) // m) * m


def _pad_gate_lanes(w, H, Hp):
    """(K, 4H) with gate order i|f|g|o -> (K, 4*Hp), each gate zero-padded to Hp lanes."""
    K = w.shape[0]
    w4 = jnp.pad(w.reshape(K, 4, H), ((0, 0), (0, 0), (0, Hp - H)))
    return w4.reshape(K, 4 * Hp)


# --------------------------- Pallas recurrent kernel ---------------------------
def _bilstm_kernel(len_ref, gxf_ref, gxb_ref, whf_ref, whb_ref,
                   of_ref, ob_ref,
                   hf, cf, hb, cb):
    g = pl.program_id(0)
    TT, Bp, G4 = gxf_ref.shape
    Hp = G4 // 4
    T_pad = pl.num_programs(0) * TT

    @pl.when(g == 0)
    def _():
        hf[...] = jnp.zeros_like(hf)
        cf[...] = jnp.zeros_like(cf)
        hb[...] = jnp.zeros_like(hb)
        cb[...] = jnp.zeros_like(cb)

    # Hoisted once per TT-block: lengths lane-broadcast to a full (Bp, Hp) vreg shape.
    len_b = jnp.broadcast_to(len_ref[...], (Bp, Hp)).astype(jnp.int32)

    def cell(gates, h, c, mask):
        # gates: (Bp, 4*Hp) pre-activations (input proj + bias already folded in).
        i = jax.nn.sigmoid(gates[:, 0 * Hp:1 * Hp])
        f = jax.nn.sigmoid(gates[:, 1 * Hp:2 * Hp])
        gg = jnp.tanh(gates[:, 2 * Hp:3 * Hp])
        o = jax.nn.sigmoid(gates[:, 3 * Hp:4 * Hp])
        c_new = f * c + i * gg
        h_new = o * jnp.tanh(c_new)
        h_out = jnp.where(mask, h_new, h)   # freeze carry on padded positions
        c_out = jnp.where(mask, c_new, c)
        y = jnp.where(mask, h_new, 0.0)     # padded outputs are 0 (pad_packed_sequence)
        return h_out, c_out, y

    t0 = g * TT

    def step(s, carry):
        h_f, c_f, h_b, c_b = carry

        # ----- forward direction: global time t0 + s -----
        mask_f = (t0 + s) < len_b
        gates_f = gxf_ref[s] + jnp.dot(h_f, whf_ref[...],
                                       preferred_element_type=jnp.float32)
        h_f, c_f, y_f = cell(gates_f, h_f, c_f, mask_f)
        of_ref[s] = y_f

        # ----- backward direction: global time T_pad - 1 - (t0 + s), block row TT-1-s -----
        r = TT - 1 - s
        mask_b = (T_pad - 1 - (t0 + s)) < len_b
        gates_b = gxb_ref[r] + jnp.dot(h_b, whb_ref[...],
                                       preferred_element_type=jnp.float32)
        h_b, c_b, y_b = cell(gates_b, h_b, c_b, mask_b)
        ob_ref[r] = y_b

        return h_f, c_f, h_b, c_b

    carry0 = (hf[...], cf[...], hb[...], cb[...])
    h_f, c_f, h_b, c_b = jax.lax.fori_loop(0, TT, step, carry0, unroll=True)

    hf[...] = h_f
    cf[...] = c_f
    hb[...] = h_b
    cb[...] = c_b


def _bilstm_pallas(gx, lengths_pad, w_hh_f, w_hh_b, Hp, *, tt):
    """gx: (T_pad, B_pad, 8*Hp) pre-projected gate inputs for BOTH directions
    (time-major, f32; columns [0, 4Hp) = forward, [4Hp, 8Hp) = backward)."""
    T_pad, B_pad, G8 = gx.shape
    G4 = G8 // 2
    n_blk = T_pad // tt

    full2 = lambda g: (0, 0)

    grid_spec = pltpu.PrefetchScalarGridSpec(
        num_scalar_prefetch=0,
        grid=(n_blk,),
        in_specs=[
            pl.BlockSpec((B_pad, 1), full2),                                    # lengths
            # Both directions stream blocks of the SAME gx array; the gate-axis block
            # index (0 or 1) picks the direction's 4*Hp gate columns.
            pl.BlockSpec((tt, B_pad, G4), lambda g: (g, 0, 0)),                 # fwd gates
            pl.BlockSpec((tt, B_pad, G4), lambda g: (n_blk - 1 - g, 0, 1)),     # bwd gates
            pl.BlockSpec((Hp, G4), full2),                                      # W_hh fwd
            pl.BlockSpec((Hp, G4), full2),                                      # W_hh bwd
        ],
        out_specs=[
            pl.BlockSpec((tt, B_pad, Hp), lambda g: (g, 0, 0)),                 # fwd hidden
            pl.BlockSpec((tt, B_pad, Hp), lambda g: (n_blk - 1 - g, 0, 0)),     # bwd hidden
        ],
        scratch_shapes=[pltpu.VMEM((B_pad, Hp), jnp.float32)] * 4,  # h_f, c_f, h_b, c_b
    )

    out_f, out_b = pl.pallas_call(
        _bilstm_kernel,
        out_shape=(
            jax.ShapeDtypeStruct((T_pad, B_pad, Hp), jnp.float32),
            jax.ShapeDtypeStruct((T_pad, B_pad, Hp), jnp.float32),
        ),
        grid_spec=grid_spec,
        compiler_params=pltpu.CompilerParams(
            dimension_semantics=("arbitrary",)),  # serial recurrence carried in scratch
    )(lengths_pad, gx, gx, w_hh_f, w_hh_b)
    return out_f, out_b


# --------------------------------- wrapper ---------------------------------
def encoder_rnn_forward(seq, lengths, params, *, tt=8):
    """Mirror of EncoderRNN.forward.

    seq: (B, T) int32 token ids (0 = padding), lengths: (B,) int32 (>= 1 expected).
    Returns (hidden, last_hidden, embedding):
      hidden:       (B, T, 2H)  padded positions are 0
      last_hidden:  (B, 2H)     cat([h_forward_final, h_backward_final], -1)
      embedding:    (B, T, E)
    """
    emb_table = params["embedding"]
    H = params["w_hh_f"].shape[0]
    B, T = seq.shape

    Hp = _round_up(H, 128)     # lane-align each gate block
    Bp = _round_up(B, 8)       # f32 sublane tile
    Tp = _round_up(T, tt)      # whole time-blocks

    # ---- per-gate lane padding of weights / biases (i|f|g|o blocks of width Hp) ----
    w_ih_f = _pad_gate_lanes(params["w_ih_f"], H, Hp)                         # (E, 4Hp)
    w_ih_b = _pad_gate_lanes(params["w_ih_b"], H, Hp)
    b_f = _pad_gate_lanes(params["b_f"], H, Hp)                               # (1, 4Hp)
    b_b = _pad_gate_lanes(params["b_b"], H, Hp)
    w_hh_f = _pad_gate_lanes(jnp.pad(params["w_hh_f"], ((0, Hp - H), (0, 0))), H, Hp)
    w_hh_b = _pad_gate_lanes(jnp.pad(params["w_hh_b"], ((0, Hp - H), (0, 0))), H, Hp)

    # ---- embedding lookup (gather; row 0 is the zero padding vector) ----
    emb = emb_table[seq]                                                      # (B, T, E)

    # ---- hoisted input projection: ONE fused GEMM for both directions ----
    w_ih_fb = jnp.concatenate([w_ih_f, w_ih_b], axis=1)                       # (E, 8Hp)
    b_fb = jnp.concatenate([b_f, b_b], axis=1)                                # (1, 8Hp)
    gx = jnp.einsum("bte,eg->tbg", emb, w_ih_fb,
                    preferred_element_type=jnp.float32) + b_fb[None]          # (T, B, 8Hp)
    gx = jnp.pad(gx, ((0, Tp - T), (0, Bp - B), (0, 0)))                      # zero pad

    lengths_pad = jnp.pad(lengths.astype(jnp.int32), (0, Bp - B)).reshape(Bp, 1)

    out_f, out_b = _bilstm_pallas(gx, lengths_pad, w_hh_f, w_hh_b, Hp, tt=tt)

    out_fw = jnp.transpose(out_f, (1, 0, 2))[:B, :T, :H]                      # (B, T, H)
    out_bw = jnp.transpose(out_b, (1, 0, 2))[:B, :T, :H]
    hidden = jnp.concatenate([out_fw, out_bw], axis=-1)                       # (B, T, 2H)

    # Final states: fwd state at t = len-1 (clamped; len==0 -> zero row), bwd state at t = 0.
    idx = jnp.clip(lengths.astype(jnp.int32) - 1, 0, T - 1)[:, None, None]
    last_fw = jnp.take_along_axis(out_fw, idx, axis=1)[:, 0, :]
    last_bw = out_bw[:, 0, :]
    last_hidden = jnp.concatenate([last_fw, last_bw], axis=-1)
    return hidden, last_hidden, emb


# ---------------------- pure-JAX reference (for correctness check) ----------------------
def _lstm_ref_dir(x_tbe, lengths, wih, whh, b, reverse):
    T, B, E = x_tbe.shape
    H = whh.shape[0]
    ts = jnp.arange(T)
    mask = ts[:, None, None] < lengths[None, :, None]   # (T, B, 1)
    xs = (x_tbe[::-1], mask[::-1]) if reverse else (x_tbe, mask)

    def step(carry, inp):
        h, c = carry
        x, m = inp
        gates = x @ wih + h @ whh + b
        i = jax.nn.sigmoid(gates[:, :H])
        f = jax.nn.sigmoid(gates[:, H:2 * H])
        g = jnp.tanh(gates[:, 2 * H:3 * H])
        o = jax.nn.sigmoid(gates[:, 3 * H:])
        c_new = f * c + i * g
        h_new = o * jnp.tanh(c_new)
        c = jnp.where(m, c_new, c)
        h = jnp.where(m, h_new, h)
        return (h, c), jnp.where(m, h, 0.0)

    init = (jnp.zeros((B, H), jnp.float32), jnp.zeros((B, H), jnp.float32))
    (h, _), outs = jax.lax.scan(step, init, xs)
    if reverse:
        outs = outs[::-1]
    return jnp.transpose(outs, (1, 0, 2)), h


def encoder_rnn_reference(seq, lengths, params):
    emb = params["embedding"][seq]
    x_tbe = jnp.transpose(emb, (1, 0, 2))
    out_f, h_f = _lstm_ref_dir(x_tbe, lengths, params["w_ih_f"], params["w_hh_f"], params["b_f"], False)
    out_b, h_b = _lstm_ref_dir(x_tbe, lengths, params["w_ih_b"], params["w_hh_b"], params["b_b"], True)
    hidden = jnp.concatenate([out_f, out_b], axis=-1)
    last_hidden = jnp.concatenate([h_f, h_b], axis=-1)
    return hidden, last_hidden, emb


if __name__ == "__main__":
    # Small, deterministic setup consistent with EncoderRNN(vocab_size, embed_size, hidden_size).
    VOCAB, EMBED, HIDDEN = 50, 32, 32
    B, T = 4, 8

    key = jax.random.PRNGKey(0)
    keys = jax.random.split(key, 9)
    u = lambda k, shape: jax.random.uniform(k, shape, jnp.float32, -0.1, 0.1)

    emb_table = u(keys[0], (VOCAB, EMBED))
    emb_table = emb_table.at[0, :].set(0.0)  # padding_idx=0

    params = {
        "embedding": emb_table,
        # forward direction (W_ih stored as (E, 4H) so the math is x @ W; gate order i,f,g,o)
        "w_ih_f": u(keys[1], (EMBED, 4 * HIDDEN)),
        "w_hh_f": u(keys[2], (HIDDEN, 4 * HIDDEN)),
        "b_f": u(keys[3], (1, 4 * HIDDEN)) + u(keys[4], (1, 4 * HIDDEN)),  # b_ih + b_hh
        # backward direction
        "w_ih_b": u(keys[5], (EMBED, 4 * HIDDEN)),
        "w_hh_b": u(keys[6], (HIDDEN, 4 * HIDDEN)),
        "b_b": u(keys[7], (1, 4 * HIDDEN)) + u(keys[8], (1, 4 * HIDDEN)),
    }

    # Token ids with explicit padding (id 0) past each sequence's length.
    lengths = jnp.array([8, 5, 3, 6], dtype=jnp.int32)
    seq = jax.random.randint(jax.random.PRNGKey(1), (B, T), 1, VOCAB, dtype=jnp.int32)
    pad_mask = jnp.arange(T)[None, :] < lengths[:, None]
    seq = jnp.where(pad_mask, seq, 0)

    fwd = jax.jit(functools.partial(encoder_rnn_forward, params=params))
    hidden, last_hidden, embedding = fwd(seq, lengths)
    jax.block_until_ready((hidden, last_hidden, embedding))

    # Verify against the pure-JAX reference of the same math.
    hidden_ref, last_hidden_ref, emb_ref = encoder_rnn_reference(seq, lengths, params)
    assert hidden.shape == (B, T, 2 * HIDDEN)
    assert last_hidden.shape == (B, 2 * HIDDEN)
    assert embedding.shape == (B, T, EMBED)
    assert jnp.allclose(hidden, hidden_ref, atol=1e-4), "hidden mismatch"
    assert jnp.allclose(last_hidden, last_hidden_ref, atol=1e-4), "last_hidden mismatch"
    assert jnp.allclose(embedding, emb_ref, atol=1e-6), "embedding mismatch"

    print("KERNEL_OK")
</pallas_src>

<mosaic_0001>
module attributes {stable_mosaic.version = 11 : i64} {
  func.func @_bilstm_kernel(%arg0: i32, %arg1: memref<8x1xi32, #tpu.memory_space<vmem>>, %arg2: memref<8x8x512xf32, #tpu.memory_space<vmem>>, %arg3: memref<8x8x512xf32, #tpu.memory_space<vmem>>, %arg4: memref<128x512xf32, #tpu.memory_space<vmem>>, %arg5: memref<128x512xf32, #tpu.memory_space<vmem>>, %arg6: memref<8x8x128xf32, #tpu.memory_space<vmem>>, %arg7: memref<8x8x128xf32, #tpu.memory_space<vmem>>, %arg8: memref<8x128xf32, #tpu.memory_space<vmem>>, %arg9: memref<8x128xf32, #tpu.memory_space<vmem>>, %arg10: memref<8x128xf32, #tpu.memory_space<vmem>>, %arg11: memref<8x128xf32, #tpu.memory_space<vmem>>) attributes {dimension_semantics = [#tpu.dimension_semantics<arbitrary>], iteration_bounds = array<i64: 1>, scalar_prefetch = 0 : i64, scratch_operands = 4 : i64, tpu.core_type = #tpu.core_type<tc>, window_params = [{pipeline_mode = #tpu.pipeline_mode<synchronous>, transform_indices = @transform_0, window_bounds = array<i64: 8, 1>}, {transform_indices = @transform_1, window_bounds = array<i64: 8, 8, 512>}, {transform_indices = @transform_2, window_bounds = array<i64: 8, 8, 512>}, {pipeline_mode = #tpu.pipeline_mode<synchronous>, transform_indices = @transform_3, window_bounds = array<i64: 128, 512>}, {pipeline_mode = #tpu.pipeline_mode<synchronous>, transform_indices = @transform_4, window_bounds = array<i64: 128, 512>}, {transform_indices = @transform_5, window_bounds = array<i64: 8, 8, 128>}, {transform_indices = @transform_6, window_bounds = array<i64: 8, 8, 128>}]} {
    %c0_i32 = arith.constant 0 : i32
    %0 = arith.cmpi eq, %arg0, %c0_i32 : i32
    %1 = arith.extui %0 : i1 to i32
    %c0_i32_0 = arith.constant 0 : i32
    %2 = arith.cmpi ne, %1, %c0_i32_0 : i32
    scf.if %2 {
      %cst_211 = arith.constant 0.000000e+00 : f32
      %703 = vector.broadcast %cst_211 : f32 to vector<8x128xf32>
      %c0_212 = arith.constant 0 : index
      %c0_213 = arith.constant 0 : index
      %704 = vector.load %arg8[%c0_212, %c0_213] : memref<8x128xf32, #tpu.memory_space<vmem>>, vector<8x128xf32>
      tpu.vector_store %arg8[%c0_212, %c0_213], %703 {strides = array<i32>} : memref<8x128xf32, #tpu.memory_space<vmem>>, vector<8x128xf32>,
      %cst_214 = arith.constant 0.000000e+00 : f32
      %705 = vector.broadcast %cst_214 : f32 to vector<8x128xf32>
      %c0_215 = arith.constant 0 : index
      %c0_216 = arith.constant 0 : index
      %706 = vector.load %arg9[%c0_215, %c0_216] : memref<8x128xf32, #tpu.memory_space<vmem>>, vector<8x128xf32>
      tpu.vector_store %arg9[%c0_215, %c0_216], %705 {strides = array<i32>} : memref<8x128xf32, #tpu.memory_space<vmem>>, vector<8x128xf32>,
      %cst_217 = arith.constant 0.000000e+00 : f32
      %707 = vector.broadcast %cst_217 : f32 to vector<8x128xf32>
      %c0_218 = arith.constant 0 : index
      %c0_219 = arith.constant 0 : index
      %708 = vector.load %arg10[%c0_218, %c0_219] : memref<8x128xf32, #tpu.memory_space<vmem>>, vector<8x128xf32>
      tpu.vector_store %arg10[%c0_218, %c0_219], %707 {strides = array<i32>} : memref<8x128xf32, #tpu.memory_space<vmem>>, vector<8x128xf32>,
      %cst_220 = arith.constant 0.000000e+00 : f32
      %709 = vector.broadcast %cst_220 : f32 to vector<8x128xf32>
      %c0_221 = arith.constant 0 : index
      %c0_222 = arith.constant 0 : index
      %710 = vector.load %arg11[%c0_221, %c0_222] : memref<8x128xf32, #tpu.memory_space<vmem>>, vector<8x128xf32>
      tpu.vector_store %arg11[%c0_221, %c0_222], %709 {strides = array<i32>} : memref<8x128xf32, #tpu.memory_space<vmem>>, vector<8x128xf32>,
    } else {
    }
    %c0 = arith.constant 0 : index
    %c0_1 = arith.constant 0 : index
    %3 = vector.load %arg1[%c0, %c0_1] : memref<8x1xi32, #tpu.memory_space<vmem>>, vector<8x1xi32>
    %4 = vector.shape_cast %3 : vector<8x1xi32> to vector<8x1xi32>
    %5 = vector.broadcast %4 : vector<8x1xi32> to vector<8x128xi32>
    %c8_i32 = arith.constant 8 : i32
    %6 = arith.muli %arg0, %c8_i32 : i32
    %c0_2 = arith.constant 0 : index
    %c0_3 = arith.constant 0 : index
    %7 = vector.load %arg8[%c0_2, %c0_3] : memref<8x128xf32, #tpu.memory_space<vmem>>, vector<8x128xf32>
    %c0_4 = arith.constant 0 : index
    %c0_5 = arith.constant 0 : index
    %8 = vector.load %arg9[%c0_4, %c0_5] : memref<8x128xf32, #tpu.memory_space<vmem>>, vector<8x128xf32>
    %c0_6 = arith.constant 0 : index
    %c0_7 = arith.constant 0 : index
    %9 = vector.load %arg10[%c0_6, %c0_7] : memref<8x128xf32, #tpu.memory_space<vmem>>, vector<8x128xf32>
    %c0_8 = arith.constant 0 : index
    %c0_9 = arith.constant 0 : index
    %10 = vector.load %arg11[%c0_8, %c0_9] : memref<8x128xf32, #tpu.memory_space<vmem>>, vector<8x128xf32>
    %c0_i32_10 = arith.constant 0 : i32
    %11 = arith.addi %6, %c0_i32_10 : i32
    %12 = vector.broadcast %11 : i32 to vector<8x128xi32>
    %13 = arith.cmpi slt, %12, %5 : vector<8x128xi32>
    %14 = arith.index_cast %c0_i32_10 : i32 to index
    %c0_11 = arith.constant 0 : index
    %c0_12 = arith.constant 0 : index
    %15 = vector.load %arg2[%14, %c0_11, %c0_12] : memref<8x8x512xf32, #tpu.memory_space<vmem>>, vector<1x8x512xf32>
    %16 = vector.shape_cast %15 : vector<1x8x512xf32> to vector<8x512xf32>
    %c0_13 = arith.constant 0 : index
    %c0_14 = arith.constant 0 : index
    %17 = vector.load %arg4[%c0_13, %c0_14] : memref<128x512xf32, #tpu.memory_space<vmem>>, vector<128x512xf32>
    %cst = arith.constant dense<0.000000e+00> : vector<8x512xf32>
    %18 = tpu.matmul %7, %17, %cst {dimension_numbers = #tpu.dot_dimension_numbers<[1], [0], [0], [1], [0, 0, 1, 1], [], []>} : vector<8x128xf32>, vector<128x512xf32>, vector<8x512xf32> -> vector<8x512xf32>
    %19 = arith.addf %16, %18 : vector<8x512xf32>
    %20 = vector.extract_strided_slice %19 {offsets = [0, 0], sizes = [8, 128], strides = [1, 1]} : vector<8x512xf32> to vector<8x128xf32>
    %21 = arith.negf %20 : vector<8x128xf32>
    %22 = math.exp %21 : vector<8x128xf32>
    %cst_15 = arith.constant 1.000000e+00 : f32
    %23 = vector.broadcast %cst_15 : f32 to vector<8x128xf32>
    %24 = arith.addf %23, %22 : vector<8x128xf32>
    %25 = arith.divf %23, %24 : vector<8x128xf32>
    %26 = vector.extract_strided_slice %19 {offsets = [0, 128], sizes = [8, 128], strides = [1, 1]} : vector<8x512xf32> to vector<8x128xf32>
    %27 = arith.negf %26 : vector<8x128xf32>
    %28 = math.exp %27 : vector<8x128xf32>
    %cst_16 = arith.constant 1.000000e+00 : f32
    %29 = vector.broadcast %cst_16 : f32 to vector<8x128xf32>
    %30 = arith.addf %29, %28 : vector<8x128xf32>
    %31 = arith.divf %29, %30 : vector<8x128xf32>
    %32 = vector.extract_strided_slice %19 {offsets = [0, 256], sizes = [8, 128], strides = [1, 1]} : vector<8x512xf32> to vector<8x128xf32>
    %33 = math.tanh %32 : vector<8x128xf32>
    %34 = vector.extract_strided_slice %19 {offsets = [0, 384], sizes = [8, 128], strides = [1, 1]} : vector<8x512xf32> to vector<8x128xf32>
    %35 = arith.negf %34 : vector<8x128xf32>
    %36 = math.exp %35 : vector<8x128xf32>
    %cst_17 = arith.constant 1.000000e+00 : f32
    %37 = vector.broadcast %cst_17 : f32 to vector<8x128xf32>
    %38 = arith.addf %37, %36 : vector<8x128xf32>
    %39 = arith.divf %37, %38 : vector<8x128xf32>
    %40 = arith.mulf %31, %8 : vector<8x128xf32>
    %41 = arith.mulf %25, %33 : vector<8x128xf32>
    %42 = arith.addf %40, %41 : vector<8x128xf32>
    %43 = math.tanh %42 : vector<8x128xf32>
    %44 = arith.mulf %39, %43 : vector<8x128xf32>
    %45 = arith.select %13, %44, %7 : vector<8x128xi1>, vector<8x128xf32>
    %46 = arith.select %13, %42, %8 : vector<8x128xi1>, vector<8x128xf32>
    %cst_18 = arith.constant 0.000000e+00 : f32
    %47 = vector.broadcast %cst_18 : f32 to vector<8x128xf32>
    %48 = arith.select %13, %44, %47 : vector<8x128xi1>, vector<8x128xf32>
    %49 = arith.index_cast %c0_i32_10 : i32 to index
    %c0_19 = arith.constant 0 : index
    %c0_20 = arith.constant 0 : index
    %50 = vector.load %arg6[%49, %c0_19, %c0_20] : memref<8x8x128xf32, #tpu.memory_space<vmem>>, vector<1x8x128xf32>
    %51 = vector.shape_cast %50 : vector<1x8x128xf32> to vector<8x128xf32>
    %52 = vector.shape_cast %48 : vector<8x128xf32> to vector<1x8x128xf32>
    tpu.vector_store %arg6[%49, %c0_19, %c0_20], %52 {strides = array<i32>} : memref<8x8x128xf32, #tpu.memory_space<vmem>>, vector<1x8x128xf32>,
    %c7_i32 = arith.constant 7 : i32
    %53 = arith.subi %c7_i32, %c0_i32_10 : i32
    %54 = arith.addi %6, %c0_i32_10 : i32
    %c7_i32_21 = arith.constant 7 : i32
    %55 = arith.subi %c7_i32_21, %54 : i32
    %56 = vector.broadcast %55 : i32 to vector<8x128xi32>
    %57 = arith.cmpi slt, %56, %5 : vector<8x128xi32>
    %58 = arith.index_cast %53 : i32 to index
    %c0_22 = arith.constant 0 : index
    %c0_23 = arith.constant 0 : index
    %59 = vector.load %arg3[%58, %c0_22, %c0_23] : memref<8x8x512xf32, #tpu.memory_space<vmem>>, vector<1x8x512xf32>
    %60 = vector.shape_cast %59 : vector<1x8x512xf32> to vector<8x512xf32>
    %c0_24 = arith.constant 0 : index
    %c0_25 = arith.constant 0 : index
    %61 = vector.load %arg5[%c0_24, %c0_25] : memref<128x512xf32, #tpu.memory_space<vmem>>, vector<128x512xf32>
    %cst_26 = arith.constant dense<0.000000e+00> : vector<8x512xf32>
    %62 = tpu.matmul %9, %61, %cst_26 {dimension_numbers = #tpu.dot_dimension_numbers<[1], [0], [0], [1], [0, 0, 1, 1], [], []>} : vector<8x128xf32>, vector<128x512xf32>, vector<8x512xf32> -> vector<8x512xf32>
    %63 = arith.addf %60, %62 : vector<8x512xf32>
    %64 = vector.extract_strided_slice %63 {offsets = [0, 0], sizes = [8, 128], strides = [1, 1]} : vector<8x512xf32> to vector<8x128xf32>
    %65 = arith.negf %64 : vector<8x128xf32>
    %66 = math.exp %65 : vector<8x128xf32>
    %cst_27 = arith.constant 1.000000e+00 : f32
    %67 = vector.broadcast %cst_27 : f32 to vector<8x128xf32>
    %68 = arith.addf %67, %66 : vector<8x128xf32>
    %69 = arith.divf %67, %68 : vector<8x128xf32>
    %70 = vector.extract_strided_slice %63 {offsets = [0, 128], sizes = [8, 128], strides = [1, 1]} : vector<8x512xf32> to vector<8x128xf32>
    %71 = arith.negf %70 : vector<8x128xf32>
    %72 = math.exp %71 : vector<8x128xf32>
    %cst_28 = arith.constant 1.000000e+00 : f32
    %73 = vector.broadcast %cst_28 : f32 to vector<8x128xf32>
    %74 = arith.addf %73, %72 : vector<8x128xf32>
    %75 = arith.divf %73, %74 : vector<8x128xf32>
    %76 = vector.extract_strided_slice %63 {offsets = [0, 256], sizes = [8, 128], strides = [1, 1]} : vector<8x512xf32> to vector<8x128xf32>
    %77 = math.tanh %76 : vector<8x128xf32>
    %78 = vector.extract_strided_slice %63 {offsets = [0, 384], sizes = [8, 128], strides = [1, 1]} : vector<8x512xf32> to vector<8x128xf32>
    %79 = arith.negf %78 : vector<8x128xf32>
    %80 = math.exp %79 : vector<8x128xf32>
    %cst_29 = arith.constant 1.000000e+00 : f32
    %81 = vector.broadcast %cst_29 : f32 to vector<8x128xf32>
    %82 = arith.addf %81, %80 : vector<8x128xf32>
    %83 = arith.divf %81, %82 : vector<8x128xf32>
    %84 = arith.mulf %75, %10 : vector<8x128xf32>
    %85 = arith.mulf %69, %77 : vector<8x128xf32>
    %86 = arith.addf %84, %85 : vector<8x128xf32>
    %87 = math.tanh %86 : vector<8x128xf32>
    %88 = arith.mulf %83, %87 : vector<8x128xf32>
    %89 = arith.select %57, %88, %9 : vector<8x128xi1>, vector<8x128xf32>
    %90 = arith.select %57, %86, %10 : vector<8x128xi1>, vector<8x128xf32>
    %cst_30 = arith.constant 0.000000e+00 : f32
    %91 = vector.broadcast %cst_30 : f32 to vector<8x128xf32>
    %92 = arith.select %57, %88, %91 : vector<8x128xi1>, vector<8x128xf32>
    %93 = arith.index_cast %53 : i32 to index
    %c0_31 = arith.constant 0 : index
    %c0_32 = arith.constant 0 : index
    %94 = vector.load %arg7[%93, %c0_31, %c0_32] : memref<8x8x128xf32, #tpu.memory_space<vmem>>, vector<1x8x128xf32>
    %95 = vector.shape_cast %94 : vector<1x8x128xf32> to vector<8x128xf32>
    %96 = vector.shape_cast %92 : vector<8x128xf32> to vector<1x8x128xf32>
    tpu.vector_store %arg7[%93, %c0_31, %c0_32], %96 {strides = array<i32>} : memref<8x8x128xf32, #tpu.memory_space<vmem>>, vector<1x8x128xf32>,
    %c1_i32 = arith.constant 1 : i32
    %97 = arith.addi %6, %c1_i32 : i32
    %98 = vector.broadcast %97 : i32 to vector<8x128xi32>
    %99 = arith.cmpi slt, %98, %5 : vector<8x128xi32>
    %100 = arith.index_cast %c1_i32 : i32 to index
    %c0_33 = arith.constant 0 : index
    %c0_34 = arith.constant 0 : index
    %101 = vector.load %arg2[%100, %c0_33, %c0_34] : memref<8x8x512xf32, #tpu.memory_space<vmem>>, vector<1x8x512xf32>
    %102 = vector.shape_cast %101 : vector<1x8x512xf32> to vector<8x512xf32>
    %c0_35 = arith.constant 0 : index
    %c0_36 = arith.constant 0 : index
    %103 = vector.load %arg4[%c0_35, %c0_36] : memref<128x512xf32, #tpu.memory_space<vmem>>, vector<128x512xf32>
    %cst_37 = arith.constant dense<0.000000e+00> : vector<8x512xf32>
    %104 = tpu.matmul %45, %103, %cst_37 {dimension_numbers = #tpu.dot_dimension_numbers<[1], [0], [0], [1], [0, 0, 1, 1], [], []>} : vector<8x128xf32>, vector<128x512xf32>, vector<8x512xf32> -> vector<8x512xf32>
    %105 = arith.addf %102, %104 : vector<8x512xf32>
    %106 = vector.extract_strided_slice %105 {offsets = [0, 0], sizes = [8, 128], strides = [1, 1]} : vector<8x512xf32> to vector<8x128xf32>
    %107 = arith.negf %106 : vector<8x128xf32>
    %108 = math.exp %107 : vector<8x128xf32>
    %cst_38 = arith.constant 1.000000e+00 : f32
    %109 = vector.broadcast %cst_38 : f32 to vector<8x128xf32>
    %110 = arith.addf %109, %108 : vector<8x128xf32>
    %111 = arith.divf %109, %110 : vector<8x128xf32>
    %112 = vector.extract_strided_slice %105 {offsets = [0, 128], sizes = [8, 128], strides = [1, 1]} : vector<8x512xf32> to vector<8x128xf32>
    %113 = arith.negf %112 : vector<8x128xf32>
    %114 = math.exp %113 : vector<8x128xf32>
    %cst_39 = arith.constant 1.000000e+00 : f32
    %115 = vector.broadcast %cst_39 : f32 to vector<8x128xf32>
    %116 = arith.addf %115, %114 : vector<8x128xf32>
    %117 = arith.divf %115, %116 : vector<8x128xf32>
    %118 = vector.extract_strided_slice %105 {offsets = [0, 256], sizes = [8, 128], strides = [1, 1]} : vector<8x512xf32> to vector<8x128xf32>
    %119 = math.tanh %118 : vector<8x128xf32>
    %120 = vector.extract_strided_slice %105 {offsets = [0, 384], sizes = [8, 128], strides = [1, 1]} : vector<8x512xf32> to vector<8x128xf32>
    %121 = arith.negf %120 : vector<8x128xf32>
    %122 = math.exp %121 : vector<8x128xf32>
    %cst_40 = arith.constant 1.000000e+00 : f32
    %123 = vector.broadcast %cst_40 : f32 to vector<8x128xf32>
    %124 = arith.addf %123, %122 : vector<8x128xf32>
    %125 = arith.divf %123, %124 : vector<8x128xf32>
    %126 = arith.mulf %117, %46 : vector<8x128xf32>
    %127 = arith.mulf %111, %119 : vector<8x128xf32>
    %128 = arith.addf %126, %127 : vector<8x128xf32>
    %129 = math.tanh %128 : vector<8x128xf32>
    %130 = arith.mulf %125, %129 : vector<8x128xf32>
    %131 = arith.select %99, %130, %45 : vector<8x128xi1>, vector<8x128xf32>
    %132 = arith.select %99, %128, %46 : vector<8x128xi1>, vector<8x128xf32>
    %cst_41 = arith.constant 0.000000e+00 : f32
    %133 = vector.broadcast %cst_41 : f32 to vector<8x128xf32>
    %134 = arith.select %99, %130, %133 : vector<8x128xi1>, vector<8x128xf32>
    %135 = arith.index_cast %c1_i32 : i32 to index
    %c0_42 = arith.constant 0 : index
    %c0_43 = arith.constant 0 : index
    %136 = vector.load %arg6[%135, %c0_42, %c0_43] : memref<8x8x128xf32, #tpu.memory_space<vmem>>, vector<1x8x128xf32>
    %137 = vector.shape_cast %136 : vector<1x8x128xf32> to vector<8x128xf32>
    %138 = vector.shape_cast %134 : vector<8x128xf32> to vector<1x8x128xf32>
    tpu.vector_store %arg6[%135, %c0_42, %c0_43], %138 {strides = array<i32>} : memref<8x8x128xf32, #tpu.memory_space<vmem>>, vector<1x8x128xf32>,
    %c7_i32_44 = arith.constant 7 : i32
    %139 = arith.subi %c7_i32_44, %c1_i32 : i32
    %140 = arith.addi %6, %c1_i32 : i32
    %c7_i32_45 = arith.constant 7 : i32
    %141 = arith.subi %c7_i32_45, %140 : i32
    %142 = vector.broadcast %141 : i32 to vector<8x128xi32>
    %143 = arith.cmpi slt, %142, %5 : vector<8x128xi32>
    %144 = arith.index_cast %139 : i32 to index
    %c0_46 = arith.constant 0 : index
    %c0_47 = arith.constant 0 : index
    %145 = vector.load %arg3[%144, %c0_46, %c0_47] : memref<8x8x512xf32, #tpu.memory_space<vmem>>, vector<1x8x512xf32>
    %146 = vector.shape_cast %145 : vector<1x8x512xf32> to vector<8x512xf32>
    %c0_48 = arith.constant 0 : index
    %c0_49 = arith.constant 0 : index
    %147 = vector.load %arg5[%c0_48, %c0_49] : memref<128x512xf32, #tpu.memory_space<vmem>>, vector<128x512xf32>
    %cst_50 = arith.constant dense<0.000000e+00> : vector<8x512xf32>
    %148 = tpu.matmul %89, %147, %cst_50 {dimension_numbers = #tpu.dot_dimension_numbers<[1], [0], [0], [1], [0, 0, 1, 1], [], []>} : vector<8x128xf32>, vector<128x512xf32>, vector<8x512xf32> -> vector<8x512xf32>
    %149 = arith.addf %146, %148 : vector<8x512xf32>
    %150 = vector.extract_strided_slice %149 {offsets = [0, 0], sizes = [8, 128], strides = [1, 1]} : vector<8x512xf32> to vector<8x128xf32>
    %151 = arith.negf %150 : vector<8x128xf32>
    %152 = math.exp %151 : vector<8x128xf32>
    %cst_51 = arith.constant 1.000000e+00 : f32
    %153 = vector.broadcast %cst_51 : f32 to vector<8x128xf32>
    %154 = arith.addf %153, %152 : vector<8x128xf32>
    %155 = arith.divf %153, %154 : vector<8x128xf32>
    %156 = vector.extract_strided_slice %149 {offsets = [0, 128], sizes = [8, 128], strides = [1, 1]} : vector<8x512xf32> to vector<8x128xf32>
    %157 = arith.negf %156 : vector<8x128xf32>
    %158 = math.exp %157 : vector<8x128xf32>
    %cst_52 = arith.constant 1.000000e+00 : f32
    %159 = vector.broadcast %cst_52 : f32 to vector<8x128xf32>
    %160 = arith.addf %159, %158 : vector<8x128xf32>
    %161 = arith.divf %159, %160 : vector<8x128xf32>
    %162 = vector.extract_strided_slice %149 {offsets = [0, 256], sizes = [8, 128], strides = [1, 1]} : vector<8x512xf32> to vector<8x128xf32>
    %163 = math.tanh %162 : vector<8x128xf32>
    %164 = vector.extract_strided_slice %149 {offsets = [0, 384], sizes = [8, 128], strides = [1, 1]} : vector<8x512xf32> to vector<8x128xf32>
    %165 = arith.negf %164 : vector<8x128xf32>
    %166 = math.exp %165 : vector<8x128xf32>
    %cst_53 = arith.constant 1.000000e+00 : f32
    %167 = vector.broadcast %cst_53 : f32 to vector<8x128xf32>
    %168 = arith.addf %167, %166 : vector<8x128xf32>
    %169 = arith.divf %167, %168 : vector<8x128xf32>
    %170 = arith.mulf %161, %90 : vector<8x128xf32>
    %171 = arith.mulf %155, %163 : vector<8x128xf32>
    %172 = arith.addf %170, %171 : vector<8x128xf32>
    %173 = math.tanh %172 : vector<8x128xf32>
    %174 = arith.mulf %169, %173 : vector<8x128xf32>
    %175 = arith.select %143, %174, %89 : vector<8x128xi1>, vector<8x128xf32>
    %176 = arith.select %143, %172, %90 : vector<8x128xi1>, vector<8x128xf32>
    %cst_54 = arith.constant 0.000000e+00 : f32
    %177 = vector.broadcast %cst_54 : f32 to vector<8x128xf32>
    %178 = arith.select %143, %174, %177 : vector<8x128xi1>, vector<8x128xf32>
    %179 = arith.index_cast %139 : i32 to index
    %c0_55 = arith.constant 0 : index
    %c0_56 = arith.constant 0 : index
    %180 = vector.load %arg7[%179, %c0_55, %c0_56] : memref<8x8x128xf32, #tpu.memory_space<vmem>>, vector<1x8x128xf32>
    %181 = vector.shape_cast %180 : vector<1x8x128xf32> to vector<8x128xf32>
    %182 = vector.shape_cast %178 : vector<8x128xf32> to vector<1x8x128xf32>
    tpu.vector_store %arg7[%179, %c0_55, %c0_56], %182 {strides = array<i32>} : memref<8x8x128xf32, #tpu.memory_space<vmem>>, vector<1x8x128xf32>,
    %c2_i32 = arith.constant 2 : i32
    %183 = arith.addi %6, %c2_i32 : i32
    %184 = vector.broadcast %183 : i32 to vector<8x128xi32>
    %185 = arith.cmpi slt, %184, %5 : vector<8x128xi32>
    %186 = arith.index_cast %c2_i32 : i32 to index
    %c0_57 = arith.constant 0 : index
    %c0_58 = arith.constant 0 : index
    %187 = vector.load %arg2[%186, %c0_57, %c0_58] : memref<8x8x512xf32, #tpu.memory_space<vmem>>, vector<1x8x512xf32>
    %188 = vector.shape_cast %187 : vector<1x8x512xf32> to vector<8x512xf32>
    %c0_59 = arith.constant 0 : index
    %c0_60 = arith.constant 0 : index
    %189 = vector.load %arg4[%c0_59, %c0_60] : memref<128x512xf32, #tpu.memory_space<vmem>>, vector<128x512xf32>
    %cst_61 = arith.constant dense<0.000000e+00> : vector<8x512xf32>
    %190 = tpu.matmul %131, %189, %cst_61 {dimension_numbers = #tpu.dot_dimension_numbers<[1], [0], [0], [1], [0, 0, 1, 1], [], []>} : vector<8x128xf32>, vector<128x512xf32>, vector<8x512xf32> -> vector<8x512xf32>
    %191 = arith.addf %188, %190 : vector<8x512xf32>
    %192 = vector.extract_strided_slice %191 {offsets = [0, 0], sizes = [8, 128], strides = [1, 1]} : vector<8x512xf32> to vector<8x128xf32>
    %193 = arith.negf %192 : vector<8x128xf32>
    %194 = math.exp %193 : vector<8x128xf32>
    %cst_62 = arith.constant 1.000000e+00 : f32
    %195 = vector.broadcast %cst_62 : f32 to vector<8x128xf32>
    %196 = arith.addf %195, %194 : vector<8x128xf32>
    %197 = arith.divf %195, %196 : vector<8x128xf32>
    %198 = vector.extract_strided_slice %191 {offsets = [0, 128], sizes = [8, 128], strides = [1, 1]} : vector<8x512xf32> to vector<8x128xf32>
    %199 = arith.negf %198 : vector<8x128xf32>
    %200 = math.exp %199 : vector<8x128xf32>
    %cst_63 = arith.constant 1.000000e+00 : f32
    %201 = vector.broadcast %cst_63 : f32 to vector<8x128xf32>
    %202 = arith.addf %201, %200 : vector<8x128xf32>
    %203 = arith.divf %201, %202 : vector<8x128xf32>
    %204 = vector.extract_strided_slice %191 {offsets = [0, 256], sizes = [8, 128], strides = [1, 1]} : vector<8x512xf32> to vector<8x128xf32>
    %205 = math.tanh %204 : vector<8x128xf32>
    %206 = vector.extract_strided_slice %191 {offsets = [0, 384], sizes = [8, 128], strides = [1, 1]} : vector<8x512xf32> to vector<8x128xf32>
    %207 = arith.negf %206 : vector<8x128xf32>
    %208 = math.exp %207 : vector<8x128xf32>
    %cst_64 = arith.constant 1.000000e+00 : f32
    %209 = vector.broadcast %cst_64 : f32 to vector<8x128xf32>
    %210 = arith.addf %209, %208 : vector<8x128xf32>
    %211 = arith.divf %209, %210 : vector<8x128xf32>
    %212 = arith.mulf %203, %132 : vector<8x128xf32>
    %213 = arith.mulf %197, %205 : vector<8x128xf32>
    %214 = arith.addf %212, %213 : vector<8x128xf32>
    %215 = math.tanh %214 : vector<8x128xf32>
    %216 = arith.mulf %211, %215 : vector<8x128xf32>
    %217 = arith.select %185, %216, %131 : vector<8x128xi1>, vector<8x128xf32>
    %218 = arith.select %185, %214, %132 : vector<8x128xi1>, vector<8x128xf32>
    %cst_65 = arith.constant 0.000000e+00 : f32
    %219 = vector.broadcast %cst_65 : f32 to vector<8x128xf32>
    %220 = arith.select %185, %216, %219 : vector<8x128xi1>, vector<8x128xf32>
    %221 = arith.index_cast %c2_i32 : i32 to index
    %c0_66 = arith.constant 0 : index
    %c0_67 = arith.constant 0 : index
    %222 = vector.load %arg6[%221, %c0_66, %c0_67] : memref<8x8x128xf32, #tpu.memory_space<vmem>>, vector<1x8x128xf32>
    %223 = vector.shape_cast %222 : vector<1x8x128xf32> to vector<8x128xf32>
    %224 = vector.shape_cast %220 : vector<8x128xf32> to vector<1x8x128xf32>
    tpu.vector_store %arg6[%221, %c0_66, %c0_67], %224 {strides = array<i32>} : memref<8x8x128xf32, #tpu.memory_space<vmem>>, vector<1x8x128xf32>,
    %c7_i32_68 = arith.constant 7 : i32
    %225 = arith.subi %c7_i32_68, %c2_i32 : i32
    %226 = arith.addi %6, %c2_i32 : i32
    %c7_i32_69 = arith.constant 7 : i32
    %227 = arith.subi %c7_i32_69, %226 : i32
    %228 = vector.broadcast %227 : i32 to vector<8x128xi32>
    %229 = arith.cmpi slt, %228, %5 : vector<8x128xi32>
    %230 = arith.index_cast %225 : i32 to index
    %c0_70 = arith.constant 0 : index
    %c0_71 = arith.constant 0 : index
    %231 = vector.load %arg3[%230, %c0_70, %c0_71] : memref<8x8x512xf32, #tpu.memory_space<vmem>>, vector<1x8x512xf32>
    %232 = vector.shape_cast %231 : vector<1x8x512xf32> to vector<8x512xf32>
    %c0_72 = arith.constant 0 : index
    %c0_73 = arith.constant 0 : index
    %233 = vector.load %arg5[%c0_72, %c0_73] : memref<128x512xf32, #tpu.memory_space<vmem>>, vector<128x512xf32>
    %cst_74 = arith.constant dense<0.000000e+00> : vector<8x512xf32>
    %234 = tpu.matmul %175, %233, %cst_74 {dimension_numbers = #tpu.dot_dimension_numbers<[1], [0], [0], [1], [0, 0, 1, 1], [], []>} : vector<8x128xf32>, vector<128x512xf32>, vector<8x512xf32> -> vector<8x512xf32>
    %235 = arith.addf %232, %234 : vector<8x512xf32>
    %236 = vector.extract_strided_slice %235 {offsets = [0, 0], sizes = [8, 128], strides = [1, 1]} : vector<8x512xf32> to vector<8x128xf32>
    %237 = arith.negf %236 : vector<8x128xf32>
    %238 = math.exp %237 : vector<8x128xf32>
    %cst_75 = arith.constant 1.000000e+00 : f32
    %239 = vector.broadcast %cst_75 : f32 to vector<8x128xf32>
    %240 = arith.addf %239, %238 : vector<8x128xf32>
    %241 = arith.divf %239, %240 : vector<8x128xf32>
    %242 = vector.extract_strided_slice %235 {offsets = [0, 128], sizes = [8, 128], strides = [1, 1]} : vector<8x512xf32> to vector<8x128xf32>
    %243 = arith.negf %242 : vector<8x128xf32>
    %244 = math.exp %243 : vector<8x128xf32>
    %cst_76 = arith.constant 1.000000e+00 : f32
    %245 = vector.broadcast %cst_76 : f32 to vector<8x128xf32>
    %246 = arith.addf %245, %244 : vector<8x128xf32>
    %247 = arith.divf %245, %246 : vector<8x128xf32>
    %248 = vector.extract_strided_slice %235 {offsets = [0, 256], sizes = [8, 128], strides = [1, 1]} : vector<8x512xf32> to vector<8x128xf32>
    %249 = math.tanh %248 : vector<8x128xf32>
    %250 = vector.extract_strided_slice %235 {offsets = [0, 384], sizes = [8, 128], strides = [1, 1]} : vector<8x512xf32> to vector<8x128xf32>
    %251 = arith.negf %250 : vector<8x128xf32>
    %252 = math.exp %251 : vector<8x128xf32>
    %cst_77 = arith.constant 1.000000e+00 : f32
    %253 = vector.broadcast %cst_77 : f32 to vector<8x128xf32>
    %254 = arith.addf %253, %252 : vector<8x128xf32>
    %255 = arith.divf %253, %254 : vector<8x128xf32>
    %256 = arith.mulf %247, %176 : vector<8x128xf32>
    %257 = arith.mulf %241, %249 : vector<8x128xf32>
    %258 = arith.addf %256, %257 : vector<8x128xf32>
    %259 = math.tanh %258 : vector<8x128xf32>
    %260 = arith.mulf %255, %259 : vector<8x128xf32>
    %261 = arith.select %229, %260, %175 : vector<8x128xi1>, vector<8x128xf32>
    %262 = arith.select %229, %258, %176 : vector<8x128xi1>, vector<8x128xf32>
    %cst_78 = arith.constant 0.000000e+00 : f32
    %263 = vector.broadcast %cst_78 : f32 to vector<8x128xf32>
    %264 = arith.select %229, %260, %263 : vector<8x128xi1>, vector<8x128xf32>
    %265 = arith.index_cast %225 : i32 to index
    %c0_79 = arith.constant 0 : index
    %c0_80 = arith.constant 0 : index
    %266 = vector.load %arg7[%265, %c0_79, %c0_80] : memref<8x8x128xf32, #tpu.memory_space<vmem>>, vector<1x8x128xf32>
    %267 = vector.shape_cast %266 : vector<1x8x128xf32> to vector<8x128xf32>
    %268 = vector.shape_cast %264 : vector<8x128xf32> to vector<1x8x128xf32>
    tpu.vector_store %arg7[%265, %c0_79, %c0_80], %268 {strides = array<i32>} : memref<8x8x128xf32, #tpu.memory_space<vmem>>, vector<1x8x128xf32>,
    %c3_i32 = arith.constant 3 : i32
    %269 = arith.addi %6, %c3_i32 : i32
    %270 = vector.broadcast %269 : i32 to vector<8x128xi32>
    %271 = arith.cmpi slt, %270, %5 : vector<8x128xi32>
    %272 = arith.index_cast %c3_i32 : i32 to index
    %c0_81 = arith.constant 0 : index
    %c0_82 = arith.constant 0 : index
    %273 = vector.load %arg2[%272, %c0_81, %c0_82] : memref<8x8x512xf32, #tpu.memory_space<vmem>>, vector<1x8x512xf32>
    %274 = vector.shape_cast %273 : vector<1x8x512xf32> to vector<8x512xf32>
    %c0_83 = arith.constant 0 : index
    %c0_84 = arith.constant 0 : index
    %275 = vector.load %arg4[%c0_83, %c0_84] : memref<128x512xf32, #tpu.memory_space<vmem>>, vector<128x512xf32>
    %cst_85 = arith.constant dense<0.000000e+00> : vector<8x512xf32>
    %276 = tpu.matmul %217, %275, %cst_85 {dimension_numbers = #tpu.dot_dimension_numbers<[1], [0], [0], [1], [0, 0, 1, 1], [], []>} : vector<8x128xf32>, vector<128x512xf32>, vector<8x512xf32> -> vector<8x512xf32>
    %277 = arith.addf %274, %276 : vector<8x512xf32>
    %278 = vector.extract_strided_slice %277 {offsets = [0, 0], sizes = [8, 128], strides = [1, 1]} : vector<8x512xf32> to vector<8x128xf32>
    %279 = arith.negf %278 : vector<8x128xf32>
    %280 = math.exp %279 : vector<8x128xf32>
    %cst_86 = arith.constant 1.000000e+00 : f32
    %281 = vector.broadcast %cst_86 : f32 to vector<8x128xf32>
    %282 = arith.addf %281, %280 : vector<8x128xf32>
    %283 = arith.divf %281, %282 : vector<8x128xf32>
    %284 = vector.extract_strided_slice %277 {offsets = [0, 128], sizes = [8, 128], strides = [1, 1]} : vector<8x512xf32> to vector<8x128xf32>
    %285 = arith.negf %284 : vector<8x128xf32>
    %286 = math.exp %285 : vector<8x128xf32>
    %cst_87 = arith.constant 1.000000e+00 : f32
    %287 = vector.broadcast %cst_87 : f32 to vector<8x128xf32>
    %288 = arith.addf %287, %286 : vector<8x128xf32>
    %289 = arith.divf %287, %288 : vector<8x128xf32>
    %290 = vector.extract_strided_slice %277 {offsets = [0, 256], sizes = [8, 128], strides = [1, 1]} : vector<8x512xf32> to vector<8x128xf32>
    %291 = math.tanh %290 : vector<8x128xf32>
    %292 = vector.extract_strided_slice %277 {offsets = [0, 384], sizes = [8, 128], strides = [1, 1]} : vector<8x512xf32> to vector<8x128xf32>
    %293 = arith.negf %292 : vector<8x128xf32>
    %294 = math.exp %293 : vector<8x128xf32>
    %cst_88 = arith.constant 1.000000e+00 : f32
    %295 = vector.broadcast %cst_88 : f32 to vector<8x128xf32>
    %296 = arith.addf %295, %294 : vector<8x128xf32>
    %297 = arith.divf %295, %296 : vector<8x128xf32>
    %298 = arith.mulf %289, %218 : vector<8x128xf32>
    %299 = arith.mulf %283, %291 : vector<8x128xf32>
    %300 = arith.addf %298, %299 : vector<8x128xf32>
    %301 = math.tanh %300 : vector<8x128xf32>
    %302 = arith.mulf %297, %301 : vector<8x128xf32>
    %303 = arith.select %271, %302, %217 : vector<8x128xi1>, vector<8x128xf32>
    %304 = arith.select %271, %300, %218 : vector<8x128xi1>, vector<8x128xf32>
    %cst_89 = arith.constant 0.000000e+00 : f32
    %305 = vector.broadcast %cst_89 : f32 to vector<8x128xf32>
    %306 = arith.select %271, %302, %305 : vector<8x128xi1>, vector<8x128xf32>
    %307 = arith.index_cast %c3_i32 : i32 to index
    %c0_90 = arith.constant 0 : index
    %c0_91 = arith.constant 0 : index
    %308 = vector.load %arg6[%307, %c0_90, %c0_91] : memref<8x8x128xf32, #tpu.memory_space<vmem>>, vector<1x8x128xf32>
    %309 = vector.shape_cast %308 : vector<1x8x128xf32> to vector<8x128xf32>
    %310 = vector.shape_cast %306 : vector<8x128xf32> to vector<1x8x128xf32>
    tpu.vector_store %arg6[%307, %c0_90, %c0_91], %310 {strides = array<i32>} : memref<8x8x128xf32, #tpu.memory_space<vmem>>, vector<1x8x128xf32>,
    %c7_i32_92 = arith.constant 7 : i32
    %311 = arith.subi %c7_i32_92, %c3_i32 : i32
    %312 = arith.addi %6, %c3_i32 : i32
    %c7_i32_93 = arith.constant 7 : i32
    %313 = arith.subi %c7_i32_93, %312 : i32
    %314 = vector.broadcast %313 : i32 to vector<8x128xi32>
    %315 = arith.cmpi slt, %314, %5 : vector<8x128xi32>
    %316 = arith.index_cast %311 : i32 to index
    %c0_94 = arith.constant 0 : index
    %c0_95 = arith.constant 0 : index
    %317 = vector.load %arg3[%316, %c0_94, %c0_95] : memref<8x8x512xf32, #tpu.memory_space<vmem>>, vector<1x8x512xf32>
    %318 = vector.shape_cast %317 : vector<1x8x512xf32> to vector<8x512xf32>
    %c0_96 = arith.constant 0 : index
    %c0_97 = arith.constant 0 : index
    %319 = vector.load %arg5[%c0_96, %c0_97] : memref<128x512xf32, #tpu.memory_space<vmem>>, vector<128x512xf32>
    %cst_98 = arith.constant dense<0.000000e+00> : vector<8x512xf32>
    %320 = tpu.matmul %261, %319, %cst_98 {dimension_numbers = #tpu.dot_dimension_numbers<[1], [0], [0], [1], [0, 0, 1, 1], [], []>} : vector<8x128xf32>, vector<128x512xf32>, vector<8x512xf32> -> vector<8x512xf32>
    %321 = arith.addf %318, %320 : vector<8x512xf32>
    %322 = vector.extract_strided_slice %321 {offsets = [0, 0], sizes = [8, 128], strides = [1, 1]} : vector<8x512xf32> to vector<8x128xf32>
    %323 = arith.negf %322 : vector<8x128xf32>
    %324 = math.exp %323 : vector<8x128xf32>
    %cst_99 = arith.constant 1.000000e+00 : f32
    %325 = vector.broadcast %cst_99 : f32 to vector<8x128xf32>
    %326 = arith.addf %325, %324 : vector<8x128xf32>
    %327 = arith.divf %325, %326 : vector<8x128xf32>
    %328 = vector.extract_strided_slice %321 {offsets = [0, 128], sizes = [8, 128], strides = [1, 1]} : vector<8x512xf32> to vector<8x128xf32>
    %329 = arith.negf %328 : vector<8x128xf32>
    %330 = math.exp %329 : vector<8x128xf32>
    %cst_100 = arith.constant 1.000000e+00 : f32
    %331 = vector.broadcast %cst_100 : f32 to vector<8x128xf32>
    %332 = arith.addf %331, %330 : vector<8x128xf32>
    %333 = arith.divf %331, %332 : vector<8x128xf32>
    %334 = vector.extract_strided_slice %321 {offsets = [0, 256], sizes = [8, 128], strides = [1, 1]} : vector<8x512xf32> to vector<8x128xf32>
    %335 = math.tanh %334 : vector<8x128xf32>
    %336 = vector.extract_strided_slice %321 {offsets = [0, 384], sizes = [8, 128], strides = [1, 1]} : vector<8x512xf32> to vector<8x128xf32>
    %337 = arith.negf %336 : vector<8x128xf32>
    %338 = math.exp %337 : vector<8x128xf32>
    %cst_101 = arith.constant 1.000000e+00 : f32
    %339 = vector.broadcast %cst_101 : f32 to vector<8x128xf32>
    %340 = arith.addf %339, %338 : vector<8x128xf32>
    %341 = arith.divf %339, %340 : vector<8x128xf32>
    %342 = arith.mulf %333, %262 : vector<8x128xf32>
    %343 = arith.mulf %327, %335 : vector<8x128xf32>
    %344 = arith.addf %342, %343 : vector<8x128xf32>
    %345 = math.tanh %344 : vector<8x128xf32>
    %346 = arith.mulf %341, %345 : vector<8x128xf32>
    %347 = arith.select %315, %346, %261 : vector<8x128xi1>, vector<8x128xf32>
    %348 = arith.select %315, %344, %262 : vector<8x128xi1>, vector<8x128xf32>
    %cst_102 = arith.constant 0.000000e+00 : f32
    %349 = vector.broadcast %cst_102 : f32 to vector<8x128xf32>
    %350 = arith.select %315, %346, %349 : vector<8x128xi1>, vector<8x128xf32>
    %351 = arith.index_cast %311 : i32 to index
    %c0_103 = arith.constant 0 : index
    %c0_104 = arith.constant 0 : index
    %352 = vector.load %arg7[%351, %c0_103, %c0_104] : memref<8x8x128xf32, #tpu.memory_space<vmem>>, vector<1x8x128xf32>
    %353 = vector.shape_cast %352 : vector<1x8x128xf32> to vector<8x128xf32>
    %354 = vector.shape_cast %350 : vector<8x128xf32> to vector<1x8x128xf32>
    tpu.vector_store %arg7[%351, %c0_103, %c0_104], %354 {strides = array<i32>} : memref<8x8x128xf32, #tpu.memory_space<vmem>>, vector<1x8x128xf32>,
    %c4_i32 = arith.constant 4 : i32
    %355 = arith.addi %6, %c4_i32 : i32
    %356 = vector.broadcast %355 : i32 to vector<8x128xi32>
    %357 = arith.cmpi slt, %356, %5 : vector<8x128xi32>
    %358 = arith.index_cast %c4_i32 : i32 to index
    %c0_105 = arith.constant 0 : index
    %c0_106 = arith.constant 0 : index
    %359 = vector.load %arg2[%358, %c0_105, %c0_106] : memref<8x8x512xf32, #tpu.memory_space<vmem>>, vector<1x8x512xf32>
    %360 = vector.shape_cast %359 : vector<1x8x512xf32> to vector<8x512xf32>
    %c0_107 = arith.constant 0 : index
    %c0_108 = arith.constant 0 : index
    %361 = vector.load %arg4[%c0_107, %c0_108] : memref<128x512xf32, #tpu.memory_space<vmem>>, vector<128x512xf32>
    %cst_109 = arith.constant dense<0.000000e+00> : vector<8x512xf32>
    %362 = tpu.matmul %303, %361, %cst_109 {dimension_numbers = #tpu.dot_dimension_numbers<[1], [0], [0], [1], [0, 0, 1, 1], [], []>} : vector<8x128xf32>, vector<128x512xf32>, vector<8x512xf32> -> vector<8x512xf32>
    %363 = arith.addf %360, %362 : vector<8x512xf32>
    %364 = vector.extract_strided_slice %363 {offsets = [0, 0], sizes = [8, 128], strides = [1, 1]} : vector<8x512xf32> to vector<8x128xf32>
    %365 = arith.negf %364 : vector<8x128xf32>
    %366 = math.exp %365 : vector<8x128xf32>
    %cst_110 = arith.constant 1.000000e+00 : f32
    %367 = vector.broadcast %cst_110 : f32 to vector<8x128xf32>
    %368 = arith.addf %367, %366 : vector<8x128xf32>
    %369 = arith.divf %367, %368 : vector<8x128xf32>
    %370 = vector.extract_strided_slice %363 {offsets = [0, 128], sizes = [8, 128], strides = [1, 1]} : vector<8x512xf32> to vector<8x128xf32>
    %371 = arith.negf %370 : vector<8x128xf32>
    %372 = math.exp %371 : vector<8x128xf32>
    %cst_111 = arith.constant 1.000000e+00 : f32
    %373 = vector.broadcast %cst_111 : f32 to vector<8x128xf32>
    %374 = arith.addf %373, %372 : vector<8x128xf32>
    %375 = arith.divf %373, %374 : vector<8x128xf32>
    %376 = vector.extract_strided_slice %363 {offsets = [0, 256], sizes = [8, 128], strides = [1, 1]} : vector<8x512xf32> to vector<8x128xf32>
    %377 = math.tanh %376 : vector<8x128xf32>
    %378 = vector.extract_strided_slice %363 {offsets = [0, 384], sizes = [8, 128], strides = [1, 1]} : vector<8x512xf32> to vector<8x128xf32>
    %379 = arith.negf %378 : vector<8x128xf32>
    %380 = math.exp %379 : vector<8x128xf32>
    %cst_112 = arith.constant 1.000000e+00 : f32
    %381 = vector.broadcast %cst_112 : f32 to vector<8x128xf32>
    %382 = arith.addf %381, %380 : vector<8x128xf32>
    %383 = arith.divf %381, %382 : vector<8x128xf32>
    %384 = arith.mulf %375, %304 : vector<8x128xf32>
    %385 = arith.mulf %369, %377 : vector<8x128xf32>
    %386 = arith.addf %384, %385 : vector<8x128xf32>
    %387 = math.tanh %386 : vector<8x128xf32>
    %388 = arith.mulf %383, %387 : vector<8x128xf32>
    %389 = arith.select %357, %388, %303 : vector<8x128xi1>, vector<8x128xf32>
    %390 = arith.select %357, %386, %304 : vector<8x128xi1>, vector<8x128xf32>
    %cst_113 = arith.constant 0.000000e+00 : f32
    %391 = vector.broadcast %cst_113 : f32 to vector<8x128xf32>
    %392 = arith.select %357, %388, %391 : vector<8x128xi1>, vector<8x128xf32>
    %393 = arith.index_cast %c4_i32 : i32 to index
    %c0_114 = arith.constant 0 : index
    %c0_115 = arith.constant 0 : index
    %394 = vector.load %arg6[%393, %c0_114, %c0_115] : memref<8x8x128xf32, #tpu.memory_space<vmem>>, vector<1x8x128xf32>
    %395 = vector.shape_cast %394 : vector<1x8x128xf32> to vector<8x128xf32>
    %396 = vector.shape_cast %392 : vector<8x128xf32> to vector<1x8x128xf32>
    tpu.vector_store %arg6[%393, %c0_114, %c0_115], %396 {strides = array<i32>} : memref<8x8x128xf32, #tpu.memory_space<vmem>>, vector<1x8x128xf32>,
    %c7_i32_116 = arith.constant 7 : i32
    %397 = arith.subi %c7_i32_116, %c4_i32 : i32
    %398 = arith.addi %6, %c4_i32 : i32
    %c7_i32_117 = arith.constant 7 : i32
    %399 = arith.subi %c7_i32_117, %398 : i32
    %400 = vector.broadcast %399 : i32 to vector<8x128xi32>
    %401 = arith.cmpi slt, %400, %5 : vector<8x128xi32>
    %402 = arith.index_cast %397 : i32 to index
    %c0_118 = arith.constant 0 : index
    %c0_119 = arith.constant 0 : index
    %403 = vector.load %arg3[%402, %c0_118, %c0_119] : memref<8x8x512xf32, #tpu.memory_space<vmem>>, vector<1x8x512xf32>
    %404 = vector.shape_cast %403 : vector<1x8x512xf32> to vector<8x512xf32>
    %c0_120 = arith.constant 0 : index
    %c0_121 = arith.constant 0 : index
    %405 = vector.load %arg5[%c0_120, %c0_121] : memref<128x512xf32, #tpu.memory_space<vmem>>, vector<128x512xf32>
    %cst_122 = arith.constant dense<0.000000e+00> : vector<8x512xf32>
    %406 = tpu.matmul %347, %405, %cst_122 {dimension_numbers = #tpu.dot_dimension_numbers<[1], [0], [0], [1], [0, 0, 1, 1], [], []>} : vector<8x128xf32>, vector<128x512xf32>, vector<8x512xf32> -> vector<8x512xf32>
    %407 = arith.addf %404, %406 : vector<8x512xf32>
    %408 = vector.extract_strided_slice %407 {offsets = [0, 0], sizes = [8, 128], strides = [1, 1]} : vector<8x512xf32> to vector<8x128xf32>
    %409 = arith.negf %408 : vector<8x128xf32>
    %410 = math.exp %409 : vector<8x128xf32>
    %cst_123 = arith.constant 1.000000e+00 : f32
    %411 = vector.broadcast %cst_123 : f32 to vector<8x128xf32>
    %412 = arith.addf %411, %410 : vector<8x128xf32>
    %413 = arith.divf %411, %412 : vector<8x128xf32>
    %414 = vector.extract_strided_slice %407 {offsets = [0, 128], sizes = [8, 128], strides = [1, 1]} : vector<8x512xf32> to vector<8x128xf32>
    %415 = arith.negf %414 : vector<8x128xf32>
    %416 = math.exp %415 : vector<8x128xf32>
    %cst_124 = arith.constant 1.000000e+00 : f32
    %417 = vector.broadcast %cst_124 : f32 to vector<8x128xf32>
    %418 = arith.addf %417, %416 : vector<8x128xf32>
    %419 = arith.divf %417, %418 : vector<8x128xf32>
    %420 = vector.extract_strided_slice %407 {offsets = [0, 256], sizes = [8, 128], strides = [1, 1]} : vector<8x512xf32> to vector<8x128xf32>
    %421 = math.tanh %420 : vector<8x128xf32>
    %422 = vector.extract_strided_slice %407 {offsets = [0, 384], sizes = [8, 128], strides = [1, 1]} : vector<8x512xf32> to vector<8x128xf32>
    %423 = arith.negf %422 : vector<8x128xf32>
    %424 = math.exp %423 : vector<8x128xf32>
    %cst_125 = arith.constant 1.000000e+00 : f32
    %425 = vector.broadcast %cst_125 : f32 to vector<8x128xf32>
    %426 = arith.addf %425, %424 : vector<8x128xf32>
    %427 = arith.divf %425, %426 : vector<8x128xf32>
    %428 = arith.mulf %419, %348 : vector<8x128xf32>
    %429 = arith.mulf %413, %421 : vector<8x128xf32>
    %430 = arith.addf %428, %429 : vector<8x128xf32>
    %431 = math.tanh %430 : vector<8x128xf32>
    %432 = arith.mulf %427, %431 : vector<8x128xf32>
    %433 = arith.select %401, %432, %347 : vector<8x128xi1>, vector<8x128xf32>
    %434 = arith.select %401, %430, %348 : vector<8x128xi1>, vector<8x128xf32>
    %cst_126 = arith.constant 0.000000e+00 : f32
    %435 = vector.broadcast %cst_126 : f32 to vector<8x128xf32>
    %436 = arith.select %401, %432, %435 : vector<8x128xi1>, vector<8x128xf32>
    %437 = arith.index_cast %397 : i32 to index
    %c0_127 = arith.constant 0 : index
    %c0_128 = arith.constant 0 : index
    %438 = vector.load %arg7[%437, %c0_127, %c0_128] : memref<8x8x128xf32, #tpu.memory_space<vmem>>, vector<1x8x128xf32>
    %439 = vector.shape_cast %438 : vector<1x8x128xf32> to vector<8x128xf32>
    %440 = vector.shape_cast %436 : vector<8x128xf32> to vector<1x8x128xf32>
    tpu.vector_store %arg7[%437, %c0_127, %c0_128], %440 {strides = array<i32>} : memref<8x8x128xf32, #tpu.memory_space<vmem>>, vector<1x8x128xf32>,
    %c5_i32 = arith.constant 5 : i32
    %441 = arith.addi %6, %c5_i32 : i32
    %442 = vector.broadcast %441 : i32 to vector<8x128xi32>
    %443 = arith.cmpi slt, %442, %5 : vector<8x128xi32>
    %444 = arith.index_cast %c5_i32 : i32 to index
    %c0_129 = arith.constant 0 : index
    %c0_130 = arith.constant 0 : index
    %445 = vector.load %arg2[%444, %c0_129, %c0_130] : memref<8x8x512xf32, #tpu.memory_space<vmem>>, vector<1x8x512xf32>
    %446 = vector.shape_cast %445 : vector<1x8x512xf32> to vector<8x512xf32>
    %c0_131 = arith.constant 0 : index
    %c0_132 = arith.constant 0 : index
    %447 = vector.load %arg4[%c0_131, %c0_132] : memref<128x512xf32, #tpu.memory_space<vmem>>, vector<128x512xf32>
    %cst_133 = arith.constant dense<0.000000e+00> : vector<8x512xf32>
    %448 = tpu.matmul %389, %447, %cst_133 {dimension_numbers = #tpu.dot_dimension_numbers<[1], [0], [0], [1], [0, 0, 1, 1], [], []>} : vector<8x128xf32>, vector<128x512xf32>, vector<8x512xf32> -> vector<8x512xf32>
    %449 = arith.addf %446, %448 : vector<8x512xf32>
    %450 = vector.extract_strided_slice %449 {offsets = [0, 0], sizes = [8, 128], strides = [1, 1]} : vector<8x512xf32> to vector<8x128xf32>
    %451 = arith.negf %450 : vector<8x128xf32>
    %452 = math.exp %451 : vector<8x128xf32>
    %cst_134 = arith.constant 1.000000e+00 : f32
    %453 = vector.broadcast %cst_134 : f32 to vector<8x128xf32>
    %454 = arith.addf %453, %452 : vector<8x128xf32>
    %455 = arith.divf %453, %454 : vector<8x128xf32>
    %456 = vector.extract_strided_slice %449 {offsets = [0, 128], sizes = [8, 128], strides = [1, 1]} : vector<8x512xf32> to vector<8x128xf32>
    %457 = arith.negf %456 : vector<8x128xf32>
    %458 = math.exp %457 : vector<8x128xf32>
    %cst_135 = arith.constant 1.000000e+00 : f32
    %459 = vector.broadcast %cst_135 : f32 to vector<8x128xf32>
    %460 = arith.addf %459, %458 : vector<8x128xf32>
    %461 = arith.divf %459, %460 : vector<8x128xf32>
    %462 = vector.extract_strided_slice %449 {offsets = [0, 256], sizes = [8, 128], strides = [1, 1]} : vector<8x512xf32> to vector<8x128xf32>
    %463 = math.tanh %462 : vector<8x128xf32>
    %464 = vector.extract_strided_slice %449 {offsets = [0, 384], sizes = [8, 128], strides = [1, 1]} : vector<8x512xf32> to vector<8x128xf32>
    %465 = arith.negf %464 : vector<8x128xf32>
    %466 = math.exp %465 : vector<8x128xf32>
    %cst_136 = arith.constant 1.000000e+00 : f32
    %467 = vector.broadcast %cst_136 : f32 to vector<8x128xf32>
    %468 = arith.addf %467, %466 : vector<8x128xf32>
    %469 = arith.divf %467, %468 : vector<8x128xf32>
    %470 = arith.mulf %461, %390 : vector<8x128xf32>
    %471 = arith.mulf %455, %463 : vector<8x128xf32>
    %472 = arith.addf %470, %471 : vector<8x128xf32>
    %473 = math.tanh %472 : vector<8x128xf32>
    %474 = arith.mulf %469, %473 : vector<8x128xf32>
    %475 = arith.select %443, %474, %389 : vector<8x128xi1>, vector<8x128xf32>
    %476 = arith.select %443, %472, %390 : vector<8x128xi1>, vector<8x128xf32>
    %cst_137 = arith.constant 0.000000e+00 : f32
    %477 = vector.broadcast %cst_137 : f32 to vector<8x128xf32>
    %478 = arith.select %443, %474, %477 : vector<8x128xi1>, vector<8x128xf32>
    %479 = arith.index_cast %c5_i32 : i32 to index
    %c0_138 = arith.constant 0 : index
    %c0_139 = arith.constant 0 : index
    %480 = vector.load %arg6[%479, %c0_138, %c0_139] : memref<8x8x128xf32, #tpu.memory_space<vmem>>, vector<1x8x128xf32>
    %481 = vector.shape_cast %480 : vector<1x8x128xf32> to vector<8x128xf32>
    %482 = vector.shape_cast %478 : vector<8x128xf32> to vector<1x8x128xf32>
    tpu.vector_store %arg6[%479, %c0_138, %c0_139], %482 {strides = array<i32>} : memref<8x8x128xf32, #tpu.memory_space<vmem>>, vector<1x8x128xf32>,
    %c7_i32_140 = arith.constant 7 : i32
    %483 = arith.subi %c7_i32_140, %c5_i32 : i32
    %484 = arith.addi %6, %c5_i32 : i32
    %c7_i32_141 = arith.constant 7 : i32
    %485 = arith.subi %c7_i32_141, %484 : i32
    %486 = vector.broadcast %485 : i32 to vector<8x128xi32>
    %487 = arith.cmpi slt, %486, %5 : vector<8x128xi32>
    %488 = arith.index_cast %483 : i32 to index
    %c0_142 = arith.constant 0 : index
    %c0_143 = arith.constant 0 : index
    %489 = vector.load %arg3[%488, %c0_142, %c0_143] : memref<8x8x512xf32, #tpu.memory_space<vmem>>, vector<1x8x512xf32>
    %490 = vector.shape_cast %489 : vector<1x8x512xf32> to vector<8x512xf32>
    %c0_144 = arith.constant 0 : index
    %c0_145 = arith.constant 0 : index
    %491 = vector.load %arg5[%c0_144, %c0_145] : memref<128x512xf32, #tpu.memory_space<vmem>>, vector<128x512xf32>
    %cst_146 = arith.constant dense<0.000000e+00> : vector<8x512xf32>
    %492 = tpu.matmul %433, %491, %cst_146 {dimension_numbers = #tpu.dot_dimension_numbers<[1], [0], [0], [1], [0, 0, 1, 1], [], []>} : vector<8x128xf32>, vector<128x512xf32>, vector<8x512xf32> -> vector<8x512xf32>
    %493 = arith.addf %490, %492 : vector<8x512xf32>
    %494 = vector.extract_strided_slice %493 {offsets = [0, 0], sizes = [8, 128], strides = [1, 1]} : vector<8x512xf32> to vector<8x128xf32>
    %495 = arith.negf %494 : vector<8x128xf32>
    %496 = math.exp %495 : vector<8x128xf32>
    %cst_147 = arith.constant 1.000000e+00 : f32
    %497 = vector.broadcast %cst_147 : f32 to vector<8x128xf32>
    %498 = arith.addf %497, %496 : vector<8x128xf32>
    %499 = arith.divf %497, %498 : vector<8x128xf32>
    %500 = vector.extract_strided_slice %493 {offsets = [0, 128], sizes = [8, 128], strides = [1, 1]} : vector<8x512xf32> to vector<8x128xf32>
    %501 = arith.negf %500 : vector<8x128xf32>
    %502 = math.exp %501 : vector<8x128xf32>
    %cst_148 = arith.constant 1.000000e+00 : f32
    %503 = vector.broadcast %cst_148 : f32 to vector<8x128xf32>
    %504 = arith.addf %503, %502 : vector<8x128xf32>
    %505 = arith.divf %503, %504 : vector<8x128xf32>
    %506 = vector.extract_strided_slice %493 {offsets = [0, 256], sizes = [8, 128], strides = [1, 1]} : vector<8x512xf32> to vector<8x128xf32>
    %507 = math.tanh %506 : vector<8x128xf32>
    %508 = vector.extract_strided_slice %493 {offsets = [0, 384], sizes = [8, 128], strides = [1, 1]} : vector<8x512xf32> to vector<8x128xf32>
    %509 = arith.negf %508 : vector<8x128xf32>
    %510 = math.exp %509 : vector<8x128xf32>
    %cst_149 = arith.constant 1.000000e+00 : f32
    %511 = vector.broadcast %cst_149 : f32 to vector<8x128xf32>
    %512 = arith.addf %511, %510 : vector<8x128xf32>
    %513 = arith.divf %511, %512 : vector<8x128xf32>
    %514 = arith.mulf %505, %434 : vector<8x128xf32>
    %515 = arith.mulf %499, %507 : vector<8x128xf32>
    %516 = arith.addf %514, %515 : vector<8x128xf32>
    %517 = math.tanh %516 : vector<8x128xf32>
    %518 = arith.mulf %513, %517 : vector<8x128xf32>
    %519 = arith.select %487, %518, %433 : vector<8x128xi1>, vector<8x128xf32>
    %520 = arith.select %487, %516, %434 : vector<8x128xi1>, vector<8x128xf32>
    %cst_150 = arith.constant 0.000000e+00 : f32
    %521 = vector.broadcast %cst_150 : f32 to vector<8x128xf32>
    %522 = arith.select %487, %518, %521 : vector<8x128xi1>, vector<8x128xf32>
    %523 = arith.index_cast %483 : i32 to index
    %c0_151 = arith.constant 0 : index
    %c0_152 = arith.constant 0 : index
    %524 = vector.load %arg7[%523, %c0_151, %c0_152] : memref<8x8x128xf32, #tpu.memory_space<vmem>>, vector<1x8x128xf32>
    %525 = vector.shape_cast %524 : vector<1x8x128xf32> to vector<8x128xf32>
    %526 = vector.shape_cast %522 : vector<8x128xf32> to vector<1x8x128xf32>
    tpu.vector_store %arg7[%523, %c0_151, %c0_152], %526 {strides = array<i32>} : memref<8x8x128xf32, #tpu.memory_space<vmem>>, vector<1x8x128xf32>,
    %c6_i32 = arith.constant 6 : i32
    %527 = arith.addi %6, %c6_i32 : i32
    %528 = vector.broadcast %527 : i32 to vector<8x128xi32>
    %529 = arith.cmpi slt, %528, %5 : vector<8x128xi32>
    %530 = arith.index_cast %c6_i32 : i32 to index
    %c0_153 = arith.constant 0 : index
    %c0_154 = arith.constant 0 : index
    %531 = vector.load %arg2[%530, %c0_153, %c0_154] : memref<8x8x512xf32, #tpu.memory_space<vmem>>, vector<1x8x512xf32>
    %532 = vector.shape_cast %531 : vector<1x8x512xf32> to vector<8x512xf32>
    %c0_155 = arith.constant 0 : index
    %c0_156 = arith.constant 0 : index
    %533 = vector.load %arg4[%c0_155, %c0_156] : memref<128x512xf32, #tpu.memory_space<vmem>>, vector<128x512xf32>
    %cst_157 = arith.constant dense<0.000000e+00> : vector<8x512xf32>
    %534 = tpu.matmul %475, %533, %cst_157 {dimension_numbers = #tpu.dot_dimension_numbers<[1], [0], [0], [1], [0, 0, 1, 1], [], []>} : vector<8x128xf32>, vector<128x512xf32>, vector<8x512xf32> -> vector<8x512xf32>
    %535 = arith.addf %532, %534 : vector<8x512xf32>
    %536 = vector.extract_strided_slice %535 {offsets = [0, 0], sizes = [8, 128], strides = [1, 1]} : vector<8x512xf32> to vector<8x128xf32>
    %537 = arith.negf %536 : vector<8x128xf32>
    %538 = math.exp %537 : vector<8x128xf32>
    %cst_158 = arith.constant 1.000000e+00 : f32
    %539 = vector.broadcast %cst_158 : f32 to vector<8x128xf32>
    %540 = arith.addf %539, %538 : vector<8x128xf32>
    %541 = arith.divf %539, %540 : vector<8x128xf32>
    %542 = vector.extract_strided_slice %535 {offsets = [0, 128], sizes = [8, 128], strides = [1, 1]} : vector<8x512xf32> to vector<8x128xf32>
    %543 = arith.negf %542 : vector<8x128xf32>
    %544 = math.exp %543 : vector<8x128xf32>
    %cst_159 = arith.constant 1.000000e+00 : f32
    %545 = vector.broadcast %cst_159 : f32 to vector<8x128xf32>
    %546 = arith.addf %545, %544 : vector<8x128xf32>
    %547 = arith.divf %545, %546 : vector<8x128xf32>
    %548 = vector.extract_strided_slice %535 {offsets = [0, 256], sizes = [8, 128], strides = [1, 1]} : vector<8x512xf32> to vector<8x128xf32>
    %549 = math.tanh %548 : vector<8x128xf32>
    %550 = vector.extract_strided_slice %535 {offsets = [0, 384], sizes = [8, 128], strides = [1, 1]} : vector<8x512xf32> to vector<8x128xf32>
    %551 = arith.negf %550 : vector<8x128xf32>
    %552 = math.exp %551 : vector<8x128xf32>
    %cst_160 = arith.constant 1.000000e+00 : f32
    %553 = vector.broadcast %cst_160 : f32 to vector<8x128xf32>
    %554 = arith.addf %553, %552 : vector<8x128xf32>
    %555 = arith.divf %553, %554 : vector<8x128xf32>
    %556 = arith.mulf %547, %476 : vector<8x128xf32>
    %557 = arith.mulf %541, %549 : vector<8x128xf32>
    %558 = arith.addf %556, %557 : vector<8x128xf32>
    %559 = math.tanh %558 : vector<8x128xf32>
    %560 = arith.mulf %555, %559 : vector<8x128xf32>
    %561 = arith.select %529, %560, %475 : vector<8x128xi1>, vector<8x128xf32>
    %562 = arith.select %529, %558, %476 : vector<8x128xi1>, vector<8x128xf32>
    %cst_161 = arith.constant 0.000000e+00 : f32
    %563 = vector.broadcast %cst_161 : f32 to vector<8x128xf32>
    %564 = arith.select %529, %560, %563 : vector<8x128xi1>, vector<8x128xf32>
    %565 = arith.index_cast %c6_i32 : i32 to index
    %c0_162 = arith.constant 0 : index
    %c0_163 = arith.constant 0 : index
    %566 = vector.load %arg6[%565, %c0_162, %c0_163] : memref<8x8x128xf32, #tpu.memory_space<vmem>>, vector<1x8x128xf32>
    %567 = vector.shape_cast %566 : vector<1x8x128xf32> to vector<8x128xf32>
    %568 = vector.shape_cast %564 : vector<8x128xf32> to vector<1x8x128xf32>
    tpu.vector_store %arg6[%565, %c0_162, %c0_163], %568 {strides = array<i32>} : memref<8x8x128xf32, #tpu.memory_space<vmem>>, vector<1x8x128xf32>,
    %c7_i32_164 = arith.constant 7 : i32
    %569 = arith.subi %c7_i32_164, %c6_i32 : i32
    %570 = arith.addi %6, %c6_i32 : i32
    %c7_i32_165 = arith.constant 7 : i32
    %571 = arith.subi %c7_i32_165, %570 : i32
    %572 = vector.broadcast %571 : i32 to vector<8x128xi32>
    %573 = arith.cmpi slt, %572, %5 : vector<8x128xi32>
    %574 = arith.index_cast %569 : i32 to index
    %c0_166 = arith.constant 0 : index
    %c0_167 = arith.constant 0 : index
    %575 = vector.load %arg3[%574, %c0_166, %c0_167] : memref<8x8x512xf32, #tpu.memory_space<vmem>>, vector<1x8x512xf32>
    %576 = vector.shape_cast %575 : vector<1x8x512xf32> to vector<8x512xf32>
    %c0_168 = arith.constant 0 : index
    %c0_169 = arith.constant 0 : index
    %577 = vector.load %arg5[%c0_168, %c0_169] : memref<128x512xf32, #tpu.memory_space<vmem>>, vector<128x512xf32>
    %cst_170 = arith.constant dense<0.000000e+00> : vector<8x512xf32>
    %578 = tpu.matmul %519, %577, %cst_170 {dimension_numbers = #tpu.dot_dimension_numbers<[1], [0], [0], [1], [0, 0, 1, 1], [], []>} : vector<8x128xf32>, vector<128x512xf32>, vector<8x512xf32> -> vector<8x512xf32>
    %579 = arith.addf %576, %578 : vector<8x512xf32>
    %580 = vector.extract_strided_slice %579 {offsets = [0, 0], sizes = [8, 128], strides = [1, 1]} : vector<8x512xf32> to vector<8x128xf32>
    %581 = arith.negf %580 : vector<8x128xf32>
    %582 = math.exp %581 : vector<8x128xf32>
    %cst_171 = arith.constant 1.000000e+00 : f32
    %583 = vector.broadcast %cst_171 : f32 to vector<8x128xf32>
    %584 = arith.addf %583, %582 : vector<8x128xf32>
    %585 = arith.divf %583, %584 : vector<8x128xf32>
    %586 = vector.extract_strided_slice %579 {offsets = [0, 128], sizes = [8, 128], strides = [1, 1]} : vector<8x512xf32> to vector<8x128xf32>
    %587 = arith.negf %586 : vector<8x128xf32>
    %588 = math.exp %587 : vector<8x128xf32>
    %cst_172 = arith.constant 1.000000e+00 : f32
    %589 = vector.broadcast %cst_172 : f32 to vector<8x128xf32>
    %590 = arith.addf %589, %588 : vector<8x128xf32>
    %591 = arith.divf %589, %590 : vector<8x128xf32>
    %592 = vector.extract_strided_slice %579 {offsets = [0, 256], sizes = [8, 128], strides = [1, 1]} : vector<8x512xf32> to vector<8x128xf32>
    %593 = math.tanh %592 : vector<8x128xf32>
    %594 = vector.extract_strided_slice %579 {offsets = [0, 384], sizes = [8, 128], strides = [1, 1]} : vector<8x512xf32> to vector<8x128xf32>
    %595 = arith.negf %594 : vector<8x128xf32>
    %596 = math.exp %595 : vector<8x128xf32>
    %cst_173 = arith.constant 1.000000e+00 : f32
    %597 = vector.broadcast %cst_173 : f32 to vector<8x128xf32>
    %598 = arith.addf %597, %596 : vector<8x128xf32>
    %599 = arith.divf %597, %598 : vector<8x128xf32>
    %600 = arith.mulf %591, %520 : vector<8x128xf32>
    %601 = arith.mulf %585, %593 : vector<8x128xf32>
    %602 = arith.addf %600, %601 : vector<8x128xf32>
    %603 = math.tanh %602 : vector<8x128xf32>
    %604 = arith.mulf %599, %603 : vector<8x128xf32>
    %605 = arith.select %573, %604, %519 : vector<8x128xi1>, vector<8x128xf32>
    %606 = arith.select %573, %602, %520 : vector<8x128xi1>, vector<8x128xf32>
    %cst_174 = arith.constant 0.000000e+00 : f32
    %607 = vector.broadcast %cst_174 : f32 to vector<8x128xf32>
    %608 = arith.select %573, %604, %607 : vector<8x128xi1>, vector<8x128xf32>
    %609 = arith.index_cast %569 : i32 to index
    %c0_175 = arith.constant 0 : index
    %c0_176 = arith.constant 0 : index
    %610 = vector.load %arg7[%609, %c0_175, %c0_176] : memref<8x8x128xf32, #tpu.memory_space<vmem>>, vector<1x8x128xf32>
    %611 = vector.shape_cast %610 : vector<1x8x128xf32> to vector<8x128xf32>
    %612 = vector.shape_cast %608 : vector<8x128xf32> to vector<1x8x128xf32>
    tpu.vector_store %arg7[%609, %c0_175, %c0_176], %612 {strides = array<i32>} : memref<8x8x128xf32, #tpu.memory_space<vmem>>, vector<1x8x128xf32>,
    %c7_i32_177 = arith.constant 7 : i32
    %613 = arith.addi %6, %c7_i32_177 : i32
    %614 = vector.broadcast %613 : i32 to vector<8x128xi32>
    %615 = arith.cmpi slt, %614, %5 : vector<8x128xi32>
    %616 = arith.index_cast %c7_i32_177 : i32 to index
    %c0_178 = arith.constant 0 : index
    %c0_179 = arith.constant 0 : index
    %617 = vector.load %arg2[%616, %c0_178, %c0_179] : memref<8x8x512xf32, #tpu.memory_space<vmem>>, vector<1x8x512xf32>
    %618 = vector.shape_cast %617 : vector<1x8x512xf32> to vector<8x512xf32>
    %c0_180 = arith.constant 0 : index
    %c0_181 = arith.constant 0 : index
    %619 = vector.load %arg4[%c0_180, %c0_181] : memref<128x512xf32, #tpu.memory_space<vmem>>, vector<128x512xf32>
    %cst_182 = arith.constant dense<0.000000e+00> : vector<8x512xf32>
    %620 = tpu.matmul %561, %619, %cst_182 {dimension_numbers = #tpu.dot_dimension_numbers<[1], [0], [0], [1], [0, 0, 1, 1], [], []>} : vector<8x128xf32>, vector<128x512xf32>, vector<8x512xf32> -> vector<8x512xf32>
    %621 = arith.addf %618, %620 : vector<8x512xf32>
    %622 = vector.extract_strided_slice %621 {offsets = [0, 0], sizes = [8, 128], strides = [1, 1]} : vector<8x512xf32> to vector<8x128xf32>
    %623 = arith.negf %622 : vector<8x128xf32>
    %624 = math.exp %623 : vector<8x128xf32>
    %cst_183 = arith.constant 1.000000e+00 : f32
    %625 = vector.broadcast %cst_183 : f32 to vector<8x128xf32>
    %626 = arith.addf %625, %624 : vector<8x128xf32>
    %627 = arith.divf %625, %626 : vector<8x128xf32>
    %628 = vector.extract_strided_slice %621 {offsets = [0, 128], sizes = [8, 128], strides = [1, 1]} : vector<8x512xf32> to vector<8x128xf32>
    %629 = arith.negf %628 : vector<8x128xf32>
    %630 = math.exp %629 : vector<8x128xf32>
    %cst_184 = arith.constant 1.000000e+00 : f32
    %631 = vector.broadcast %cst_184 : f32 to vector<8x128xf32>
    %632 = arith.addf %631, %630 : vector<8x128xf32>
    %633 = arith.divf %631, %632 : vector<8x128xf32>
    %634 = vector.extract_strided_slice %621 {offsets = [0, 256], sizes = [8, 128], strides = [1, 1]} : vector<8x512xf32> to vector<8x128xf32>
    %635 = math.tanh %634 : vector<8x128xf32>
    %636 = vector.extract_strided_slice %621 {offsets = [0, 384], sizes = [8, 128], strides = [1, 1]} : vector<8x512xf32> to vector<8x128xf32>
    %637 = arith.negf %636 : vector<8x128xf32>
    %638 = math.exp %637 : vector<8x128xf32>
    %cst_185 = arith.constant 1.000000e+00 : f32
    %639 = vector.broadcast %cst_185 : f32 to vector<8x128xf32>
    %640 = arith.addf %639, %638 : vector<8x128xf32>
    %641 = arith.divf %639, %640 : vector<8x128xf32>
    %642 = arith.mulf %633, %562 : vector<8x128xf32>
    %643 = arith.mulf %627, %635 : vector<8x128xf32>
    %644 = arith.addf %642, %643 : vector<8x128xf32>
    %645 = math.tanh %644 : vector<8x128xf32>
    %646 = arith.mulf %641, %645 : vector<8x128xf32>
    %647 = arith.select %615, %646, %561 : vector<8x128xi1>, vector<8x128xf32>
    %648 = arith.select %615, %644, %562 : vector<8x128xi1>, vector<8x128xf32>
    %cst_186 = arith.constant 0.000000e+00 : f32
    %649 = vector.broadcast %cst_186 : f32 to vector<8x128xf32>
    %650 = arith.select %615, %646, %649 : vector<8x128xi1>, vector<8x128xf32>
    %651 = arith.index_cast %c7_i32_177 : i32 to index
    %c0_187 = arith.constant 0 : index
    %c0_188 = arith.constant 0 : index
    %652 = vector.load %arg6[%651, %c0_187, %c0_188] : memref<8x8x128xf32, #tpu.memory_space<vmem>>, vector<1x8x128xf32>
    %653 = vector.shape_cast %652 : vector<1x8x128xf32> to vector<8x128xf32>
    %654 = vector.shape_cast %650 : vector<8x128xf32> to vector<1x8x128xf32>
    tpu.vector_store %arg6[%651, %c0_187, %c0_188], %654 {strides = array<i32>} : memref<8x8x128xf32, #tpu.memory_space<vmem>>, vector<1x8x128xf32>,
    %c7_i32_189 = arith.constant 7 : i32
    %655 = arith.subi %c7_i32_189, %c7_i32_177 : i32
    %656 = arith.addi %6, %c7_i32_177 : i32
    %c7_i32_190 = arith.constant 7 : i32
    %657 = arith.subi %c7_i32_190, %656 : i32
    %658 = vector.broadcast %657 : i32 to vector<8x128xi32>
    %659 = arith.cmpi slt, %658, %5 : vector<8x128xi32>
    %660 = arith.index_cast %655 : i32 to index
    %c0_191 = arith.constant 0 : index
    %c0_192 = arith.constant 0 : index
    %661 = vector.load %arg3[%660, %c0_191, %c0_192] : memref<8x8x512xf32, #tpu.memory_space<vmem>>, vector<1x8x512xf32>
    %662 = vector.shape_cast %661 : vector<1x8x512xf32> to vector<8x512xf32>
    %c0_193 = arith.constant 0 : index
    %c0_194 = arith.constant 0 : index
    %663 = vector.load %arg5[%c0_193, %c0_194] : memref<128x512xf32, #tpu.memory_space<vmem>>, vector<128x512xf32>
    %cst_195 = arith.constant dense<0.000000e+00> : vector<8x512xf32>
    %664 = tpu.matmul %605, %663, %cst_195 {dimension_numbers = #tpu.dot_dimension_numbers<[1], [0], [0], [1], [0, 0, 1, 1], [], []>} : vector<8x128xf32>, vector<128x512xf32>, vector<8x512xf32> -> vector<8x512xf32>
    %665 = arith.addf %662, %664 : vector<8x512xf32>
    %666 = vector.extract_strided_slice %665 {offsets = [0, 0], sizes = [8, 128], strides = [1, 1]} : vector<8x512xf32> to vector<8x128xf32>
    %667 = arith.negf %666 : vector<8x128xf32>
    %668 = math.exp %667 : vector<8x128xf32>
    %cst_196 = arith.constant 1.000000e+00 : f32
    %669 = vector.broadcast %cst_196 : f32 to vector<8x128xf32>
    %670 = arith.addf %669, %668 : vector<8x128xf32>
    %671 = arith.divf %669, %670 : vector<8x128xf32>
    %672 = vector.extract_strided_slice %665 {offsets = [0, 128], sizes = [8, 128], strides = [1, 1]} : vector<8x512xf32> to vector<8x128xf32>
    %673 = arith.negf %672 : vector<8x128xf32>
    %674 = math.exp %673 : vector<8x128xf32>
    %cst_197 = arith.constant 1.000000e+00 : f32
    %675 = vector.broadcast %cst_197 : f32 to vector<8x128xf32>
    %676 = arith.addf %675, %674 : vector<8x128xf32>
    %677 = arith.divf %675, %676 : vector<8x128xf32>
    %678 = vector.extract_strided_slice %665 {offsets = [0, 256], sizes = [8, 128], strides = [1, 1]} : vector<8x512xf32> to vector<8x128xf32>
    %679 = math.tanh %678 : vector<8x128xf32>
    %680 = vector.extract_strided_slice %665 {offsets = [0, 384], sizes = [8, 128], strides = [1, 1]} : vector<8x512xf32> to vector<8x128xf32>
    %681 = arith.negf %680 : vector<8x128xf32>
    %682 = math.exp %681 : vector<8x128xf32>
    %cst_198 = arith.constant 1.000000e+00 : f32
    %683 = vector.broadcast %cst_198 : f32 to vector<8x128xf32>
    %684 = arith.addf %683, %682 : vector<8x128xf32>
    %685 = arith.divf %683, %684 : vector<8x128xf32>
    %686 = arith.mulf %677, %606 : vector<8x128xf32>
    %687 = arith.mulf %671, %679 : vector<8x128xf32>
    %688 = arith.addf %686, %687 : vector<8x128xf32>
    %689 = math.tanh %688 : vector<8x128xf32>
    %690 = arith.mulf %685, %689 : vector<8x128xf32>
    %691 = arith.select %659, %690, %605 : vector<8x128xi1>, vector<8x128xf32>
    %692 = arith.select %659, %688, %606 : vector<8x128xi1>, vector<8x128xf32>
    %cst_199 = arith.constant 0.000000e+00 : f32
    %693 = vector.broadcast %cst_199 : f32 to vector<8x128xf32>
    %694 = arith.select %659, %690, %693 : vector<8x128xi1>, vector<8x128xf32>
    %695 = arith.index_cast %655 : i32 to index
    %c0_200 = arith.constant 0 : index
    %c0_201 = arith.constant 0 : index
    %696 = vector.load %arg7[%695, %c0_200, %c0_201] : memref<8x8x128xf32, #tpu.memory_space<vmem>>, vector<1x8x128xf32>
    %697 = vector.shape_cast %696 : vector<1x8x128xf32> to vector<8x128xf32>
    %698 = vector.shape_cast %694 : vector<8x128xf32> to vector<1x8x128xf32>
    tpu.vector_store %arg7[%695, %c0_200, %c0_201], %698 {strides = array<i32>} : memref<8x8x128xf32, #tpu.memory_space<vmem>>, vector<1x8x128xf32>,
    %c8_i32_202 = arith.constant 8 : i32
    %c0_203 = arith.constant 0 : index
    %c0_204 = arith.constant 0 : index
    %699 = vector.load %arg8[%c0_203, %c0_204] : memref<8x128xf32, #tpu.memory_space<vmem>>, vector<8x128xf32>
    tpu.vector_store %arg8[%c0_203, %c0_204], %647 {strides = array<i32>} : memref<8x128xf32, #tpu.memory_space<vmem>>, vector<8x128xf32>,
    %c0_205 = arith.constant 0 : index
    %c0_206 = arith.constant 0 : index
    %700 = vector.load %arg9[%c0_205, %c0_206] : memref<8x128xf32, #tpu.memory_space<vmem>>, vector<8x128xf32>
    tpu.vector_store %arg9[%c0_205, %c0_206], %648 {strides = array<i32>} : memref<8x128xf32, #tpu.memory_space<vmem>>, vector<8x128xf32>,
    %c0_207 = arith.constant 0 : index
    %c0_208 = arith.constant 0 : index
    %701 = vector.load %arg10[%c0_207, %c0_208] : memref<8x128xf32, #tpu.memory_space<vmem>>, vector<8x128xf32>
    tpu.vector_store %arg10[%c0_207, %c0_208], %691 {strides = array<i32>} : memref<8x128xf32, #tpu.memory_space<vmem>>, vector<8x128xf32>,
    %c0_209 = arith.constant 0 : index
    %c0_210 = arith.constant 0 : index
    %702 = vector.load %arg11[%c0_209, %c0_210] : memref<8x128xf32, #tpu.memory_space<vmem>>, vector<8x128xf32>
    tpu.vector_store %arg11[%c0_209, %c0_210], %692 {strides = array<i32>} : memref<8x128xf32, #tpu.memory_space<vmem>>, vector<8x128xf32>,
    return
  }
  func.func @transform_0(%arg0: i32) -> (i32, i32) {
    %c0_i32 = arith.constant 0 : i32
    %c0_i32_0 = arith.constant 0 : i32
    %c0_i32_1 = arith.constant 0 : i32
    return %c0_i32, %c0_i32_0 : i32, i32
  }
  func.func @transform_1(%arg0: i32) -> (i32, i32, i32) {
    %c0_i32 = arith.constant 0 : i32
    %c0_i32_0 = arith.constant 0 : i32
    %c0_i32_1 = arith.constant 0 : i32
    return %arg0, %c0_i32, %c0_i32_0 : i32, i32, i32
  }
  func.func @transform_2(%arg0: i32) -> (i32, i32, i32) {
    %c0_i32 = arith.constant 0 : i32
    %0 = arith.subi %c0_i32, %arg0 : i32
    %c0_i32_0 = arith.constant 0 : i32
    %c1_i32 = arith.constant 1 : i32
    %c0_i32_1 = arith.constant 0 : i32
    return %0, %c0_i32_0, %c1_i32 : i32, i32, i32
  }
  func.func @transform_3(%arg0: i32) -> (i32, i32) {
    %c0_i32 = arith.constant 0 : i32
    %c0_i32_0 = arith.constant 0 : i32
    %c0_i32_1 = arith.constant 0 : i32
    return %c0_i32, %c0_i32_0 : i32, i32
  }
  func.func @transform_4(%arg0: i32) -> (i32, i32) {
    %c0_i32 = arith.constant 0 : i32
    %c0_i32_0 = arith.constant 0 : i32
    %c0_i32_1 = arith.constant 0 : i32
    return %c0_i32, %c0_i32_0 : i32, i32
  }
  func.func @transform_5(%arg0: i32) -> (i32, i32, i32) {
    %c0_i32 = arith.constant 0 : i32
    %c0_i32_0 = arith.constant 0 : i32
    %c0_i32_1 = arith.constant 0 : i32
    return %arg0, %c0_i32, %c0_i32_0 : i32, i32, i32
  }
  func.func @transform_6(%arg0: i32) -> (i32, i32, i32) {
    %c0_i32 = arith.constant 0 : i32
    %0 = arith.subi %c0_i32, %arg0 : i32
    %c0_i32_0 = arith.constant 0 : i32
    %c0_i32_1 = arith.constant 0 : i32
    %c0_i32_2 = arith.constant 0 : i32
    return %0, %c0_i32_0, %c0_i32_1 : i32, i32, i32
  }
}

</mosaic_0001>

<bundles_post_ra>
// kernel: encoder_rnn_forward.1
= control target key start
LH: loop header
LB: loop body
LE: loop exit
PB: predicated region body
PF: predicated region fallthrough
CT: control target
= control target key end

     0   :  { %v8710_v7 = vmov 0.0   ;;  %v5614_v13 = vmov 0   ;;  %s8703_s0 = inlined_call_operand.vmem [shape: s32[8,1], index: 0, kind: input, shape index: {}]   ;;  %s8704_s1 = inlined_call_operand.vmem [shape: f32[8,8,1024], index: 1, kind: input, shape index: {}, may-alias: {1,2}]   ;;  %s8705_s2 = inlined_call_operand.vmem [shape: f32[8,8,1024], index: 2, kind: input, shape index: {}, may-alias: {1,2}]   ;;  %s8706_s3 = inlined_call_operand.vmem [shape: f32[128,512], index: 3, kind: input, shape index: {}]   ;;  %s8707_s4 = inlined_call_operand.vmem [shape: f32[128,512], index: 4, kind: input, shape index: {}]   ;;  %s8708_s5 = inlined_call_operand.vmem [shape: f32[8,8,128], index: 5, kind: output, shape index: {0}]   ;;  %s8709_s6 = inlined_call_operand.vmem [shape: f32[8,8,128], index: 6, kind: output, shape index: {1}]  }
   0x1   :  { %v230_v0 = vld [vmem:[%s8706_s3 + $0x8] sm:$0xff]  ;;  %v229_v2 = vld [vmem:[%s8706_s3] sm:$0xff]  ;;  %357 = vmatprep.mubr.f32.mxu0 %v8710_v7  ;;  %428 = vmatprep.mubr.f32.mxu1 %v8710_v7  ;;  %v232_v20 = vld [vmem:[%s8706_s3 + $0x18] sm:$0xff] }
   0x2   :  { %v234_v1 = vld [vmem:[%s8706_s3 + $0x28] sm:$0xff]  ;;  %v233_v4 = vld [vmem:[%s8706_s3 + $0x20] sm:$0xff]  ;;  %5356 = vset.pattern.permute.xlu0 %v5614_v13  ;;  %v236_v21 = vld [vmem:[%s8706_s3 + $0x38] sm:$0xff] }
   0x3   :  { %v5659_v3 = vpack.c.bf16 %v234_v1, %v230_v0  ;;  %v238_v5 = vld [vmem:[%s8706_s3 + $0x48] sm:$0xff]  ;;  %v5672_v8 = vpack.c.bf16 %v233_v4, %v229_v2  ;;  %v237_v10 = vld [vmem:[%s8706_s3 + $0x40] sm:$0xff]  ;;  %v5713_v23 = vpack.c.bf16 %v236_v21, %v232_v20  ;;  %v231_v24 = vld [vmem:[%s8706_s3 + $0x10] sm:$0xff] }
   0x4   :  { %v242_v6 = vld [vmem:[%s8706_s3 + $0x68] sm:$0xff]  ;;  %v241_v11 = vld [vmem:[%s8706_s3 + $0x60] sm:$0xff]  ;;  %v235_v25 = vld [vmem:[%s8706_s3 + $0x30] sm:$0xff] }
   0x5   :  { %v5674_v9 = vpack.c.bf16 %v242_v6, %v238_v5  ;;  %v246_v12 = vld [vmem:[%s8706_s3 + $0x88] sm:$0xff]  ;;  %4331 = vmatprep.subr.bf16.mxu0 %v5659_v3  ;;  %v5690_v15 = vpack.c.bf16 %v241_v11, %v237_v10  ;;  %v245_v16 = vld [vmem:[%s8706_s3 + $0x80] sm:$0xff]  ;;  %v5721_v26 = vpack.c.bf16 %v235_v25, %v231_v24  ;;  %4363 = vmatprep.subr.bf16.mxu1 %v5713_v23  ;;  %v240_v28 = vld [vmem:[%s8706_s3 + $0x58] sm:$0xff] }
   0x6   :  { %v250_v14 = vld [vmem:[%s8706_s3 + $0xa8] sm:$0xff]  ;;  %4333 = vmatpush1.bf16.msra.mxu0 %v5672_v8  ;;  %v249_v17 = vld [vmem:[%s8706_s3 + $0xa0] sm:$0xff]  ;;  %v244_v29 = vld [vmem:[%s8706_s3 + $0x78] sm:$0xff] }
   0x7   :  { %4335 = vmatprep.subr.bf16.mxu0 %v5674_v9  ;;  %v5699_v18 = vpack.c.bf16 %v250_v14, %v246_v12  ;;  %v254_v19 = vld [vmem:[%s8706_s3 + $0xc8] sm:$0xff]  ;;  %v5724_v27 = vpack.c.bf16 %v249_v17, %v245_v16  ;;  %v239_v30 = vld [vmem:[%s8706_s3 + $0x50] sm:$0xff]  ;;  %v253_v32 = vld [vmem:[%s8706_s3 + $0xc0] sm:$0xff]  ;;  %4365 = vmatpush1.bf16.msra.mxu1 %v5721_v26  ;;  %v5746_v34 = vpack.c.bf16 %v244_v29, %v240_v28 }
   0x8   :  { %v258_v22 = vld [vmem:[%s8706_s3 + $0xe8] sm:$0xff]  ;;  %v257_v33 = vld [vmem:[%s8706_s3 + $0xe0] sm:$0xff]  ;;  %v243_v35 = vld [vmem:[%s8706_s3 + $0x70] sm:$0xff] }
   0x9   :  { %v5737_v31 = vpack.c.bf16 %v258_v22, %v254_v19  ;;  %v262_v36 = vld [vmem:[%s8706_s3 + $0x108] sm:$0xff]  ;;  %v5757_v38 = vpack.c.bf16 %v243_v35, %v239_v30  ;;  %v248_v39 = vld [vmem:[%s8706_s3 + $0x98] sm:$0xff]  ;;  %4367 = vmatprep.subr.bf16.mxu1 %v5746_v34  ;;  %v247_v41 = vld [vmem:[%s8706_s3 + $0x90] sm:$0xff]  ;;  %v5773_v43 = vpack.c.bf16 %v257_v33, %v253_v32 }
   0xa   :  { %4337 = vmatpush1.bf16.msra.mxu0 %v5690_v15  ;;  %v266_v37 = vld [vmem:[%s8706_s3 + $0x128] sm:$0xff]  ;;  %v252_v40 = vld [vmem:[%s8706_s3 + $0xb8] sm:$0xff]  ;;  %v251_v42 = vld [vmem:[%s8706_s3 + $0xb0] sm:$0xff] }
   0xb   :  { %4339 = vmatprep.subr.bf16.mxu0 %v5699_v18  ;;  %v261_v44 = vld [vmem:[%s8706_s3 + $0x100] sm:$0xff]  ;;  %v5781_v46 = vpack.c.bf16 %v252_v40, %v248_v39  ;;  %v5784_v47 = vpack.c.bf16 %v266_v37, %v262_v36  ;;  %4369 = vmatpush1.bf16.msra.mxu1 %v5757_v38  ;;  %v270_v48 = vld [vmem:[%s8706_s3 + $0x148] sm:$0xff]  ;;  %v5790_v49 = vpack.c.bf16 %v251_v42, %v247_v41  ;;  %v256_v50 = vld [vmem:[%s8706_s3 + $0xd8] sm:$0xff] }
   0xc   :  { %v265_v45 = vld [vmem:[%s8706_s3 + $0x120] sm:$0xff]  ;;  %v260_v51 = vld [vmem:[%s8706_s3 + $0xf8] sm:$0xff]  ;;  %v274_v52 = vld [vmem:[%s8706_s3 + $0x168] sm:$0xff] }
   0xd   :  { %4371 = vmatprep.subr.bf16.mxu1 %v5781_v46  ;;  %v5802_v53 = vpack.c.bf16 %v260_v51, %v256_v50  ;;  %v255_v54 = vld [vmem:[%s8706_s3 + $0xd0] sm:$0xff]  ;;  %v5811_v56 = vpack.c.bf16 %v265_v45, %v261_v44  ;;  %v264_v57 = vld [vmem:[%s8706_s3 + $0x118] sm:$0xff]  ;;  %v5820_v59 = vpack.c.bf16 %v274_v52, %v270_v48  ;;  %v269_v60 = vld [vmem:[%s8706_s3 + $0x140] sm:$0xff] }
   0xe   :  { %4341 = vmatpush1.bf16.msra.mxu0 %v5724_v27  ;;  %v259_v55 = vld [vmem:[%s8706_s3 + $0xf0] sm:$0xff]  ;;  %v268_v58 = vld [vmem:[%s8706_s3 + $0x138] sm:$0xff]  ;;  %v273_v61 = vld [vmem:[%s8706_s3 + $0x160] sm:$0xff] }
   0xf   :  { %4343 = vmatprep.subr.bf16.mxu0 %v5737_v31  ;;  %4373 = vmatpush1.bf16.msra.mxu1 %v5790_v49  ;;  %v278_v62 = vld [vmem:[%s8706_s3 + $0x188] sm:$0xff]  ;;  %v5832_v63 = vpack.c.bf16 %v259_v55, %v255_v54  ;;  %v5838_v1 = vpack.c.bf16 %v268_v58, %v264_v57  ;;  %v263_v2 = vld [vmem:[%s8706_s3 + $0x110] sm:$0xff]  ;;  %v272_v5 = vld [vmem:[%s8706_s3 + $0x158] sm:$0xff]  ;;  %v5853_v10 = vpack.c.bf16 %v273_v61, %v269_v60 }
  0x10   :  { %v282_v0 = vld [vmem:[%s8706_s3 + $0x1a8] sm:$0xff]  ;;  %4375 = vmatprep.subr.bf16.mxu1 %v5802_v53  ;;  %v267_v4 = vld [vmem:[%s8706_s3 + $0x130] sm:$0xff]  ;;  %v276_v6 = vld [vmem:[%s8706_s3 + $0x178] sm:$0xff] }
  0x11   :  { %v5856_v11 = vpack.c.bf16 %v282_v0, %v278_v62  ;;  %v277_v12 = vld [vmem:[%s8706_s3 + $0x180] sm:$0xff]  ;;  %v286_v14 = vld [vmem:[%s8706_s3 + $0x1c8] sm:$0xff]  ;;  %v5868_v16 = vpack.c.bf16 %v267_v4, %v263_v2  ;;  %v5874_v19 = vpack.c.bf16 %v276_v6, %v272_v5  ;;  %v271_v20 = vld [vmem:[%s8706_s3 + $0x150] sm:$0xff] }
  0x12   :  { %4345 = vmatpush1.bf16.msra.mxu0 %v5773_v43  ;;  %v281_v13 = vld [vmem:[%s8706_s3 + $0x1a0] sm:$0xff]  ;;  %v290_v17 = vld [vmem:[%s8706_s3 + $0x1e8] sm:$0xff]  ;;  %v275_v21 = vld [vmem:[%s8706_s3 + $0x170] sm:$0xff] }
  0x13   :  { %4347 = vmatprep.subr.bf16.mxu0 %v5784_v47  ;;  %4377 = vmatpush1.bf16.msra.mxu1 %v5832_v63  ;;  %v280_v22 = vld [vmem:[%s8706_s3 + $0x198] sm:$0xff]  ;;  %v5889_v25 = vpack.c.bf16 %v281_v13, %v277_v12  ;;  %v5892_v28 = vpack.c.bf16 %v290_v17, %v286_v14  ;;  %v285_v29 = vld [vmem:[%s8706_s3 + $0x1c0] sm:$0xff]  ;;  %v476_v32 = vld [vmem:[%s8707_s4 + $0x8] sm:$0xff]  ;;  %v5904_v33 = vpack.c.bf16 %v275_v21, %v271_v20 }
  0x14   :  { %4379 = vmatprep.subr.bf16.mxu1 %v5838_v1  ;;  %v284_v24 = vld [vmem:[%s8706_s3 + $0x1b8] sm:$0xff]  ;;  %v289_v30 = vld [vmem:[%s8706_s3 + $0x1e0] sm:$0xff]  ;;  %v480_v35 = vld [vmem:[%s8707_s4 + $0x28] sm:$0xff] }
  0x15   :  { %v5910_v36 = vpack.c.bf16 %v284_v24, %v280_v22  ;;  %v279_v37 = vld [vmem:[%s8706_s3 + $0x190] sm:$0xff]  ;;  %v288_v40 = vld [vmem:[%s8706_s3 + $0x1d8] sm:$0xff]  ;;  %v5925_v42 = vpack.c.bf16 %v289_v30, %v285_v29  ;;  %v5928_v44 = vpack.c.bf16 %v480_v35, %v476_v32  ;;  %v475_v45 = vld [vmem:[%s8707_s4] sm:$0xff] }
  0x16   :  { %4349 = vmatpush1.bf16.msra.mxu0 %v5811_v56  ;;  %v283_v39 = vld [vmem:[%s8706_s3 + $0x1b0] sm:$0xff]  ;;  %v292_v41 = vld [vmem:[%s8706_s3 + $0x1f8] sm:$0xff]  ;;  %v479_v48 = vld [vmem:[%s8707_s4 + $0x20] sm:$0xff] }
  0x17   :  { %4351 = vmatprep.subr.bf16.mxu0 %v5820_v59  ;;  %4381 = vmatpush1.bf16.msra.mxu1 %v5868_v16  ;;  %v484_v50 = vld [vmem:[%s8707_s4 + $0x48] sm:$0xff]  ;;  %v5940_v51 = vpack.c.bf16 %v283_v39, %v279_v37  ;;  %v5946_v54 = vpack.c.bf16 %v292_v41, %v288_v40  ;;  %v287_v55 = vld [vmem:[%s8706_s3 + $0x1d0] sm:$0xff]  ;;  %v478_v58 = vld [vmem:[%s8707_s4 + $0x18] sm:$0xff]  ;;  %v5961_v61 = vpack.c.bf16 %v479_v48, %v475_v45 }
  0x18   :  { %4383 = vmatprep.subr.bf16.mxu1 %v5874_v19  ;;  %v488_v52 = vld [vmem:[%s8707_s4 + $0x68] sm:$0xff]  ;;  %v291_v57 = vld [vmem:[%s8706_s3 + $0x1f0] sm:$0xff]  ;;  %v482_v60 = vld [vmem:[%s8707_s4 + $0x38] sm:$0xff] }
  0x19   :  { %v5964_v62 = vpack.c.bf16 %v488_v52, %v484_v50  ;;  %v483_v0 = vld [vmem:[%s8707_s4 + $0x40] sm:$0xff]  ;;  %v492_v4 = vld [vmem:[%s8707_s4 + $0x88] sm:$0xff]  ;;  %v5976_v5 = vpack.c.bf16 %v291_v57, %v287_v55  ;;  %v5982_v12 = vpack.c.bf16 %v482_v60, %v478_v58  ;;  %v477_v13 = vld [vmem:[%s8707_s4 + $0x10] sm:$0xff] }
  0x1a   :  { %4353 = vmatpush1.bf16.msra.mxu0 %v5853_v10  ;;  %v487_v2 = vld [vmem:[%s8707_s4 + $0x60] sm:$0xff]  ;;  %v496_v6 = vld [vmem:[%s8707_s4 + $0xa8] sm:$0xff]  ;;  %v481_v14 = vld [vmem:[%s8707_s4 + $0x30] sm:$0xff] }
  0x1b   :  { %4355 = vmatprep.subr.bf16.mxu0 %v5856_v11  ;;  %4385 = vmatpush1.bf16.msra.mxu1 %v5904_v33  ;;  %v486_v17 = vld [vmem:[%s8707_s4 + $0x58] sm:$0xff]  ;;  %v5998_v21 = vpack.c.bf16 %v487_v2, %v483_v0  ;;  %v6002_v22 = vpack.c.bf16 %v496_v6, %v492_v4  ;;  %v491_v24 = vld [vmem:[%s8707_s4 + $0x80] sm:$0xff]  ;;  %v500_v30 = vld [vmem:[%s8707_s4 + $0xc8] sm:$0xff]  ;;  %v6014_v32 = vpack.c.bf16 %v481_v14, %v477_v13 }
  0x1c   :  { %4387 = vmatprep.subr.bf16.mxu1 %v5910_v36  ;;  %v490_v20 = vld [vmem:[%s8707_s4 + $0x78] sm:$0xff]  ;;  %v495_v29 = vld [vmem:[%s8707_s4 + $0xa0] sm:$0xff]  ;;  %v504_v35 = vld [vmem:[%s8707_s4 + $0xe8] sm:$0xff] }
  0x1d   :  { %v6020_v37 = vpack.c.bf16 %v490_v20, %v486_v17  ;;  %v485_v39 = vld [vmem:[%s8707_s4 + $0x50] sm:$0xff]  ;;  %v494_v41 = vld [vmem:[%s8707_s4 + $0x98] sm:$0xff]  ;;  %v6035_v48 = vpack.c.bf16 %v495_v29, %v491_v24  ;;  %v499_v50 = vld [vmem:[%s8707_s4 + $0xc0] sm:$0xff]  ;;  %v6042_v52 = vpack.c.bf16 %v504_v35, %v500_v30 }
  0x1e   :  { %4357 = vmatpush1.bf16.msra.mxu0 %v5889_v25  ;;  %v489_v40 = vld [vmem:[%s8707_s4 + $0x70] sm:$0xff]  ;;  %v498_v45 = vld [vmem:[%s8707_s4 + $0xb8] sm:$0xff]  ;;  %v503_v55 = vld [vmem:[%s8707_s4 + $0xe0] sm:$0xff] }
  0x1f   :  { %4359 = vmatprep.subr.bf16.mxu0 %v5892_v28  ;;  %4389 = vmatpush1.bf16.msra.mxu1 %v5940_v51  ;;  %v508_v57 = vld [vmem:[%s8707_s4 + $0x108] sm:$0xff]  ;;  %v6054_v60 = vpack.c.bf16 %v489_v40, %v485_v39  ;;  %v6057_v0 = vpack.c.bf16 %v498_v45, %v494_v41  ;;  %v493_v2 = vld [vmem:[%s8707_s4 + $0x90] sm:$0xff]  ;;  %v214_v6 = vld [vmem:[%s8703_s0] sm:$0xff]  ;;  %v6076_v17 = vpack.c.bf16 %v503_v55, %v499_v50 }
  0x20   :  { %4391 = vmatprep.subr.bf16.mxu1 %v5946_v54  ;;  %v512_v58 = vld [vmem:[%s8707_s4 + $0x128] sm:$0xff]  ;;  %v497_v4 = vld [vmem:[%s8707_s4 + $0xb0] sm:$0xff]  ;;  %v502_v13 = vld [vmem:[%s8707_s4 + $0xd8] sm:$0xff]  ;;  %216 = vperm.xlu0 %5356, %v214_v6  }
  0x21   :  { %v506_v14 = vld [vmem:[%s8707_s4 + $0xf8] sm:$0xff]  ;;  %v6079_v20 = vpack.c.bf16 %v512_v58, %v508_v57  ;;  %v507_v24 = vld [vmem:[%s8707_s4 + $0x100] sm:$0xff]  ;;  %v516_v30 = vld [vmem:[%s8707_s4 + $0x148] sm:$0xff]  ;;  %v6091_v35 = vpack.c.bf16 %v497_v4, %v493_v2 }
  0x22   :  { %4361 = vmatpush1.bf16.msra.mxu0 %v5925_v42  ;;  %v511_v29 = vld [vmem:[%s8707_s4 + $0x120] sm:$0xff]  ;;  %v520_v39 = vld [vmem:[%s8707_s4 + $0x168] sm:$0xff]  ;;  %v6097_v40 = vpack.c.bf16 %v506_v14, %v502_v13  ;;  %v501_v41 = vld [vmem:[%s8707_s4 + $0xd0] sm:$0xff] }
  0x23   :  { %4395 = vmatprep.subr.bf16.mxu0 %v5928_v44  ;;  %4393 = vmatpush1.bf16.msra.mxu1 %v5976_v5  ;;  %8761 = vst [vmem:[#allocation8_spill] sm:$0xff] %v6079_v20  ;;  %v505_v45 = vld [vmem:[%s8707_s4 + $0xf0] sm:$0xff]  ;;  %v510_v50 = vld [vmem:[%s8707_s4 + $0x118] sm:$0xff]  ;;  %v6112_v57 = vpack.c.bf16 %v511_v29, %v507_v24  ;;  %v6115_v58 = vpack.c.bf16 %v520_v39, %v516_v30  ;;  %v515_v2 = vld [vmem:[%s8707_s4 + $0x140] sm:$0xff] }
  0x24   :  { %4427 = vmatprep.subr.bf16.mxu1 %v5982_v12  ;;  %v514_v55 = vld [vmem:[%s8707_s4 + $0x138] sm:$0xff]  ;;  %v519_v4 = vld [vmem:[%s8707_s4 + $0x160] sm:$0xff]  ;;  %v524_v6 = vld [vmem:[%s8707_s4 + $0x188] sm:$0xff]  ;;  %v6127_v13 = vpack.c.bf16 %v505_v45, %v501_v41 }
  0x25   :  { %358 = vmatmul.mubr.f32.vlgmr.msra.gmra.mrb[0].mxu0 %v8710_v7  ;;  %8762 = vst [vmem:[#allocation9_spill] sm:$0xff] %v6112_v57  ;;  %8763 = vst [vmem:[#allocation10_spill] sm:$0xff] %v6115_v58  ;;  %v528_v14 = vld [vmem:[%s8707_s4 + $0x1a8] sm:$0xff]  ;;  %v6133_v24 = vpack.c.bf16 %v514_v55, %v510_v50  ;;  %v509_v29 = vld [vmem:[%s8707_s4 + $0x110] sm:$0xff]  ;;  %v6148_v45 = vpack.c.bf16 %v519_v4, %v515_v2 }
  0x26   :  { %4397 = vmatpush1.bf16.msra.mxu0 %v5961_v61  ;;  %603 = vmatprep.mubr.f32.mxu0 %v8710_v7  ;;  %8764 = vst [vmem:[#allocation11_spill] sm:$0xff] %v6127_v13  ;;  %v513_v30 = vld [vmem:[%s8707_s4 + $0x130] sm:$0xff]  ;;  %v518_v39 = vld [vmem:[%s8707_s4 + $0x158] sm:$0xff]  ;;  %v6151_v50 = vpack.c.bf16 %v528_v14, %v524_v6  ;;  %v523_v55 = vld [vmem:[%s8707_s4 + $0x180] sm:$0xff] }
  0x27   :  { %4399 = vmatprep.subr.bf16.mxu0 %v5964_v62  ;;  %429 = vmatmul.mubr.f32.vlgmr.msra.gmra.mrb[0].mxu1 %v8710_v7  ;;  %8765 = vst [vmem:[#allocation12_spill] sm:$0xff] %v6133_v24  ;;  %v522_v41 = vld [vmem:[%s8707_s4 + $0x178] sm:$0xff]  ;;  %v6163_v2 = vpack.c.bf16 %v513_v30, %v509_v29  ;;  %v536_v4 = vld [vmem:[%s8707_s4 + $0x1e8] sm:$0xff]  ;;  %v517_v14 = vld [vmem:[%s8707_s4 + $0x150] sm:$0xff] }
  0x28   :  { %4429 = vmatpush1.bf16.msra.mxu1 %v6014_v32  ;;  %674 = vmatprep.mubr.f32.mxu1 %v8710_v7  ;;  %8766 = vst [vmem:[#allocation13_spill] sm:$0xff] %v6151_v50  ;;  %v527_v7 = vld [vmem:[%s8707_s4 + $0x1a0] sm:$0xff]  ;;  %v6169_v6 = vpack.c.bf16 %v522_v41, %v518_v39  ;;  %v526_v29 = vld [vmem:[%s8707_s4 + $0x198] sm:$0xff] }
  0x29   :  { %4431 = vmatprep.subr.bf16.mxu1 %v6020_v37  ;;  %v530_v30 = vld [vmem:[%s8707_s4 + $0x1b8] sm:$0xff]  ;;  %v6184_v39 = vpack.c.bf16 %v527_v7, %v523_v55  ;;  %v529_v55 = vld [vmem:[%s8707_s4 + $0x1b0] sm:$0xff] }
  0x2a   :  { %4401 = vmatpush1.bf16.msra.mxu0 %v5998_v21  ;;  %v6199_v7 = vpack.c.bf16 %v530_v30, %v526_v29 }
  0x2b   :  { %4403 = vmatprep.subr.bf16.mxu0 %v6002_v22  ;;  %8767 = vst [vmem:[#allocation14_spill] sm:$0xff] %v6184_v39 }
  0x2c   :  { %4433 = vmatpush1.bf16.msra.mxu1 %v6054_v60 }
  0x2d   :  { %4435 = vmatprep.subr.bf16.mxu1 %v6057_v0 }
  0x2e   :  { %4405 = vmatpush1.bf16.msra.mxu0 %v6035_v48 }
  0x2f   :  { %4407 = vmatprep.subr.bf16.mxu0 %v6042_v52 }
  0x30   :  { %4437 = vmatpush1.bf16.msra.mxu1 %v6091_v35 }
  0x31   :  { %4439 = vmatprep.subr.bf16.mxu1 %v6097_v40 }
  0x32   :  { %4409 = vmatpush1.bf16.msra.mxu0 %v6076_v17 }
  0x33   :  { %4411 = vmatprep.subr.bf16.mxu0 %v6079_v20  ;;  %v535_v20 = vld [vmem:[%s8707_s4 + $0x1e0] sm:$0xff] }
  0x34   :  { %4441 = vmatpush1.bf16.msra.mxu1 %v6127_v13 }
  0x35   :  { %4443 = vmatprep.subr.bf16.mxu1 %v6133_v24  ;;  %v531_v24 = vld [vmem:[%s8707_s4 + $0x1c0] sm:$0xff] }
  0x36   :  { %4413 = vmatpush1.bf16.msra.mxu0 %v6112_v57  ;;  %v532_v57 = vld [vmem:[%s8707_s4 + $0x1c8] sm:$0xff] }
  0x37   :  { %4415 = vmatprep.subr.bf16.mxu0 %v6115_v58  ;;  %v521_v58 = vld [vmem:[%s8707_s4 + $0x170] sm:$0xff]  ;;  %v6187_v41 = vpack.c.bf16 %v536_v4, %v532_v57  ;;  %v534_v4 = vld [vmem:[%s8707_s4 + $0x1d8] sm:$0xff] }
  0x38   :  { %4445 = vmatpush1.bf16.msra.mxu1 %v6163_v2  ;;  %v6196_v13 = vpack.c.bf16 %v521_v58, %v517_v14  ;;  %v525_v57 = vld [vmem:[%s8707_s4 + $0x190] sm:$0xff]  ;;  %v538_v58 = vld [vmem:[%s8707_s4 + $0x1f8] sm:$0xff]  ;;  %v6214_v14 = vpack.c.bf16 %v535_v20, %v531_v24  ;;  %v8768_v24 = vmov 0.0  }
  0x39   :  { %4447 = vmatprep.subr.bf16.mxu1 %v6169_v6  ;;  %v6218_v29 = vpack.c.bf16 %v529_v55, %v525_v57  ;;  %v6221_v30 = vpack.c.bf16 %v538_v58, %v534_v4  ;;  %v4246_v58 = vld [vmem:[%s8705_s2 + $0x1f0] sm:$0xff] }
  0x3a   :  { %4417 = vmatpush1.bf16.msra.mxu0 %v6148_v45 }
  0x3b   :  { %4419 = vmatprep.subr.bf16.mxu0 %v6151_v50  ;;  %v533_v50 = vld [vmem:[%s8707_s4 + $0x1d0] sm:$0xff] }
  0x3c   :  { %4449 = vmatpush1.bf16.msra.mxu1 %v6196_v13 }
  0x3d   :  { %4451 = vmatprep.subr.bf16.mxu1 %v6199_v7 }
  0x3e   :  { %4421 = vmatpush1.bf16.msra.mxu0 %v6184_v39  ;;  %v537_v39 = vld [vmem:[%s8707_s4 + $0x1f0] sm:$0xff] }
  0x3f   :  { %4423 = vmatprep.subr.bf16.mxu0 %v6187_v41  ;;  %v6231_v20 = vpack.c.bf16 %v537_v39, %v533_v50  ;;  %v4247_v39 = vld [vmem:[%s8705_s2 + $0x1f8] sm:$0xff] }
  0x40   :  { %4453 = vmatpush1.bf16.msra.mxu1 %v6218_v29 }
  0x41   :  { %4455 = vmatprep.subr.bf16.mxu1 %v6221_v30 }
  0x42   :  { %4425 = vmatpush1.bf16.msra.mxu0 %v6214_v14 }
  0x43   :  { %4459 = vmatprep.subr.bf16.mxu0 %v5659_v3  ;;  %v28_v3 = vld [vmem:[%s8704_s1] sm:$0xff] }
  0x44   :  { %4457 = vmatpush1.bf16.msra.mxu1 %v6231_v20 }
  0x45   :  { %604 = vmatmul.mubr.f32.vlgmr.msra.gmra.mrb[2].mxu0 %v8768_v24  ;;  %4491 = vmatprep.subr.bf16.mxu1 %v5713_v23 }
  0x46   :  { %4461 = vmatpush1.bf16.msra.mxu0 %v5672_v8  ;;  %850 = vmatprep.mubr.f32.mxu0 %v8768_v24  ;;  %v30_v8 = vld [vmem:[%s8704_s1 + $0x8] sm:$0xff] }
  0x47   :  { %4463 = vmatprep.subr.bf16.mxu0 %v5674_v9  ;;  %675 = vmatmul.mubr.f32.vlgmr.msra.gmra.mrb[2].mxu1 %v8768_v24 }
  0x48   :  { %4493 = vmatpush1.bf16.msra.mxu1 %v5721_v26  ;;  %921 = vmatprep.mubr.f32.mxu1 %v8768_v24 }
  0x49   :  { %4495 = vmatprep.subr.bf16.mxu1 %v5746_v34 }
  0x4a   :  { %4465 = vmatpush1.bf16.msra.mxu0 %v5690_v15 }
  0x4b   :  { %4467 = vmatprep.subr.bf16.mxu0 %v5699_v18 }
  0x4c   :  { %4497 = vmatpush1.bf16.msra.mxu1 %v5757_v38 }
  0x4d   :  { %4499 = vmatprep.subr.bf16.mxu1 %v5781_v46  ;;  %v32_v46 = vld [vmem:[%s8704_s1 + $0x10] sm:$0xff] }
  0x4e   :  { %4469 = vmatpush1.bf16.msra.mxu0 %v5724_v27 }
  0x4f   :  { %4471 = vmatprep.subr.bf16.mxu0 %v5737_v31  ;;  %v34_v31 = vld [vmem:[%s8704_s1 + $0x18] sm:$0xff] }
  0x50   :  { %4501 = vmatpush1.bf16.msra.mxu1 %v5790_v49 }
  0x51   :  { %4503 = vmatprep.subr.bf16.mxu1 %v5802_v53 }
  0x52   :  { %4473 = vmatpush1.bf16.msra.mxu0 %v5773_v43 }
  0x53   :  { %4475 = vmatprep.subr.bf16.mxu0 %v5784_v47 }
  0x54   :  { %4505 = vmatpush1.bf16.msra.mxu1 %v5832_v63 }
  0x55   :  { %4507 = vmatprep.subr.bf16.mxu1 %v5838_v1 }
  0x56   :  { %4477 = vmatpush1.bf16.msra.mxu0 %v5811_v56 }
  0x57   :  { %4479 = vmatprep.subr.bf16.mxu0 %v5820_v59 }
  0x58   :  { %4509 = vmatpush1.bf16.msra.mxu1 %v5868_v16 }
  0x59   :  { %4511 = vmatprep.subr.bf16.mxu1 %v5874_v19 }
  0x5a   :  { %4481 = vmatpush1.bf16.msra.mxu0 %v5853_v10 }
  0x5b   :  { %4483 = vmatprep.subr.bf16.mxu0 %v5856_v11 }
  0x5c   :  { %4513 = vmatpush1.bf16.msra.mxu1 %v5904_v33  ;;  %v4244_v33 = vld [vmem:[%s8705_s2 + $0x1e0] sm:$0xff] }
  0x5d   :  { %4515 = vmatprep.subr.bf16.mxu1 %v5910_v36  ;;  %v4245_v36 = vld [vmem:[%s8705_s2 + $0x1e8] sm:$0xff] }
  0x5e   :  { %4485 = vmatpush1.bf16.msra.mxu0 %v5889_v25 }
  0x5f   :  { %4487 = vmatprep.subr.bf16.mxu0 %v5892_v28 }
  0x60   :  { %4517 = vmatpush1.bf16.msra.mxu1 %v5940_v51 }
  0x61   :  { %4519 = vmatprep.subr.bf16.mxu1 %v5946_v54 }
  0x62   :  { %4489 = vmatpush1.bf16.msra.mxu0 %v5925_v42 }
  0x63   :  { %4523 = vmatprep.subr.bf16.mxu0 %v5928_v44 }
  0x64   :  { %4521 = vmatpush1.bf16.msra.mxu1 %v5976_v5 }
  0x65   :  { %4555 = vmatprep.subr.bf16.mxu1 %v5982_v12 }
  0xf8   :  { %v359_v9 = vpop.f32.mrb[0].mxu0 }
  0xf9   :  { %v435_v15 = vadd.f32 %v359_v9, %v28_v3  ;;  %v361_v18 = vpop.f32.mrb[1].mxu0 }
  0xfa   :  { %v436_v23 = vadd.f32 %v361_v18, %v30_v8  ;;  %v430_v34 = vpop.f32.mrb[0].mxu1  ;;  %v6300_v8 = vpop.permute.xlu0 %216 }
  0xfb   :  { %v4249_v26 = vmul.f32 -1.442695, %v435_v15  ;;  %v432_v38 = vpop.f32.mrb[1].mxu1  ;;  %v437_v49 = vadd.f32 %v430_v34, %v32_v46  ;;  %vm4248_vm0 = vcmp.gt.s32.totalorder %v6300_v8, 0  ;;  %v8775_v46 = vld [vmem:[#allocation14_spill] sm:$0xff]  ;;  %vm4252_vm1 = vcmp.gt.s32.totalorder %v6300_v8, 7 }
  0xfc   :  { %v4250_v27 = vmul.f32 -1.442695, %v436_v23  ;;  %v438_v43 = vadd.f32 %v432_v38, %v34_v31  ;;  %vm4257_vm2 = vcmp.gt.s32.totalorder %v6300_v8, 1  ;;  %vm4262_vm3 = vcmp.gt.s32.totalorder %v6300_v8, 6 }
  0xfd   :  { %5357 = vpow2.f32 %v4249_v26  ;;  %vm4267_vm4 = vcmp.gt.s32.totalorder %v6300_v8, 2  ;;  %vm4272_vm5 = vcmp.gt.s32.totalorder %v6300_v8, 5  ;;  %vm4277_vm6 = vcmp.gt.s32.totalorder %v6300_v8, 3 }
  0xfe   :  { %5359 = vpow2.f32 %v4250_v27  ;;  %v4251_v47 = vmul.f32 -1.442695, %v438_v43  ;;  %v8770_v43 = vld [vmem:[#allocation8_spill] sm:$0xff]  ;;  %vm4282_vm7 = vcmp.gt.s32.totalorder %v6300_v8, 4 }
 0x100   :  { %5361 = vpow2.f32 %v4251_v47  ;;  %v1220_v47 = vld [vmem:[%s8706_s3 + $0x20] sm:$0xff] }
 0x101   :  { %5363 = vtanh.f32 %v437_v49 }
 0x107   :  { %v5358_v53 = vpop.eup %5357 }
 0x108   :  { %v5360_v56 = vpop.eup %5359  ;;  %v442_v59 = vadd.f32 1.0, %v5358_v53 }
 0x109   :  { %v448_v63 = vadd.f32 1.0, %v5360_v56  ;;  %v1218_v56 = vld [vmem:[%s8706_s3 + $0x10] sm:$0xff] }
 0x10a   :  { %5365 = vrcp.f32 %v442_v59  ;;  %v5362_v1 = vpop.eup %5361  ;;  %v1222_v59 = vld [vmem:[%s8706_s3 + $0x30] sm:$0xff] }
 0x10b   :  { %5367 = vrcp.f32 %v448_v63  ;;  %v5364_v10 = vpop.eup %5363  ;;  %v455_v16 = vadd.f32 1.0, %v5362_v1  ;;  %v6396_v63 = vpack.c.bf16 %v1222_v59, %v1218_v56  ;;  %v1225_v1 = vld [vmem:[%s8706_s3 + $0x48] sm:$0xff] }
 0x10d   :  { %5369 = vrcp.f32 %v455_v16 }
 0x114   :  { %v5366_v11 = vpop.eup %5365 }
 0x115   :  { %v5368_v19 = vpop.eup %5367  ;;  %v459_v25 = vmul.f32 %v5366_v11, %v5364_v10  ;;  %v1229_v10 = vld [vmem:[%s8706_s3 + $0x68] sm:$0xff]  ;;  %v1227_v11 = vld [vmem:[%s8706_s3 + $0x58] sm:$0xff] }
 0x116   :  { %v458_v28 = vmul.f32 0.0, %v5368_v19  ;;  %v6410_v16 = vpack.c.bf16 %v1229_v10, %v1225_v1  ;;  %v1231_v19 = vld [vmem:[%s8706_s3 + $0x78] sm:$0xff]  ;;  %v1256_v1 = vld [vmem:[%s8706_s3 + $0x140] sm:$0xff] }
 0x117   :  { %v5370_v3 = vpop.eup %5369  ;;  %v1260_v10 = vld [vmem:[%s8706_s3 + $0x160] sm:$0xff] }
 0x118   :  { %v605_v42 = vpop.f32.mrb[2].mxu0  ;;  %v6291_v44 = vadd.f32 %v459_v25, %v458_v28  ;;  %v1224_v25 = vld [vmem:[%s8706_s3 + $0x40] sm:$0xff] }
 0x119   :  { %v681_v51 = vadd.f32 %v4244_v33, %v605_v42  ;;  %v607_v54 = vpop.f32.mrb[3].mxu0  ;;  %v1228_v28 = vld [vmem:[%s8706_s3 + $0x60] sm:$0xff]  ;;  %v6421_v33 = vpack.c.bf16 %v1231_v19, %v1227_v11  ;;  %v1226_v42 = vld [vmem:[%s8706_s3 + $0x50] sm:$0xff]  ;;  %v6570_v19 = vpack.c.bf16 %v1260_v10, %v1256_v1  ;;  %v38_v10 = vld [vmem:[%s8704_s1 + $0x48] sm:$0xff] }
 0x11a   :  { %v682_v5 = vadd.f32 %v4245_v36, %v607_v54  ;;  %5371 = vtanh.f32 %v6291_v44  ;;  %v676_v57 = vpop.f32.mrb[2].mxu1  ;;  %v6423_v36 = vpack.c.bf16 %v1228_v28, %v1224_v25  ;;  %v1258_v11 = vld [vmem:[%s8706_s3 + $0x150] sm:$0xff]  ;;  %v36_v1 = vld [vmem:[%s8704_s1 + $0x40] sm:$0xff] }
 0x11b   :  { %v4253_v12 = vmul.f32 -1.442695, %v681_v51  ;;  %v678_v55 = vpop.f32.mrb[3].mxu1  ;;  %v683_v18 = vadd.f32 %v4246_v58, %v676_v57  ;;  %v1230_v51 = vld [vmem:[%s8706_s3 + $0x70] sm:$0xff]  ;;  %v1239_v57 = vld [vmem:[%s8706_s3 + $0xb8] sm:$0xff] }
 0x11c   :  { %v4254_v50 = vmul.f32 -1.442695, %v682_v5  ;;  %v684_v4 = vadd.f32 %v4247_v39, %v678_v55  ;;  %v6432_v54 = vpack.c.bf16 %v1230_v51, %v1226_v42  ;;  %v1233_v5 = vld [vmem:[%s8706_s3 + $0x88] sm:$0xff]  ;;  %v1232_v55 = vld [vmem:[%s8706_s3 + $0x80] sm:$0xff]  ;;  %v1262_v25 = vld [vmem:[%s8706_s3 + $0x170] sm:$0xff] }
 0x11d   :  { %5373 = vpow2.f32 %v4253_v12  ;;  %v1237_v12 = vld [vmem:[%s8706_s3 + $0xa8] sm:$0xff]  ;;  %v6577_v28 = vpack.c.bf16 %v1262_v25, %v1258_v11 }
 0x11e   :  { %5375 = vpow2.f32 %v4254_v50  ;;  %v4255_v9 = vmul.f32 -1.442695, %v684_v4  ;;  %v1235_v50 = vld [vmem:[%s8706_s3 + $0x98] sm:$0xff]  ;;  %v6446_v39 = vpack.c.bf16 %v1237_v12, %v1233_v5  ;;  %v1236_v4 = vld [vmem:[%s8706_s3 + $0xa0] sm:$0xff]  ;;  %v1265_v42 = vld [vmem:[%s8706_s3 + $0x188] sm:$0xff] }
 0x11f   :  { %v6457_v58 = vpack.c.bf16 %v1239_v57, %v1235_v50  ;;  %v1269_v51 = vld [vmem:[%s8706_s3 + $0x1a8] sm:$0xff]  ;;  %v1267_v5 = vld [vmem:[%s8706_s3 + $0x198] sm:$0xff]  ;;  %v1264_v57 = vld [vmem:[%s8706_s3 + $0x180] sm:$0xff] }
 0x120   :  { %5377 = vpow2.f32 %v4255_v9  ;;  %v1234_v9 = vld [vmem:[%s8706_s3 + $0x90] sm:$0xff]  ;;  %v6589_v12 = vpack.c.bf16 %v1269_v51, %v1265_v42  ;;  %v1271_v50 = vld [vmem:[%s8706_s3 + $0x1b8] sm:$0xff] }
 0x121   :  { %5379 = vtanh.f32 %v683_v18 }
 0x124   :  { %v5372_v15 = vpop.eup %5371 }
 0x125   :  { %v462_v23 = vmul.f32 %v5372_v15, %v5370_v3  ;;  %v6459_v3 = vpack.c.bf16 %v1236_v4, %v1232_v55  ;;  %v1238_v15 = vld [vmem:[%s8706_s3 + $0xb0] sm:$0xff]  ;;  %v1268_v55 = vld [vmem:[%s8706_s3 + $0x1a0] sm:$0xff]  ;;  %v6601_v4 = vpack.c.bf16 %v1271_v50, %v1267_v5 }
 0x126   :  { %v6468_v18 = vpack.c.bf16 %v1238_v15, %v1234_v9  ;;  %v6603_v9 = vpack.c.bf16 %v1268_v55, %v1264_v57  ;;  %v1266_v15 = vld [vmem:[%s8706_s3 + $0x190] sm:$0xff] }
 0x127   :  { %v5374_v26 = vpop.eup %5373  ;;  %4326 = vmatmul.mubr.msk.f32.vlgmr.msra.gmra.mrb[4].mxu0 %vm4248_vm0, %v462_v23  ;;  %4327 = vmatmul.mubr.msk.f32.vlgmr.msra.gmra.mrb[4].mxu1 %vm4248_vm0, %v462_v23  ;;  %v6309_v27 = vsel %vm4248_vm0, %v462_v23, 0.0  ;;  %v1241_v23 = vld [vmem:[%s8706_s3 + $0xc8] sm:$0xff] }
 0x128   :  { %v5376_v31 = vpop.eup %5375  ;;  %v688_v34 = vadd.f32 1.0, %v5374_v26  ;;  %4525 = vmatpush1.bf16.msra.mxu0 %v5961_v61  ;;  %4557 = vmatpush1.bf16.msra.mxu1 %v6014_v32  ;;  %466 = vst [vmem:[%s8708_s5] sm:$0xff] %v6309_v27  ;;  %v1245_v26 = vld [vmem:[%s8706_s3 + $0xe8] sm:$0xff] }
 0x129   :  { %v694_v38 = vadd.f32 1.0, %v5376_v31  ;;  %4527 = vmatprep.subr.bf16.mxu0 %v5964_v62  ;;  %4559 = vmatprep.subr.bf16.mxu1 %v6020_v37  ;;  %v1243_v31 = vld [vmem:[%s8706_s3 + $0xd8] sm:$0xff] }
 0x12a   :  { %5381 = vrcp.f32 %v688_v34  ;;  %1097 = vmatprep.mubr.f32.mxu0 %v8768_v24  ;;  %1168 = vmatprep.mubr.f32.mxu1 %v8768_v24  ;;  %v5378_v61 = vpop.eup %5377  ;;  %v6482_v34 = vpack.c.bf16 %v1245_v26, %v1241_v23  ;;  %v1270_v23 = vld [vmem:[%s8706_s3 + $0x1b0] sm:$0xff] }
 0x12b   :  { %5383 = vrcp.f32 %v694_v38  ;;  %v5380_v62 = vpop.eup %5379  ;;  %v701_v37 = vadd.f32 1.0, %v5378_v61  ;;  %v1247_v38 = vld [vmem:[%s8706_s3 + $0xf8] sm:$0xff]  ;;  %v1240_v61 = vld [vmem:[%s8706_s3 + $0xc0] sm:$0xff]  ;;  %v6612_v26 = vpack.c.bf16 %v1270_v23, %v1266_v15 }
 0x12c   :  { %4529 = vmatpush1.bf16.msra.mxu0 %v5998_v21  ;;  %4561 = vmatpush1.bf16.msra.mxu1 %v6054_v60  ;;  %v8769_v21 = vld [vmem:[#allocation11_spill] sm:$0xff] }
 0x12d   :  { %4531 = vmatprep.subr.bf16.mxu0 %v6002_v22  ;;  %4563 = vmatprep.subr.bf16.mxu1 %v6057_v0  ;;  %v8771_v0 = vld [vmem:[#allocation12_spill] sm:$0xff]  ;;  %5385 = vrcp.f32 %v701_v37  ;;  %v42_v15 = vld [vmem:[%s8704_s1 + $0x58] sm:$0xff] }
 0x130   :  { %4533 = vmatpush1.bf16.msra.mxu0 %v6035_v48  ;;  %4565 = vmatpush1.bf16.msra.mxu1 %v6091_v35  ;;  %v8772_v35 = vld [vmem:[#allocation9_spill] sm:$0xff] }
 0x131   :  { %4535 = vmatprep.subr.bf16.mxu0 %v6042_v52  ;;  %4567 = vmatprep.subr.bf16.mxu1 %v6097_v40  ;;  %v8773_v40 = vld [vmem:[#allocation10_spill] sm:$0xff] }
 0x134   :  { %v5382_v32 = vpop.eup %5381  ;;  %4537 = vmatpush1.bf16.msra.mxu0 %v6076_v17  ;;  %4569 = vmatpush1.bf16.msra.mxu1 %v8769_v21  ;;  %v8774_v17 = vld [vmem:[#allocation13_spill] sm:$0xff]  ;;  %v1242_v21 = vld [vmem:[%s8706_s3 + $0xd0] sm:$0xff] }
 0x135   :  { %v5384_v60 = vpop.eup %5383  ;;  %v705_v22 = vmul.f32 %v5382_v32, %v5380_v62  ;;  %4539 = vmatprep.subr.bf16.mxu0 %v8770_v43  ;;  %4571 = vmatprep.subr.bf16.mxu1 %v8771_v0  ;;  %v1244_v62 = vld [vmem:[%s8706_s3 + $0xe0] sm:$0xff]  ;;  %v6493_v32 = vpack.c.bf16 %v1247_v38, %v1243_v31  ;;  %v1249_v43 = vld [vmem:[%s8706_s3 + $0x108] sm:$0xff] }
 0x136   :  { %v704_v48 = vmul.f32 0.0, %v5384_v60  ;;  %v6495_v37 = vpack.c.bf16 %v1244_v62, %v1240_v61  ;;  %v1246_v60 = vld [vmem:[%s8706_s3 + $0xf0] sm:$0xff]  ;;  %v1253_v0 = vld [vmem:[%s8706_s3 + $0x128] sm:$0xff]  ;;  %v1275_v61 = vld [vmem:[%s8706_s3 + $0x1d8] sm:$0xff] }
 0x137   :  { %v1273_v31 = vld [vmem:[%s8706_s3 + $0x1c8] sm:$0xff] }
 0x138   :  { %4541 = vmatpush1.bf16.msra.mxu0 %v8772_v35  ;;  %4573 = vmatpush1.bf16.msra.mxu1 %v6163_v2  ;;  %v6335_v52 = vadd.f32 %v705_v22, %v704_v48  ;;  %v5386_v2 = vpop.eup %5385  ;;  %v6504_v22 = vpack.c.bf16 %v1246_v60, %v1242_v21  ;;  %v1251_v48 = vld [vmem:[%s8706_s3 + $0x118] sm:$0xff]  ;;  %v6518_v35 = vpack.c.bf16 %v1253_v0, %v1249_v43  ;;  %v1277_v38 = vld [vmem:[%s8706_s3 + $0x1e8] sm:$0xff]  ;;  %v1272_v60 = vld [vmem:[%s8706_s3 + $0x1c0] sm:$0xff] }
 0x139   :  { %4543 = vmatprep.subr.bf16.mxu0 %v8773_v40  ;;  %4575 = vmatprep.subr.bf16.mxu1 %v6169_v6  ;;  %v1255_v40 = vld [vmem:[%s8706_s3 + $0x138] sm:$0xff]  ;;  %v6625_v62 = vpack.c.bf16 %v1277_v38, %v1273_v31  ;;  %v1276_v43 = vld [vmem:[%s8706_s3 + $0x1e0] sm:$0xff]  ;;  %v40_v31 = vld [vmem:[%s8704_s1 + $0x50] sm:$0xff] }
 0x13a   :  { %5387 = vtanh.f32 %v6335_v52  ;;  %v1279_v21 = vld [vmem:[%s8706_s3 + $0x1f8] sm:$0xff] }
 0x13b   :  { %v6637_v0 = vpack.c.bf16 %v1279_v21, %v1275_v61 }
 0x13c   :  { %4545 = vmatpush1.bf16.msra.mxu0 %v6148_v45  ;;  %4577 = vmatpush1.bf16.msra.mxu1 %v6196_v13 }
 0x13d   :  { %4547 = vmatprep.subr.bf16.mxu0 %v8774_v17  ;;  %4579 = vmatprep.subr.bf16.mxu1 %v6199_v7  ;;  %v1221_v7 = vld [vmem:[%s8706_s3 + $0x28] sm:$0xff]  ;;  %v1248_v17 = vld [vmem:[%s8706_s3 + $0x100] sm:$0xff] }
 0x140   :  { %4549 = vmatpush1.bf16.msra.mxu0 %v8775_v46  ;;  %4581 = vmatpush1.bf16.msra.mxu1 %v6218_v29  ;;  %v1252_v46 = vld [vmem:[%s8706_s3 + $0x120] sm:$0xff] }
 0x141   :  { %4551 = vmatprep.subr.bf16.mxu0 %v6187_v41  ;;  %4583 = vmatprep.subr.bf16.mxu1 %v6221_v30  ;;  %v1217_v41 = vld [vmem:[%s8706_s3 + $0x8] sm:$0xff]  ;;  %v1223_v30 = vld [vmem:[%s8706_s3 + $0x38] sm:$0xff] }
 0x142   :  { %v6374_v29 = vpack.c.bf16 %v1221_v7, %v1217_v41  ;;  %v1254_v41 = vld [vmem:[%s8706_s3 + $0x130] sm:$0xff] }
 0x144   :  { %v5388_v6 = vpop.eup %5387  ;;  %4553 = vmatpush1.bf16.msra.mxu0 %v6214_v14  ;;  %4585 = vmatpush1.bf16.msra.mxu1 %v6231_v20  ;;  %v1219_v14 = vld [vmem:[%s8706_s3 + $0x18] sm:$0xff]  ;;  %v1216_v20 = vld [vmem:[%s8706_s3] sm:$0xff] }
 0x145   :  { %v708_v45 = vmul.f32 %v5388_v6, %v5386_v2  ;;  %v6385_v49 = vpack.c.bf16 %v1223_v30, %v1219_v14  ;;  %v6387_v53 = vpack.c.bf16 %v1220_v47, %v1216_v20  ;;  %4587 = vmatprep.subr.bf16.mxu0 %v6374_v29  ;;  %v6529_v2 = vpack.c.bf16 %v1255_v40, %v1251_v48  ;;  %v1257_v14 = vld [vmem:[%s8706_s3 + $0x148] sm:$0xff]  ;;  %v1259_v20 = vld [vmem:[%s8706_s3 + $0x158] sm:$0xff]  ;;  %v1274_v40 = vld [vmem:[%s8706_s3 + $0x1d0] sm:$0xff] }
 0x146   :  { %v6531_v6 = vpack.c.bf16 %v1252_v46, %v1248_v17  ;;  %v1261_v30 = vld [vmem:[%s8706_s3 + $0x168] sm:$0xff]  ;;  %v1263_v47 = vld [vmem:[%s8706_s3 + $0x178] sm:$0xff]  ;;  %v6639_v48 = vpack.c.bf16 %v1276_v43, %v1272_v60  ;;  %v1278_v17 = vld [vmem:[%s8706_s3 + $0x1f0] sm:$0xff] }
 0x147   :  { %4328 = vmatmul.mubr.msk.f32.vlgmr.msra.gmra.mrb[6].mxu0 %vm4252_vm1, %v708_v45  ;;  %4329 = vmatmul.mubr.msk.f32.vlgmr.msra.gmra.mrb[6].mxu1 %vm4252_vm1, %v708_v45  ;;  %v6357_v13 = vsel %vm4252_vm1, %v708_v45, 0.0  ;;  %v1250_v45 = vld [vmem:[%s8706_s3 + $0x110] sm:$0xff]  ;;  %v6557_v56 = vpack.c.bf16 %v1261_v30, %v1257_v14  ;;  %v6559_v59 = vpack.c.bf16 %v1263_v47, %v1259_v20  ;;  %v6648_v46 = vpack.c.bf16 %v1278_v17, %v1274_v40  ;;  %v1466_v14 = vld [vmem:[%s8707_s4 + $0x18] sm:$0xff] }
 0x148   :  { %1344 = vmatprep.mubr.f32.mxu0 %v8768_v24  ;;  %1415 = vmatprep.mubr.f32.mxu1 %v8768_v24  ;;  %4256 = vst [vmem:[%s8709_s6 + $0x38] sm:$0xff] %v6357_v13  ;;  %v6540_v7 = vpack.c.bf16 %v1254_v41, %v1250_v45  ;;  %v1464_v45 = vld [vmem:[%s8707_s4 + $0x8] sm:$0xff]  ;;  %v1470_v20 = vld [vmem:[%s8707_s4 + $0x38] sm:$0xff] }
 0x149   :  { %4619 = vmatprep.subr.bf16.mxu1 %v6385_v49  ;;  %4589 = vmatpush1.bf16.msra.mxu0 %v6387_v53  ;;  %v1468_v41 = vld [vmem:[%s8707_s4 + $0x28] sm:$0xff]  ;;  %v6667_v47 = vpack.c.bf16 %v1470_v20, %v1466_v14  ;;  %v464_v20 = vsel %vm4248_vm0, %v6291_v44, 0.0 }
 0x14a   :  { %4621 = vmatpush1.bf16.msra.mxu1 %v6396_v63  ;;  %4591 = vmatprep.subr.bf16.mxu0 %v6410_v16  ;;  %v6661_v30 = vpack.c.bf16 %v1468_v41, %v1464_v45 }
 0x14b   :  { %4623 = vmatprep.subr.bf16.mxu1 %v6421_v33 }
 0x14d   :  { %4593 = vmatpush1.bf16.msra.mxu0 %v6423_v36 }
 0x14e   :  { %4625 = vmatpush1.bf16.msra.mxu1 %v6432_v54  ;;  %4595 = vmatprep.subr.bf16.mxu0 %v6446_v39 }
 0x14f   :  { %4627 = vmatprep.subr.bf16.mxu1 %v6457_v58 }
 0x151   :  { %4597 = vmatpush1.bf16.msra.mxu0 %v6459_v3 }
 0x152   :  { %4629 = vmatpush1.bf16.msra.mxu1 %v6468_v18  ;;  %4599 = vmatprep.subr.bf16.mxu0 %v6482_v34 }
 0x153   :  { %4631 = vmatprep.subr.bf16.mxu1 %v6493_v32 }
 0x155   :  { %4601 = vmatpush1.bf16.msra.mxu0 %v6495_v37 }
 0x156   :  { %4633 = vmatpush1.bf16.msra.mxu1 %v6504_v22  ;;  %4603 = vmatprep.subr.bf16.mxu0 %v6518_v35 }
 0x157   :  { %4635 = vmatprep.subr.bf16.mxu1 %v6529_v2 }
 0x159   :  { %4605 = vmatpush1.bf16.msra.mxu0 %v6531_v6 }
 0x15a   :  { %4637 = vmatpush1.bf16.msra.mxu1 %v6540_v7  ;;  %4607 = vmatprep.subr.bf16.mxu0 %v6557_v56 }
 0x15b   :  { %4639 = vmatprep.subr.bf16.mxu1 %v6559_v59 }
 0x15d   :  { %4609 = vmatpush1.bf16.msra.mxu0 %v6570_v19 }
 0x15e   :  { %4641 = vmatpush1.bf16.msra.mxu1 %v6577_v28  ;;  %4611 = vmatprep.subr.bf16.mxu0 %v6589_v12 }
 0x15f   :  { %4643 = vmatprep.subr.bf16.mxu1 %v6601_v4 }
 0x161   :  { %4613 = vmatpush1.bf16.msra.mxu0 %v6603_v9 }
 0x162   :  { %4645 = vmatpush1.bf16.msra.mxu1 %v6612_v26  ;;  %4615 = vmatprep.subr.bf16.mxu0 %v6625_v62 }
 0x163   :  { %4647 = vmatprep.subr.bf16.mxu1 %v6637_v0 }
 0x165   :  { %4617 = vmatpush1.bf16.msra.mxu0 %v6639_v48 }
 0x166   :  { %4649 = vmatpush1.bf16.msra.mxu1 %v6648_v46  ;;  %4651 = vmatprep.subr.bf16.mxu0 %v6661_v30 }
 0x167   :  { %4683 = vmatprep.subr.bf16.mxu1 %v6667_v47 }
 0x1fa   :  { %v852_v11 = vpop.f32.mrb[4].mxu0  ;;  %v923_v25 = vpop.f32.mrb[4].mxu1 }
 0x1fb   :  { %v928_v42 = vadd.f32 %v852_v11, %v36_v1  ;;  %v854_v51 = vpop.f32.mrb[5].mxu0  ;;  %v925_v5 = vpop.f32.mrb[5].mxu1  ;;  %v930_v61 = vadd.f32 %v923_v25, %v40_v31  ;;  %v4240_v25 = vld [vmem:[%s8705_s2 + $0x1a0] sm:$0xff] }
 0x1fc   :  { %v929_v50 = vadd.f32 %v854_v51, %v38_v10  ;;  %v931_v23 = vadd.f32 %v925_v5, %v42_v15 }
 0x1fd   :  { %v4258_v57 = vmul.f32 -1.442695, %v928_v42  ;;  %v4241_v42 = vld [vmem:[%s8705_s2 + $0x1a8] sm:$0xff] }
 0x1fe   :  { %v4259_v55 = vmul.f32 -1.442695, %v929_v50  ;;  %v4260_v38 = vmul.f32 -1.442695, %v931_v23 }
 0x1ff   :  { %5389 = vpow2.f32 %v4258_v57 }
 0x200   :  { %5391 = vpow2.f32 %v4259_v55 }
 0x201   :  { %5393 = vpow2.f32 %v4260_v38 }
 0x202   :  { %5395 = vtanh.f32 %v930_v61  ;;  %v4243_v61 = vld [vmem:[%s8705_s2 + $0x1b8] sm:$0xff] }
 0x209   :  { %v5390_v21 = vpop.eup %5389 }
 0x20a   :  { %v5392_v60 = vpop.eup %5391  ;;  %v935_v43 = vadd.f32 1.0, %v5390_v21 }
 0x20b   :  { %v941_v40 = vadd.f32 1.0, %v5392_v60  ;;  %v5394_v17 = vpop.eup %5393  ;;  %v4242_v60 = vld [vmem:[%s8705_s2 + $0x1b0] sm:$0xff] }
 0x20c   :  { %5397 = vrcp.f32 %v935_v43  ;;  %v5396_v45 = vpop.eup %5395  ;;  %v948_v10 = vadd.f32 1.0, %v5394_v17  ;;  %v1463_v43 = vld [vmem:[%s8707_s4] sm:$0xff]  ;;  %v1465_v17 = vld [vmem:[%s8707_s4 + $0x10] sm:$0xff] }
 0x20d   :  { %5399 = vrcp.f32 %v941_v40  ;;  %v1467_v40 = vld [vmem:[%s8707_s4 + $0x20] sm:$0xff] }
 0x20e   :  { %5401 = vrcp.f32 %v948_v10  ;;  %v1478_v10 = vld [vmem:[%s8707_s4 + $0x78] sm:$0xff] }
 0x216   :  { %v5398_v41 = vpop.eup %5397 }
 0x217   :  { %v5400_v14 = vpop.eup %5399  ;;  %v952_v1 = vmul.f32 %v5398_v41, %v5396_v45  ;;  %v1469_v45 = vld [vmem:[%s8707_s4 + $0x30] sm:$0xff]  ;;  %v1472_v41 = vld [vmem:[%s8707_s4 + $0x48] sm:$0xff] }
 0x218   :  { %v951_v11 = vmul.f32 %v5400_v14, %v464_v20  ;;  %v5402_v14 = vpop.eup %5401 }
 0x21a   :  { %v953_v51 = vadd.f32 %v952_v1, %v951_v11  ;;  %v1099_v5 = vpop.f32.mrb[6].mxu0  ;;  %v1170_v50 = vpop.f32.mrb[6].mxu1  ;;  %v1474_v1 = vld [vmem:[%s8707_s4 + $0x58] sm:$0xff] }
 0x21b   :  { %v1175_v57 = vadd.f32 %v4240_v25, %v1099_v5  ;;  %v1101_v55 = vpop.f32.mrb[7].mxu0  ;;  %v1172_v15 = vpop.f32.mrb[7].mxu1  ;;  %v6727_v5 = vpack.c.bf16 %v1467_v40, %v1463_v43  ;;  %v1484_v40 = vld [vmem:[%s8707_s4 + $0xa8] sm:$0xff] }
 0x21c   :  { %v1176_v44 = vadd.f32 %v4241_v42, %v1101_v55  ;;  %5403 = vtanh.f32 %v953_v51  ;;  %v6695_v23 = vsel %vm4257_vm2, %v953_v51, %v464_v20  ;;  %v1178_v21 = vadd.f32 %v4243_v61, %v1172_v15  ;;  %v1476_v20 = vld [vmem:[%s8707_s4 + $0x68] sm:$0xff]  ;;  %v1471_v55 = vld [vmem:[%s8707_s4 + $0x40] sm:$0xff] }
 0x21d   :  { %v4263_v31 = vmul.f32 -1.442695, %v1175_v57  ;;  %v1177_v42 = vadd.f32 %v4242_v60, %v1170_v50  ;;  %v6729_v57 = vpack.c.bf16 %v1469_v45, %v1465_v17  ;;  %v1475_v15 = vld [vmem:[%s8707_s4 + $0x60] sm:$0xff]  ;;  %v1473_v50 = vld [vmem:[%s8707_s4 + $0x50] sm:$0xff]  ;;  %v1480_v61 = vld [vmem:[%s8707_s4 + $0x88] sm:$0xff] }
 0x21e   :  { %v4264_v38 = vmul.f32 -1.442695, %v1176_v44  ;;  %v4265_v25 = vmul.f32 -1.442695, %v1178_v21  ;;  %v6737_v44 = vpack.c.bf16 %v1476_v20, %v1472_v41  ;;  %v1482_v17 = vld [vmem:[%s8707_s4 + $0x98] sm:$0xff]  ;;  %v6773_v20 = vpack.c.bf16 %v1475_v15, %v1471_v55  ;;  %v1485_v55 = vld [vmem:[%s8707_s4 + $0xb0] sm:$0xff] }
 0x21f   :  { %5405 = vpow2.f32 %v4263_v31  ;;  %8776 = vst [vmem:[#allocation11_spill] sm:$0xff] %v6729_v57  ;;  %v6739_v31 = vpack.c.bf16 %v1478_v10, %v1474_v1  ;;  %v1486_v45 = vld [vmem:[%s8707_s4 + $0xb8] sm:$0xff]  ;;  %v1479_v10 = vld [vmem:[%s8707_s4 + $0x80] sm:$0xff]  ;;  %v1488_v15 = vld [vmem:[%s8707_s4 + $0xc8] sm:$0xff] }
 0x220   :  { %5407 = vpow2.f32 %v4264_v38  ;;  %8777 = vst [vmem:[#allocation8_spill] sm:$0xff] %v6737_v44  ;;  %v1477_v38 = vld [vmem:[%s8707_s4 + $0x70] sm:$0xff]  ;;  %8779 = vst [vmem:[#allocation9_spill] sm:$0xff] %v6773_v20 }
 0x221   :  { %8778 = vst [vmem:[#allocation12_spill] sm:$0xff] %v6739_v31  ;;  %5409 = vpow2.f32 %v4265_v25  ;;  %v6775_v1 = vpack.c.bf16 %v1477_v38, %v1473_v50  ;;  %v6785_v25 = vpack.c.bf16 %v1484_v40, %v1480_v61  ;;  %v1492_v50 = vld [vmem:[%s8707_s4 + $0xe8] sm:$0xff]  ;;  %v1490_v38 = vld [vmem:[%s8707_s4 + $0xd8] sm:$0xff]  ;;  %v1487_v40 = vld [vmem:[%s8707_s4 + $0xc0] sm:$0xff] }
 0x222   :  { %5411 = vtanh.f32 %v1177_v42  ;;  %v6787_v42 = vpack.c.bf16 %v1486_v45, %v1482_v17  ;;  %v1494_v61 = vld [vmem:[%s8707_s4 + $0xf8] sm:$0xff]  ;;  %v1491_v17 = vld [vmem:[%s8707_s4 + $0xe0] sm:$0xff]  ;;  %v6823_v45 = vpack.c.bf16 %v1492_v50, %v1488_v15 }
 0x223   :  { %8780 = vst [vmem:[#allocation10_spill] sm:$0xff] %v6775_v1  ;;  %8781 = vst [vmem:[#allocation13_spill] sm:$0xff] %v6785_v25  ;;  %v6847_v15 = vpack.c.bf16 %v1491_v17, %v1487_v40  ;;  %v1497_v40 = vld [vmem:[%s8707_s4 + $0x110] sm:$0xff] }
 0x224   :  { %8782 = vst [vmem:[#allocation14_spill] sm:$0xff] %v6787_v42  ;;  %8785 = vst [vmem:[#allocation17_spill] sm:$0xff] %v6823_v45  ;;  %v1501_v17 = vld [vmem:[%s8707_s4 + $0x130] sm:$0xff] }
 0x226   :  { %v5404_v11 = vpop.eup %5403 }
 0x227   :  { %v955_v51 = vmul.f32 %v5404_v11, %v5402_v14  ;;  %v1483_v11 = vld [vmem:[%s8707_s4 + $0xa0] sm:$0xff] }
 0x229   :  { %v5406_v21 = vpop.eup %5405  ;;  %v6753_v60 = vsel %vm4257_vm2, %v955_v51, %v6309_v27  ;;  %v958_v43 = vsel %vm4257_vm2, %v955_v51, 0.0  ;;  %v1481_v51 = vld [vmem:[%s8707_s4 + $0x90] sm:$0xff] }
 0x22a   :  { %v5408_v41 = vpop.eup %5407  ;;  %v1182_v14 = vadd.f32 1.0, %v5406_v21  ;;  %4261 = vst [vmem:[%s8708_s5 + $0x8] sm:$0xff] %v958_v43  ;;  %1345 = vmatmul.mubr.f32.vlgmr.msra.gmra.mrb[8].mxu0 %v6753_v60  ;;  %1416 = vmatmul.mubr.f32.vlgmr.msra.gmra.mrb[8].mxu1 %v6753_v60  ;;  %v6811_v21 = vpack.c.bf16 %v1483_v11, %v1479_v10  ;;  %v6813_v43 = vpack.c.bf16 %v1485_v55, %v1481_v51  ;;  %v1496_v10 = vld [vmem:[%s8707_s4 + $0x108] sm:$0xff]  ;;  %v1498_v51 = vld [vmem:[%s8707_s4 + $0x118] sm:$0xff] }
 0x22b   :  { %v1188_v27 = vadd.f32 1.0, %v5408_v41  ;;  %4653 = vmatpush1.bf16.msra.mxu0 %v6727_v5  ;;  %4685 = vmatpush1.bf16.msra.mxu1 %v6729_v57  ;;  %v6825_v41 = vpack.c.bf16 %v1494_v61, %v1490_v38  ;;  %v1500_v11 = vld [vmem:[%s8707_s4 + $0x128] sm:$0xff]  ;;  %v1502_v55 = vld [vmem:[%s8707_s4 + $0x138] sm:$0xff]  ;;  %v1495_v38 = vld [vmem:[%s8707_s4 + $0x100] sm:$0xff] }
 0x22c   :  { %5413 = vrcp.f32 %v1182_v14  ;;  %4655 = vmatprep.subr.bf16.mxu0 %v6737_v44  ;;  %4687 = vmatprep.subr.bf16.mxu1 %v6739_v31  ;;  %8783 = vst [vmem:[#allocation15_spill] sm:$0xff] %v6811_v21  ;;  %8784 = vst [vmem:[#allocation16_spill] sm:$0xff] %v6813_v43  ;;  %v1489_v14 = vld [vmem:[%s8707_s4 + $0xd0] sm:$0xff]  ;;  %v1499_v61 = vld [vmem:[%s8707_s4 + $0x120] sm:$0xff]  ;;  %v6888_v31 = vpack.c.bf16 %v1501_v17, %v1497_v40 }
 0x22d   :  { %5415 = vrcp.f32 %v1188_v27  ;;  %1591 = vmatprep.mubr.f32.mxu0 %v8768_v24  ;;  %1662 = vmatprep.mubr.f32.mxu1 %v8768_v24  ;;  %8786 = vst [vmem:[#allocation18_spill] sm:$0xff] %v6825_v41  ;;  %v1493_v27 = vld [vmem:[%s8707_s4 + $0xf0] sm:$0xff]  ;;  %v1503_v44 = vld [vmem:[%s8707_s4 + $0x140] sm:$0xff]  ;;  %v1516_v40 = vld [vmem:[%s8707_s4 + $0x1a8] sm:$0xff] }
 0x22e   :  { %v6849_v50 = vpack.c.bf16 %v1493_v27, %v1489_v14  ;;  %v1504_v14 = vld [vmem:[%s8707_s4 + $0x148] sm:$0xff]  ;;  %v1507_v57 = vld [vmem:[%s8707_s4 + $0x160] sm:$0xff]  ;;  %v1514_v17 = vld [vmem:[%s8707_s4 + $0x198] sm:$0xff] }
 0x22f   :  { %4657 = vmatpush1.bf16.msra.mxu0 %v6773_v20  ;;  %4689 = vmatpush1.bf16.msra.mxu1 %v6775_v1  ;;  %v6886_v20 = vpack.c.bf16 %v1499_v61, %v1495_v38  ;;  %v1505_v38 = vld [vmem:[%s8707_s4 + $0x150] sm:$0xff] }
 0x230   :  { %4659 = vmatprep.subr.bf16.mxu0 %v6785_v25  ;;  %4691 = vmatprep.subr.bf16.mxu1 %v6787_v42  ;;  %v5410_v42 = vpop.eup %5409  ;;  %v1509_v61 = vld [vmem:[%s8707_s4 + $0x170] sm:$0xff] }
 0x231   :  { %v5412_v27 = vpop.eup %5411  ;;  %v1195_v1 = vadd.f32 1.0, %v5410_v42 }
 0x233   :  { %4661 = vmatpush1.bf16.msra.mxu0 %v6811_v21  ;;  %4693 = vmatpush1.bf16.msra.mxu1 %v6813_v43  ;;  %v6859_v21 = vpack.c.bf16 %v1500_v11, %v1496_v10  ;;  %v6861_v43 = vpack.c.bf16 %v1502_v55, %v1498_v51  ;;  %v1508_v10 = vld [vmem:[%s8707_s4 + $0x168] sm:$0xff]  ;;  %v1506_v11 = vld [vmem:[%s8707_s4 + $0x158] sm:$0xff]  ;;  %5417 = vrcp.f32 %v1195_v1 }
 0x234   :  { %4663 = vmatprep.subr.bf16.mxu0 %v6823_v45  ;;  %4695 = vmatprep.subr.bf16.mxu1 %v6825_v41  ;;  %v1510_v51 = vld [vmem:[%s8707_s4 + $0x178] sm:$0xff]  ;;  %v710_v41 = vsel %vm4252_vm1, %v6335_v52, 0.0  ;;  %v6898_v42 = vpack.c.bf16 %v1508_v10, %v1504_v14 }
 0x235   :  { %8787 = vst [vmem:[#allocation19_spill] sm:$0xff] %v6861_v43  ;;  %v1518_v14 = vld [vmem:[%s8707_s4 + $0x1b8] sm:$0xff] }
 0x236   :  { %v5414_v55 = vpop.eup %5413 }
 0x237   :  { %v5416_v45 = vpop.eup %5415  ;;  %v1199_v25 = vmul.f32 %v5414_v55, %v5412_v27  ;;  %4665 = vmatpush1.bf16.msra.mxu0 %v6847_v15  ;;  %4697 = vmatpush1.bf16.msra.mxu1 %v6849_v50  ;;  %v6900_v27 = vpack.c.bf16 %v1510_v51, %v1506_v11  ;;  %v6922_v11 = vpack.c.bf16 %v1507_v57, %v1503_v44  ;;  %v1511_v55 = vld [vmem:[%s8707_s4 + $0x180] sm:$0xff]  ;;  %v1513_v44 = vld [vmem:[%s8707_s4 + $0x190] sm:$0xff] }
 0x238   :  { %v1198_v52 = vmul.f32 %v5416_v45, %v710_v41  ;;  %4667 = vmatprep.subr.bf16.mxu0 %v6859_v21  ;;  %4699 = vmatprep.subr.bf16.mxu1 %v6861_v43  ;;  %v1512_v45 = vld [vmem:[%s8707_s4 + $0x188] sm:$0xff]  ;;  %v6924_v51 = vpack.c.bf16 %v1509_v61, %v1505_v38  ;;  %v1515_v43 = vld [vmem:[%s8707_s4 + $0x1a0] sm:$0xff]  ;;  %v6937_v57 = vpack.c.bf16 %v1518_v14, %v1514_v17 }
 0x239   :  { %8788 = vst [vmem:[#allocation20_spill] sm:$0xff] %v6900_v27  ;;  %v6935_v1 = vpack.c.bf16 %v1516_v40, %v1512_v45  ;;  %v1524_v61 = vld [vmem:[%s8707_s4 + $0x1e8] sm:$0xff]  ;;  %v1522_v45 = vld [vmem:[%s8707_s4 + $0x1d8] sm:$0xff]  ;;  %v6963_v17 = vpack.c.bf16 %v1515_v43, %v1511_v55  ;;  %v1519_v14 = vld [vmem:[%s8707_s4 + $0x1c0] sm:$0xff] }
 0x23a   :  { %v1200_v10 = vadd.f32 %v1199_v25, %v1198_v52  ;;  %8789 = vst [vmem:[#allocation21_spill] sm:$0xff] %v6924_v51  ;;  %v1517_v25 = vld [vmem:[%s8707_s4 + $0x1b0] sm:$0xff]  ;;  %v1520_v52 = vld [vmem:[%s8707_s4 + $0x1c8] sm:$0xff]  ;;  %v1526_v40 = vld [vmem:[%s8707_s4 + $0x1f8] sm:$0xff] }
 0x23b   :  { %4669 = vmatpush1.bf16.msra.mxu0 %v6886_v20  ;;  %4701 = vmatpush1.bf16.msra.mxu1 %v6888_v31  ;;  %v1521_v43 = vld [vmem:[%s8707_s4 + $0x1d0] sm:$0xff] }
 0x23c   :  { %4671 = vmatprep.subr.bf16.mxu0 %v6898_v42  ;;  %4703 = vmatprep.subr.bf16.mxu1 %v6900_v27  ;;  %5419 = vtanh.f32 %v1200_v10  ;;  %v6950_v38 = vsel %vm4262_vm3, %v1200_v10, %v710_v41  ;;  %v6965_v41 = vpack.c.bf16 %v1517_v25, %v1513_v44  ;;  %v6972_v10 = vpack.c.bf16 %v1524_v61, %v1520_v52  ;;  %v1525_v55 = vld [vmem:[%s8707_s4 + $0x1f0] sm:$0xff] }
 0x23d   :  { %v6974_v27 = vpack.c.bf16 %v1526_v40, %v1522_v45  ;;  %v6989_v25 = vpack.c.bf16 %v1525_v55, %v1521_v43  ;;  %v5418_v52 = vpop.eup %5417 }
 0x23f   :  { %4673 = vmatpush1.bf16.msra.mxu0 %v6922_v11  ;;  %4705 = vmatpush1.bf16.msra.mxu1 %v6924_v51  ;;  %v1523_v51 = vld [vmem:[%s8707_s4 + $0x1e0] sm:$0xff] }
 0x240   :  { %4675 = vmatprep.subr.bf16.mxu0 %v6935_v1  ;;  %4707 = vmatprep.subr.bf16.mxu1 %v6937_v57  ;;  %v6987_v44 = vpack.c.bf16 %v1523_v51, %v1519_v14 }
 0x243   :  { %4677 = vmatpush1.bf16.msra.mxu0 %v6963_v17  ;;  %4709 = vmatpush1.bf16.msra.mxu1 %v6965_v41 }
 0x244   :  { %4679 = vmatprep.subr.bf16.mxu0 %v6972_v10  ;;  %4711 = vmatprep.subr.bf16.mxu1 %v6974_v27 }
 0x246   :  { %v5420_v61 = vpop.eup %5419 }
 0x247   :  { %4681 = vmatpush1.bf16.msra.mxu0 %v6987_v44  ;;  %4713 = vmatpush1.bf16.msra.mxu1 %v6989_v25  ;;  %v1202_v45 = vmul.f32 %v5420_v61, %v5418_v52  ;;  %v4239_v52 = vld [vmem:[%s8705_s2 + $0x178] sm:$0xff] }
 0x248   :  { %4715 = vmatprep.subr.bf16.mxu0 %v6374_v29  ;;  %4747 = vmatprep.subr.bf16.mxu1 %v6385_v49  ;;  %v46_v29 = vld [vmem:[%s8704_s1 + $0x88] sm:$0xff] }
 0x249   :  { %v7000_v51 = vsel %vm4262_vm3, %v1202_v45, %v6357_v13  ;;  %v1205_v40 = vsel %vm4262_vm3, %v1202_v45, 0.0  ;;  %v44_v13 = vld [vmem:[%s8704_s1 + $0x80] sm:$0xff]  ;;  %v4238_v45 = vld [vmem:[%s8705_s2 + $0x170] sm:$0xff] }
 0x24a   :  { %4266 = vst [vmem:[%s8709_s6 + $0x30] sm:$0xff] %v1205_v40  ;;  %1592 = vmatmul.mubr.f32.vlgmr.msra.gmra.mrb[10].mxu0 %v7000_v51  ;;  %1663 = vmatmul.mubr.f32.vlgmr.msra.gmra.mrb[10].mxu1 %v7000_v51 }
 0x24b   :  { %4717 = vmatpush1.bf16.msra.mxu0 %v6387_v53  ;;  %4749 = vmatpush1.bf16.msra.mxu1 %v6396_v63 }
 0x24c   :  { %4719 = vmatprep.subr.bf16.mxu0 %v6410_v16  ;;  %4751 = vmatprep.subr.bf16.mxu1 %v6421_v33 }
 0x24d   :  { %1838 = vmatprep.mubr.f32.mxu0 %v8768_v24  ;;  %1909 = vmatprep.mubr.f32.mxu1 %v8768_v24 }
 0x24f   :  { %4721 = vmatpush1.bf16.msra.mxu0 %v6423_v36  ;;  %4753 = vmatpush1.bf16.msra.mxu1 %v6432_v54 }
 0x250   :  { %4723 = vmatprep.subr.bf16.mxu0 %v6446_v39  ;;  %4755 = vmatprep.subr.bf16.mxu1 %v6457_v58  ;;  %v50_v58 = vld [vmem:[%s8704_s1 + $0x98] sm:$0xff] }
 0x253   :  { %4725 = vmatpush1.bf16.msra.mxu0 %v6459_v3  ;;  %4757 = vmatpush1.bf16.msra.mxu1 %v6468_v18  ;;  %v48_v18 = vld [vmem:[%s8704_s1 + $0x90] sm:$0xff] }
 0x254   :  { %4727 = vmatprep.subr.bf16.mxu0 %v6482_v34  ;;  %4759 = vmatprep.subr.bf16.mxu1 %v6493_v32 }
 0x257   :  { %4729 = vmatpush1.bf16.msra.mxu0 %v6495_v37  ;;  %4761 = vmatpush1.bf16.msra.mxu1 %v6504_v22 }
 0x258   :  { %4731 = vmatprep.subr.bf16.mxu0 %v6518_v35  ;;  %4763 = vmatprep.subr.bf16.mxu1 %v6529_v2 }
 0x25b   :  { %4733 = vmatpush1.bf16.msra.mxu0 %v6531_v6  ;;  %4765 = vmatpush1.bf16.msra.mxu1 %v6540_v7 }
 0x25c   :  { %4735 = vmatprep.subr.bf16.mxu0 %v6557_v56  ;;  %4767 = vmatprep.subr.bf16.mxu1 %v6559_v59 }
 0x25f   :  { %4737 = vmatpush1.bf16.msra.mxu0 %v6570_v19  ;;  %4769 = vmatpush1.bf16.msra.mxu1 %v6577_v28 }
 0x260   :  { %4739 = vmatprep.subr.bf16.mxu0 %v6589_v12  ;;  %4771 = vmatprep.subr.bf16.mxu1 %v6601_v4  ;;  %v4236_v4 = vld [vmem:[%s8705_s2 + $0x160] sm:$0xff] }
 0x263   :  { %4741 = vmatpush1.bf16.msra.mxu0 %v6603_v9  ;;  %4773 = vmatpush1.bf16.msra.mxu1 %v6612_v26  ;;  %v4237_v9 = vld [vmem:[%s8705_s2 + $0x168] sm:$0xff] }
 0x264   :  { %4743 = vmatprep.subr.bf16.mxu0 %v6625_v62  ;;  %4775 = vmatprep.subr.bf16.mxu1 %v6637_v0 }
 0x267   :  { %4745 = vmatpush1.bf16.msra.mxu0 %v6639_v48  ;;  %4777 = vmatpush1.bf16.msra.mxu1 %v6648_v46 }
 0x268   :  { %4779 = vmatprep.subr.bf16.mxu0 %v6661_v30  ;;  %4811 = vmatprep.subr.bf16.mxu1 %v6667_v47 }
 0x2fd   :  { %v1346_v49 = vpop.f32.mrb[8].mxu0  ;;  %v1417_v53 = vpop.f32.mrb[8].mxu1 }
 0x2fe   :  { %v1422_v63 = vadd.f32 %v1346_v49, %v44_v13  ;;  %v1348_v16 = vpop.f32.mrb[9].mxu0  ;;  %v1419_v33 = vpop.f32.mrb[9].mxu1  ;;  %v1424_v32 = vadd.f32 %v1417_v53, %v48_v18  ;;  %v8794_v18 = vld [vmem:[#allocation10_spill] sm:$0xff] }
 0x2ff   :  { %v1423_v36 = vadd.f32 %v1348_v16, %v46_v29  ;;  %v1425_v3 = vadd.f32 %v1419_v33, %v50_v58  ;;  %v8792_v58 = vld [vmem:[#allocation12_spill] sm:$0xff] }
 0x300   :  { %v4268_v54 = vmul.f32 -1.442695, %v1422_v63 }
 0x301   :  { %v4269_v39 = vmul.f32 -1.442695, %v1423_v36  ;;  %v4270_v34 = vmul.f32 -1.442695, %v1425_v3  ;;  %v8793_v3 = vld [vmem:[#allocation9_spill] sm:$0xff] }
 0x302   :  { %5421 = vpow2.f32 %v4268_v54 }
 0x303   :  { %5423 = vpow2.f32 %v4269_v39  ;;  %v8791_v39 = vld [vmem:[#allocation8_spill] sm:$0xff] }
 0x304   :  { %5425 = vpow2.f32 %v4270_v34  ;;  %v8795_v34 = vld [vmem:[#allocation13_spill] sm:$0xff] }
 0x305   :  { %5427 = vtanh.f32 %v1424_v32  ;;  %v8796_v32 = vld [vmem:[#allocation14_spill] sm:$0xff] }
 0x30c   :  { %v5422_v37 = vpop.eup %5421 }
 0x30d   :  { %v5424_v22 = vpop.eup %5423  ;;  %v1429_v35 = vadd.f32 1.0, %v5422_v37  ;;  %v8798_v37 = vld [vmem:[#allocation16_spill] sm:$0xff] }
 0x30e   :  { %v1435_v2 = vadd.f32 1.0, %v5424_v22  ;;  %v5426_v6 = vpop.eup %5425 }
 0x30f   :  { %5429 = vrcp.f32 %v1429_v35  ;;  %v5428_v7 = vpop.eup %5427  ;;  %v1442_v28 = vadd.f32 1.0, %v5426_v6  ;;  %v8799_v35 = vld [vmem:[#allocation17_spill] sm:$0xff] }
 0x310   :  { %5431 = vrcp.f32 %v1435_v2  ;;  %v8800_v2 = vld [vmem:[#allocation18_spill] sm:$0xff] }
 0x311   :  { %5433 = vrcp.f32 %v1442_v28 }
 0x319   :  { %v5430_v56 = vpop.eup %5429 }
 0x31a   :  { %v5432_v59 = vpop.eup %5431  ;;  %v1446_v19 = vmul.f32 %v5430_v56, %v5428_v7 }
 0x31b   :  { %v1445_v12 = vmul.f32 %v5432_v59, %v6695_v23  ;;  %v5434_v40 = vpop.eup %5433 }
 0x31d   :  { %v1447_v26 = vadd.f32 %v1446_v19, %v1445_v12  ;;  %v1593_v62 = vpop.f32.mrb[10].mxu0  ;;  %v1664_v0 = vpop.f32.mrb[10].mxu1  ;;  %v8801_v12 = vld [vmem:[#allocation19_spill] sm:$0xff] }
 0x31e   :  { %v1669_v48 = vadd.f32 %v4236_v4, %v1593_v62  ;;  %v1595_v46 = vpop.f32.mrb[11].mxu0  ;;  %v1666_v30 = vpop.f32.mrb[11].mxu1  ;;  %v1671_v49 = vadd.f32 %v4238_v45, %v1664_v0  ;;  %v2213_v0 = vld [vmem:[%s8706_s3 + $0x48] sm:$0xff]  ;;  %v2214_v45 = vld [vmem:[%s8706_s3 + $0x50] sm:$0xff] }
 0x31f   :  { %v1670_v47 = vadd.f32 %v4237_v9, %v1595_v46  ;;  %5435 = vtanh.f32 %v1447_v26  ;;  %v7066_v14 = vsel %vm4267_vm4, %v1447_v26, %v6695_v23  ;;  %v1672_v61 = vadd.f32 %v4239_v52, %v1666_v30  ;;  %v8802_v9 = vld [vmem:[#allocation20_spill] sm:$0xff]  ;;  %v2210_v26 = vld [vmem:[%s8706_s3 + $0x30] sm:$0xff]  ;;  %v2215_v46 = vld [vmem:[%s8706_s3 + $0x58] sm:$0xff] }
 0x320   :  { %v4273_v43 = vmul.f32 -1.442695, %v1669_v48  ;;  %v2217_v48 = vld [vmem:[%s8706_s3 + $0x68] sm:$0xff] }
 0x321   :  { %v4274_v55 = vmul.f32 -1.442695, %v1670_v47  ;;  %v4275_v29 = vmul.f32 -1.442695, %v1672_v61  ;;  %v7184_v30 = vpack.c.bf16 %v2217_v48, %v2213_v0  ;;  %v2219_v47 = vld [vmem:[%s8706_s3 + $0x78] sm:$0xff]  ;;  %v2244_v0 = vld [vmem:[%s8706_s3 + $0x140] sm:$0xff] }
 0x322   :  { %5437 = vpow2.f32 %v4273_v43  ;;  %v2212_v43 = vld [vmem:[%s8706_s3 + $0x40] sm:$0xff]  ;;  %v7195_v52 = vpack.c.bf16 %v2219_v47, %v2215_v46  ;;  %v2246_v46 = vld [vmem:[%s8706_s3 + $0x150] sm:$0xff] }
 0x323   :  { %5439 = vpow2.f32 %v4274_v55  ;;  %v2216_v55 = vld [vmem:[%s8706_s3 + $0x60] sm:$0xff] }
 0x324   :  { %5441 = vpow2.f32 %v4275_v29  ;;  %v7197_v61 = vpack.c.bf16 %v2216_v55, %v2212_v43  ;;  %v2221_v29 = vld [vmem:[%s8706_s3 + $0x88] sm:$0xff]  ;;  %v2248_v48 = vld [vmem:[%s8706_s3 + $0x160] sm:$0xff]  ;;  %v2250_v43 = vld [vmem:[%s8706_s3 + $0x170] sm:$0xff] }
 0x325   :  { %5443 = vtanh.f32 %v1671_v49  ;;  %v2225_v49 = vld [vmem:[%s8706_s3 + $0xa8] sm:$0xff]  ;;  %v7344_v47 = vpack.c.bf16 %v2248_v48, %v2244_v0  ;;  %v7351_v55 = vpack.c.bf16 %v2250_v43, %v2246_v46  ;;  %v52_v0 = vld [vmem:[%s8704_s1 + $0xc0] sm:$0xff] }
 0x326   :  { %v54_v48 = vld [vmem:[%s8704_s1 + $0xc8] sm:$0xff] }
 0x329   :  { %v5436_v13 = vpop.eup %5435 }
 0x32a   :  { %v1449_v53 = vmul.f32 %v5436_v13, %v5434_v40  ;;  %v2218_v40 = vld [vmem:[%s8706_s3 + $0x70] sm:$0xff] }
 0x32b   :  { %v7206_v13 = vpack.c.bf16 %v2218_v40, %v2214_v45  ;;  %v2253_v45 = vld [vmem:[%s8706_s3 + $0x188] sm:$0xff] }
 0x32c   :  { %v5438_v23 = vpop.eup %5437  ;;  %v7077_v63 = vsel %vm4267_vm4, %v1449_v53, %v6753_v60  ;;  %v1452_v16 = vsel %vm4267_vm4, %v1449_v53, 0.0  ;;  %v8790_v60 = vld [vmem:[#allocation11_spill] sm:$0xff]  ;;  %v2257_v40 = vld [vmem:[%s8706_s3 + $0x1a8] sm:$0xff] }
 0x32d   :  { %v5440_v33 = vpop.eup %5439  ;;  %v1676_v36 = vadd.f32 1.0, %v5438_v23  ;;  %4271 = vst [vmem:[%s8708_s5 + $0x10] sm:$0xff] %v1452_v16  ;;  %1839 = vmatmul.mubr.f32.vlgmr.msra.gmra.mrb[12].mxu0 %v7077_v63  ;;  %1910 = vmatmul.mubr.f32.vlgmr.msra.gmra.mrb[12].mxu1 %v7077_v63  ;;  %v2223_v53 = vld [vmem:[%s8706_s3 + $0x98] sm:$0xff]  ;;  %v7220_v23 = vpack.c.bf16 %v2225_v49, %v2221_v29  ;;  %v7363_v49 = vpack.c.bf16 %v2257_v40, %v2253_v45 }
 0x32e   :  { %v1682_v54 = vadd.f32 1.0, %v5440_v33  ;;  %4781 = vmatpush1.bf16.msra.mxu0 %v6727_v5  ;;  %4813 = vmatpush1.bf16.msra.mxu1 %v8790_v60  ;;  %v8797_v5 = vld [vmem:[#allocation15_spill] sm:$0xff]  ;;  %v5442_v22 = vpop.eup %5441  ;;  %v2220_v33 = vld [vmem:[%s8706_s3 + $0x80] sm:$0xff] }
 0x32f   :  { %5445 = vrcp.f32 %v1676_v36  ;;  %4783 = vmatprep.subr.bf16.mxu0 %v8791_v39  ;;  %4815 = vmatprep.subr.bf16.mxu1 %v8792_v58  ;;  %v5444_v6 = vpop.eup %5443  ;;  %v1689_v19 = vadd.f32 1.0, %v5442_v22  ;;  %v2227_v16 = vld [vmem:[%s8706_s3 + $0xb8] sm:$0xff]  ;;  %v2224_v36 = vld [vmem:[%s8706_s3 + $0xa0] sm:$0xff]  ;;  %v2222_v39 = vld [vmem:[%s8706_s3 + $0x90] sm:$0xff] }
 0x330   :  { %5447 = vrcp.f32 %v1682_v54  ;;  %2085 = vmatprep.mubr.f32.mxu0 %v8768_v24  ;;  %2156 = vmatprep.mubr.f32.mxu1 %v8768_v24  ;;  %v7231_v54 = vpack.c.bf16 %v2227_v16, %v2223_v53  ;;  %v7233_v60 = vpack.c.bf16 %v2224_v36, %v2220_v33  ;;  %v2226_v58 = vld [vmem:[%s8706_s3 + $0xb0] sm:$0xff]  ;;  %v2228_v22 = vld [vmem:[%s8706_s3 + $0xc0] sm:$0xff]  ;;  %v2255_v29 = vld [vmem:[%s8706_s3 + $0x198] sm:$0xff] }
 0x331   :  { %5449 = vrcp.f32 %v1689_v19  ;;  %v2237_v19 = vld [vmem:[%s8706_s3 + $0x108] sm:$0xff]  ;;  %v2259_v53 = vld [vmem:[%s8706_s3 + $0x1b8] sm:$0xff]  ;;  %v2252_v16 = vld [vmem:[%s8706_s3 + $0x180] sm:$0xff] }
 0x332   :  { %4785 = vmatpush1.bf16.msra.mxu0 %v8793_v3  ;;  %4817 = vmatpush1.bf16.msra.mxu1 %v8794_v18  ;;  %v7242_v3 = vpack.c.bf16 %v2226_v58, %v2222_v39  ;;  %v2229_v18 = vld [vmem:[%s8706_s3 + $0xc8] sm:$0xff]  ;;  %v2256_v33 = vld [vmem:[%s8706_s3 + $0x1a0] sm:$0xff]  ;;  %v7375_v36 = vpack.c.bf16 %v2259_v53, %v2255_v29  ;;  %v2254_v58 = vld [vmem:[%s8706_s3 + $0x190] sm:$0xff] }
 0x333   :  { %4787 = vmatprep.subr.bf16.mxu0 %v8795_v34  ;;  %4819 = vmatprep.subr.bf16.mxu1 %v8796_v32  ;;  %v2233_v34 = vld [vmem:[%s8706_s3 + $0xe8] sm:$0xff]  ;;  %v2231_v32 = vld [vmem:[%s8706_s3 + $0xd8] sm:$0xff]  ;;  %v7377_v39 = vpack.c.bf16 %v2256_v33, %v2252_v16 }
 0x336   :  { %4789 = vmatpush1.bf16.msra.mxu0 %v8797_v5  ;;  %4821 = vmatpush1.bf16.msra.mxu1 %v8798_v37  ;;  %v7256_v5 = vpack.c.bf16 %v2233_v34, %v2229_v18  ;;  %v2235_v37 = vld [vmem:[%s8706_s3 + $0xf8] sm:$0xff]  ;;  %v2258_v18 = vld [vmem:[%s8706_s3 + $0x1b0] sm:$0xff] }
 0x337   :  { %4791 = vmatprep.subr.bf16.mxu0 %v8799_v35  ;;  %4823 = vmatprep.subr.bf16.mxu1 %v8800_v2  ;;  %v2232_v35 = vld [vmem:[%s8706_s3 + $0xe0] sm:$0xff]  ;;  %v7267_v2 = vpack.c.bf16 %v2235_v37, %v2231_v32  ;;  %v7386_v34 = vpack.c.bf16 %v2258_v18, %v2254_v58  ;;  %v2261_v32 = vld [vmem:[%s8706_s3 + $0x1c8] sm:$0xff]  ;;  %v58_v58 = vld [vmem:[%s8704_s1 + $0xd8] sm:$0xff] }
 0x338   :  { %v2265_v37 = vld [vmem:[%s8706_s3 + $0x1e8] sm:$0xff] }
 0x339   :  { %v5446_v7 = vpop.eup %5445 }
 0x33a   :  { %v5448_v56 = vpop.eup %5447  ;;  %v1693_v59 = vmul.f32 %v5446_v7, %v5444_v6  ;;  %4793 = vmatpush1.bf16.msra.mxu0 %v6847_v15  ;;  %4825 = vmatpush1.bf16.msra.mxu1 %v6849_v50  ;;  %v7269_v6 = vpack.c.bf16 %v2232_v35, %v2228_v22  ;;  %v2230_v7 = vld [vmem:[%s8706_s3 + $0xd0] sm:$0xff]  ;;  %v2263_v22 = vld [vmem:[%s8706_s3 + $0x1d8] sm:$0xff]  ;;  %v7399_v35 = vpack.c.bf16 %v2265_v37, %v2261_v32 }
 0x33b   :  { %v1692_v28 = vmul.f32 %v5448_v56, %v6950_v38  ;;  %4795 = vmatprep.subr.bf16.mxu0 %v6859_v21  ;;  %4827 = vmatprep.subr.bf16.mxu1 %v8801_v12  ;;  %v8803_v21 = vld [vmem:[#allocation21_spill] sm:$0xff]  ;;  %v2234_v56 = vld [vmem:[%s8706_s3 + $0xf0] sm:$0xff]  ;;  %v2239_v12 = vld [vmem:[%s8706_s3 + $0x118] sm:$0xff] }
 0x33c   :  { %v56_v32 = vld [vmem:[%s8704_s1 + $0xd0] sm:$0xff] }
 0x33d   :  { %v1694_v4 = vadd.f32 %v1693_v59, %v1692_v28  ;;  %v7278_v59 = vpack.c.bf16 %v2234_v56, %v2230_v7  ;;  %v2241_v28 = vld [vmem:[%s8706_s3 + $0x128] sm:$0xff]  ;;  %v2267_v7 = vld [vmem:[%s8706_s3 + $0x1f8] sm:$0xff]  ;;  %v2260_v56 = vld [vmem:[%s8706_s3 + $0x1c0] sm:$0xff] }
 0x33e   :  { %4797 = vmatpush1.bf16.msra.mxu0 %v6886_v20  ;;  %4829 = vmatpush1.bf16.msra.mxu1 %v6888_v31  ;;  %v5450_v31 = vpop.eup %5449 }
 0x33f   :  { %4799 = vmatprep.subr.bf16.mxu0 %v6898_v42  ;;  %4831 = vmatprep.subr.bf16.mxu1 %v8802_v9  ;;  %5451 = vtanh.f32 %v1694_v4  ;;  %v7113_v15 = vsel %vm4272_vm5, %v1694_v4, %v6950_v38  ;;  %v7292_v4 = vpack.c.bf16 %v2241_v28, %v2237_v19  ;;  %v2243_v9 = vld [vmem:[%s8706_s3 + $0x138] sm:$0xff]  ;;  %v2264_v19 = vld [vmem:[%s8706_s3 + $0x1e0] sm:$0xff]  ;;  %v7411_v28 = vpack.c.bf16 %v2267_v7, %v2263_v22 }
 0x342   :  { %4801 = vmatpush1.bf16.msra.mxu0 %v6922_v11  ;;  %4833 = vmatpush1.bf16.msra.mxu1 %v8803_v21  ;;  %v2236_v21 = vld [vmem:[%s8706_s3 + $0x100] sm:$0xff] }
 0x343   :  { %4803 = vmatprep.subr.bf16.mxu0 %v6935_v1  ;;  %4835 = vmatprep.subr.bf16.mxu1 %v6937_v57  ;;  %v2209_v1 = vld [vmem:[%s8706_s3 + $0x28] sm:$0xff]  ;;  %v2207_v57 = vld [vmem:[%s8706_s3 + $0x18] sm:$0xff] }
 0x346   :  { %4805 = vmatpush1.bf16.msra.mxu0 %v6963_v17  ;;  %4837 = vmatpush1.bf16.msra.mxu1 %v6965_v41  ;;  %v2211_v17 = vld [vmem:[%s8706_s3 + $0x38] sm:$0xff]  ;;  %v2204_v41 = vld [vmem:[%s8706_s3] sm:$0xff] }
 0x347   :  { %4807 = vmatprep.subr.bf16.mxu0 %v6972_v10  ;;  %4839 = vmatprep.subr.bf16.mxu1 %v6974_v27  ;;  %v2205_v27 = vld [vmem:[%s8706_s3 + $0x8] sm:$0xff]  ;;  %v2208_v10 = vld [vmem:[%s8706_s3 + $0x20] sm:$0xff] }
 0x348   :  { %v7148_v38 = vpack.c.bf16 %v2209_v1, %v2205_v27  ;;  %v2242_v27 = vld [vmem:[%s8706_s3 + $0x130] sm:$0xff] }
 0x349   :  { %v5452_v20 = vpop.eup %5451 }
 0x34a   :  { %4809 = vmatpush1.bf16.msra.mxu0 %v6987_v44  ;;  %4841 = vmatpush1.bf16.msra.mxu1 %v6989_v25  ;;  %v1696_v50 = vmul.f32 %v5452_v20, %v5450_v31  ;;  %v7159_v44 = vpack.c.bf16 %v2211_v17, %v2207_v57  ;;  %v7161_v25 = vpack.c.bf16 %v2208_v10, %v2204_v41  ;;  %v2240_v31 = vld [vmem:[%s8706_s3 + $0x120] sm:$0xff]  ;;  %v2245_v57 = vld [vmem:[%s8706_s3 + $0x148] sm:$0xff]  ;;  %v2247_v41 = vld [vmem:[%s8706_s3 + $0x158] sm:$0xff] }
 0x34b   :  { %4843 = vmatprep.subr.bf16.mxu0 %v7148_v38  ;;  %v7303_v20 = vpack.c.bf16 %v2243_v9, %v2239_v12  ;;  %v2249_v17 = vld [vmem:[%s8706_s3 + $0x168] sm:$0xff]  ;;  %v2251_v10 = vld [vmem:[%s8706_s3 + $0x178] sm:$0xff]  ;;  %v7413_v12 = vpack.c.bf16 %v2264_v19, %v2260_v56  ;;  %v2262_v9 = vld [vmem:[%s8706_s3 + $0x1d0] sm:$0xff] }
 0x34c   :  { %v7128_v42 = vsel %vm4272_vm5, %v1696_v50, %v7000_v51  ;;  %v1699_v11 = vsel %vm4272_vm5, %v1696_v50, 0.0  ;;  %v2206_v51 = vld [vmem:[%s8706_s3 + $0x10] sm:$0xff]  ;;  %4875 = vmatprep.subr.bf16.mxu1 %v7159_v44  ;;  %v7305_v50 = vpack.c.bf16 %v2240_v31, %v2236_v21 }
 0x34d   :  { %4276 = vst [vmem:[%s8709_s6 + $0x28] sm:$0xff] %v1699_v11  ;;  %2086 = vmatmul.mubr.f32.vlgmr.msra.gmra.mrb[14].mxu0 %v7128_v42  ;;  %2157 = vmatmul.mubr.f32.vlgmr.msra.gmra.mrb[14].mxu1 %v7128_v42  ;;  %v7170_v62 = vpack.c.bf16 %v2210_v26, %v2206_v51  ;;  %v2238_v11 = vld [vmem:[%s8706_s3 + $0x110] sm:$0xff]  ;;  %v7331_v51 = vpack.c.bf16 %v2249_v17, %v2245_v57  ;;  %v2454_v57 = vld [vmem:[%s8707_s4 + $0x18] sm:$0xff] }
 0x34e   :  { %2332 = vmatprep.mubr.f32.mxu0 %v8768_v24  ;;  %2403 = vmatprep.mubr.f32.mxu1 %v8768_v24  ;;  %v7314_v1 = vpack.c.bf16 %v2242_v27, %v2238_v11  ;;  %v7333_v26 = vpack.c.bf16 %v2251_v10, %v2247_v41  ;;  %v2266_v21 = vld [vmem:[%s8706_s3 + $0x1f0] sm:$0xff]  ;;  %v2452_v11 = vld [vmem:[%s8707_s4 + $0x8] sm:$0xff]  ;;  %v2458_v41 = vld [vmem:[%s8707_s4 + $0x38] sm:$0xff] }
 0x34f   :  { %4845 = vmatpush1.bf16.msra.mxu0 %v7161_v25  ;;  %4877 = vmatpush1.bf16.msra.mxu1 %v7170_v62  ;;  %v7422_v31 = vpack.c.bf16 %v2266_v21, %v2262_v9  ;;  %v2456_v27 = vld [vmem:[%s8707_s4 + $0x28] sm:$0xff]  ;;  %v7441_v10 = vpack.c.bf16 %v2458_v41, %v2454_v57 }
 0x350   :  { %4847 = vmatprep.subr.bf16.mxu0 %v7184_v30  ;;  %4879 = vmatprep.subr.bf16.mxu1 %v7195_v52  ;;  %v7435_v17 = vpack.c.bf16 %v2456_v27, %v2452_v11 }
 0x353   :  { %4849 = vmatpush1.bf16.msra.mxu0 %v7197_v61  ;;  %4881 = vmatpush1.bf16.msra.mxu1 %v7206_v13 }
 0x354   :  { %4851 = vmatprep.subr.bf16.mxu0 %v7220_v23  ;;  %4883 = vmatprep.subr.bf16.mxu1 %v7231_v54 }
 0x357   :  { %4853 = vmatpush1.bf16.msra.mxu0 %v7233_v60  ;;  %4885 = vmatpush1.bf16.msra.mxu1 %v7242_v3 }
 0x358   :  { %4855 = vmatprep.subr.bf16.mxu0 %v7256_v5  ;;  %4887 = vmatprep.subr.bf16.mxu1 %v7267_v2 }
 0x35b   :  { %4857 = vmatpush1.bf16.msra.mxu0 %v7269_v6  ;;  %4889 = vmatpush1.bf16.msra.mxu1 %v7278_v59 }
 0x35c   :  { %4859 = vmatprep.subr.bf16.mxu0 %v7292_v4  ;;  %4891 = vmatprep.subr.bf16.mxu1 %v7303_v20 }
 0x35f   :  { %4861 = vmatpush1.bf16.msra.mxu0 %v7305_v50  ;;  %4893 = vmatpush1.bf16.msra.mxu1 %v7314_v1 }
 0x360   :  { %4863 = vmatprep.subr.bf16.mxu0 %v7331_v51  ;;  %4895 = vmatprep.subr.bf16.mxu1 %v7333_v26 }
 0x363   :  { %4865 = vmatpush1.bf16.msra.mxu0 %v7344_v47  ;;  %4897 = vmatpush1.bf16.msra.mxu1 %v7351_v55 }
 0x364   :  { %4867 = vmatprep.subr.bf16.mxu0 %v7363_v49  ;;  %4899 = vmatprep.subr.bf16.mxu1 %v7375_v36 }
 0x367   :  { %4869 = vmatpush1.bf16.msra.mxu0 %v7377_v39  ;;  %4901 = vmatpush1.bf16.msra.mxu1 %v7386_v34 }
 0x368   :  { %4871 = vmatprep.subr.bf16.mxu0 %v7399_v35  ;;  %4903 = vmatprep.subr.bf16.mxu1 %v7411_v28 }
 0x36b   :  { %4873 = vmatpush1.bf16.msra.mxu0 %v7413_v12  ;;  %4905 = vmatpush1.bf16.msra.mxu1 %v7422_v31 }
 0x36c   :  { %4907 = vmatprep.subr.bf16.mxu0 %v7435_v17  ;;  %4939 = vmatprep.subr.bf16.mxu1 %v7441_v10 }
 0x400   :  { %v1840_v46 = vpop.f32.mrb[12].mxu0  ;;  %v1911_v43 = vpop.f32.mrb[12].mxu1 }
 0x401   :  { %v1916_v45 = vadd.f32 %v1840_v46, %v52_v0  ;;  %v1842_v40 = vpop.f32.mrb[13].mxu0  ;;  %v1913_v29 = vpop.f32.mrb[13].mxu1  ;;  %v1918_v22 = vadd.f32 %v1911_v43, %v56_v32  ;;  %v4232_v46 = vld [vmem:[%s8705_s2 + $0x120] sm:$0xff]  ;;  %v4233_v43 = vld [vmem:[%s8705_s2 + $0x128] sm:$0xff] }
 0x402   :  { %v1917_v53 = vadd.f32 %v1842_v40, %v54_v48  ;;  %v1919_v18 = vadd.f32 %v1913_v29, %v58_v58 }
 0x403   :  { %v4278_v16 = vmul.f32 -1.442695, %v1916_v45 }
 0x404   :  { %v4279_v33 = vmul.f32 -1.442695, %v1917_v53  ;;  %v4280_v37 = vmul.f32 -1.442695, %v1919_v18 }
 0x405   :  { %5453 = vpow2.f32 %v4278_v16 }
 0x406   :  { %5455 = vpow2.f32 %v4279_v33 }
 0x407   :  { %5457 = vpow2.f32 %v4280_v37 }
 0x408   :  { %5459 = vtanh.f32 %v1918_v22  ;;  %v4235_v22 = vld [vmem:[%s8705_s2 + $0x138] sm:$0xff] }
 0x40f   :  { %v5454_v7 = vpop.eup %5453 }
 0x410   :  { %v5456_v56 = vpop.eup %5455  ;;  %v1923_v19 = vadd.f32 1.0, %v5454_v7 }
 0x411   :  { %v1929_v9 = vadd.f32 1.0, %v5456_v56  ;;  %v5458_v21 = vpop.eup %5457  ;;  %v4234_v56 = vld [vmem:[%s8705_s2 + $0x130] sm:$0xff] }
 0x412   :  { %5461 = vrcp.f32 %v1923_v19  ;;  %v5460_v11 = vpop.eup %5459  ;;  %v1936_v0 = vadd.f32 1.0, %v5458_v21  ;;  %v2451_v19 = vld [vmem:[%s8707_s4] sm:$0xff]  ;;  %v2457_v21 = vld [vmem:[%s8707_s4 + $0x30] sm:$0xff] }
 0x413   :  { %5463 = vrcp.f32 %v1929_v9  ;;  %v2453_v9 = vld [vmem:[%s8707_s4 + $0x10] sm:$0xff] }
 0x414   :  { %5465 = vrcp.f32 %v1936_v0  ;;  %v2466_v0 = vld [vmem:[%s8707_s4 + $0x78] sm:$0xff] }
 0x41c   :  { %v5462_v27 = vpop.eup %5461 }
 0x41d   :  { %v5464_v57 = vpop.eup %5463  ;;  %v1940_v41 = vmul.f32 %v5462_v27, %v5460_v11  ;;  %v2460_v11 = vld [vmem:[%s8707_s4 + $0x48] sm:$0xff] }
 0x41e   :  { %v1939_v48 = vmul.f32 %v5464_v57, %v7066_v14  ;;  %v5466_v27 = vpop.eup %5465  ;;  %v2464_v57 = vld [vmem:[%s8707_s4 + $0x68] sm:$0xff] }
 0x420   :  { %v1941_v45 = vadd.f32 %v1940_v41, %v1939_v48  ;;  %v2087_v40 = vpop.f32.mrb[14].mxu0  ;;  %v2158_v29 = vpop.f32.mrb[14].mxu1  ;;  %v2462_v41 = vld [vmem:[%s8707_s4 + $0x58] sm:$0xff] }
 0x421   :  { %v2163_v53 = vadd.f32 %v4232_v46, %v2087_v40  ;;  %v2089_v16 = vpop.f32.mrb[15].mxu0  ;;  %v2160_v33 = vpop.f32.mrb[15].mxu1 }
 0x422   :  { %v2164_v58 = vadd.f32 %v4233_v43, %v2089_v16  ;;  %5467 = vtanh.f32 %v1941_v45  ;;  %v7468_v18 = vsel %vm4277_vm6, %v1941_v45, %v7066_v14  ;;  %v2166_v7 = vadd.f32 %v4235_v22, %v2160_v33  ;;  %v2455_v14 = vld [vmem:[%s8707_s4 + $0x20] sm:$0xff]  ;;  %v2468_v22 = vld [vmem:[%s8707_s4 + $0x88] sm:$0xff] }
 0x423   :  { %v4283_v32 = vmul.f32 -1.442695, %v2163_v53  ;;  %v2165_v43 = vadd.f32 %v4234_v56, %v2158_v29  ;;  %v7500_v40 = vpack.c.bf16 %v2455_v14, %v2451_v19  ;;  %v7502_v53 = vpack.c.bf16 %v2457_v21, %v2453_v9  ;;  %v2459_v16 = vld [vmem:[%s8707_s4 + $0x40] sm:$0xff]  ;;  %v2461_v29 = vld [vmem:[%s8707_s4 + $0x50] sm:$0xff]  ;;  %v2472_v14 = vld [vmem:[%s8707_s4 + $0xa8] sm:$0xff] }
 0x424   :  { %v4284_v37 = vmul.f32 -1.442695, %v2164_v58  ;;  %v4285_v46 = vmul.f32 -1.442695, %v2166_v7  ;;  %v2463_v33 = vld [vmem:[%s8707_s4 + $0x60] sm:$0xff]  ;;  %v7510_v58 = vpack.c.bf16 %v2464_v57, %v2460_v11  ;;  %v2470_v9 = vld [vmem:[%s8707_s4 + $0x98] sm:$0xff] }
 0x425   :  { %5469 = vpow2.f32 %v4283_v32  ;;  %8804 = vst [vmem:[#allocation11_spill] sm:$0xff] %v7502_v53  ;;  %v7512_v32 = vpack.c.bf16 %v2466_v0, %v2462_v41  ;;  %v2474_v21 = vld [vmem:[%s8707_s4 + $0xb8] sm:$0xff]  ;;  %v7546_v57 = vpack.c.bf16 %v2463_v33, %v2459_v16  ;;  %v2467_v0 = vld [vmem:[%s8707_s4 + $0x80] sm:$0xff]  ;;  %v2473_v16 = vld [vmem:[%s8707_s4 + $0xb0] sm:$0xff] }
 0x426   :  { %5471 = vpow2.f32 %v4284_v37  ;;  %8805 = vst [vmem:[#allocation8_spill] sm:$0xff] %v7510_v58  ;;  %v2465_v37 = vld [vmem:[%s8707_s4 + $0x70] sm:$0xff]  ;;  %v2476_v33 = vld [vmem:[%s8707_s4 + $0xc8] sm:$0xff] }
 0x427   :  { %8806 = vst [vmem:[#allocation12_spill] sm:$0xff] %v7512_v32  ;;  %5473 = vpow2.f32 %v4285_v46  ;;  %8807 = vst [vmem:[#allocation9_spill] sm:$0xff] %v7546_v57  ;;  %v7548_v41 = vpack.c.bf16 %v2465_v37, %v2461_v29  ;;  %v7558_v46 = vpack.c.bf16 %v2472_v14, %v2468_v22  ;;  %v2480_v29 = vld [vmem:[%s8707_s4 + $0xe8] sm:$0xff]  ;;  %v2478_v37 = vld [vmem:[%s8707_s4 + $0xd8] sm:$0xff] }
 0x428   :  { %5475 = vtanh.f32 %v2165_v43  ;;  %v7560_v43 = vpack.c.bf16 %v2474_v21, %v2470_v9  ;;  %v2482_v22 = vld [vmem:[%s8707_s4 + $0xf8] sm:$0xff]  ;;  %v2475_v14 = vld [vmem:[%s8707_s4 + $0xc0] sm:$0xff]  ;;  %v7596_v21 = vpack.c.bf16 %v2480_v29, %v2476_v33 }
 0x429   :  { %8808 = vst [vmem:[#allocation10_spill] sm:$0xff] %v7548_v41  ;;  %8809 = vst [vmem:[#allocation13_spill] sm:$0xff] %v7558_v46  ;;  %v2479_v9 = vld [vmem:[%s8707_s4 + $0xe0] sm:$0xff] }
 0x42a   :  { %8810 = vst [vmem:[#allocation14_spill] sm:$0xff] %v7560_v43  ;;  %8813 = vst [vmem:[#allocation17_spill] sm:$0xff] %v7596_v21  ;;  %v7620_v33 = vpack.c.bf16 %v2479_v9, %v2475_v14  ;;  %v2485_v14 = vld [vmem:[%s8707_s4 + $0x110] sm:$0xff] }
 0x42b   :  { %v2489_v9 = vld [vmem:[%s8707_s4 + $0x130] sm:$0xff] }
 0x42c   :  { %v5468_v48 = vpop.eup %5467 }
 0x42d   :  { %v1943_v45 = vmul.f32 %v5468_v48, %v5466_v27  ;;  %v2471_v48 = vld [vmem:[%s8707_s4 + $0xa0] sm:$0xff] }
 0x42f   :  { %v5470_v7 = vpop.eup %5469  ;;  %v7526_v56 = vsel %vm4277_vm6, %v1943_v45, %v7077_v63  ;;  %v1946_v19 = vsel %vm4277_vm6, %v1943_v45, 0.0  ;;  %v2469_v45 = vld [vmem:[%s8707_s4 + $0x90] sm:$0xff] }
 0x430   :  { %v5472_v11 = vpop.eup %5471  ;;  %v2170_v27 = vadd.f32 1.0, %v5470_v7  ;;  %4281 = vst [vmem:[%s8708_s5 + $0x18] sm:$0xff] %v1946_v19  ;;  %2333 = vmatmul.mubr.f32.vlgmr.msra.gmra.mrb[16].mxu0 %v7526_v56  ;;  %2404 = vmatmul.mubr.f32.vlgmr.msra.gmra.mrb[16].mxu1 %v7526_v56  ;;  %v7584_v7 = vpack.c.bf16 %v2471_v48, %v2467_v0  ;;  %v7586_v19 = vpack.c.bf16 %v2473_v16, %v2469_v45  ;;  %v2484_v0 = vld [vmem:[%s8707_s4 + $0x108] sm:$0xff]  ;;  %v2486_v45 = vld [vmem:[%s8707_s4 + $0x118] sm:$0xff] }
 0x431   :  { %v2176_v63 = vadd.f32 1.0, %v5472_v11  ;;  %4909 = vmatpush1.bf16.msra.mxu0 %v7500_v40  ;;  %4941 = vmatpush1.bf16.msra.mxu1 %v7502_v53  ;;  %v7598_v11 = vpack.c.bf16 %v2482_v22, %v2478_v37  ;;  %v2488_v48 = vld [vmem:[%s8707_s4 + $0x128] sm:$0xff]  ;;  %v2490_v16 = vld [vmem:[%s8707_s4 + $0x138] sm:$0xff]  ;;  %v2483_v37 = vld [vmem:[%s8707_s4 + $0x100] sm:$0xff] }
 0x432   :  { %5477 = vrcp.f32 %v2170_v27  ;;  %4911 = vmatprep.subr.bf16.mxu0 %v7510_v58  ;;  %4943 = vmatprep.subr.bf16.mxu1 %v7512_v32  ;;  %8811 = vst [vmem:[#allocation15_spill] sm:$0xff] %v7584_v7  ;;  %8812 = vst [vmem:[#allocation16_spill] sm:$0xff] %v7586_v19  ;;  %v2477_v27 = vld [vmem:[%s8707_s4 + $0xd0] sm:$0xff]  ;;  %v2487_v22 = vld [vmem:[%s8707_s4 + $0x120] sm:$0xff] }
 0x433   :  { %5479 = vrcp.f32 %v2176_v63  ;;  %2579 = vmatprep.mubr.f32.mxu0 %v8768_v24  ;;  %2650 = vmatprep.mubr.f32.mxu1 %v8768_v24  ;;  %8814 = vst [vmem:[#allocation18_spill] sm:$0xff] %v7598_v11  ;;  %v2481_v63 = vld [vmem:[%s8707_s4 + $0xf0] sm:$0xff]  ;;  %v2491_v32 = vld [vmem:[%s8707_s4 + $0x140] sm:$0xff] }
 0x434   :  { %v7622_v29 = vpack.c.bf16 %v2481_v63, %v2477_v27  ;;  %v2492_v27 = vld [vmem:[%s8707_s4 + $0x148] sm:$0xff]  ;;  %v2495_v58 = vld [vmem:[%s8707_s4 + $0x160] sm:$0xff] }
 0x435   :  { %4913 = vmatpush1.bf16.msra.mxu0 %v7546_v57  ;;  %4945 = vmatpush1.bf16.msra.mxu1 %v7548_v41  ;;  %v7656_v41 = vpack.c.bf16 %v2487_v22, %v2483_v37  ;;  %v7658_v57 = vpack.c.bf16 %v2489_v9, %v2485_v14  ;;  %v2493_v22 = vld [vmem:[%s8707_s4 + $0x150] sm:$0xff]  ;;  %v2504_v9 = vld [vmem:[%s8707_s4 + $0x1a8] sm:$0xff] }
 0x436   :  { %4915 = vmatprep.subr.bf16.mxu0 %v7558_v46  ;;  %4947 = vmatprep.subr.bf16.mxu1 %v7560_v43  ;;  %v5474_v43 = vpop.eup %5473  ;;  %v2497_v14 = vld [vmem:[%s8707_s4 + $0x170] sm:$0xff] }
 0x437   :  { %v5476_v63 = vpop.eup %5475  ;;  %v2183_v46 = vadd.f32 1.0, %v5474_v43 }
 0x439   :  { %4917 = vmatpush1.bf16.msra.mxu0 %v7584_v7  ;;  %4949 = vmatpush1.bf16.msra.mxu1 %v7586_v19  ;;  %v7632_v7 = vpack.c.bf16 %v2488_v48, %v2484_v0  ;;  %v7634_v19 = vpack.c.bf16 %v2490_v16, %v2486_v45  ;;  %v2496_v0 = vld [vmem:[%s8707_s4 + $0x168] sm:$0xff]  ;;  %v2494_v48 = vld [vmem:[%s8707_s4 + $0x158] sm:$0xff]  ;;  %5481 = vrcp.f32 %v2183_v46  ;;  %v2505_v46 = vld [vmem:[%s8707_s4 + $0x1b0] sm:$0xff] }
 0x43a   :  { %4919 = vmatprep.subr.bf16.mxu0 %v7596_v21  ;;  %4951 = vmatprep.subr.bf16.mxu1 %v7598_v11  ;;  %v2498_v45 = vld [vmem:[%s8707_s4 + $0x178] sm:$0xff]  ;;  %v7669_v43 = vpack.c.bf16 %v2496_v0, %v2492_v27 }
 0x43b   :  { %8815 = vst [vmem:[#allocation19_spill] sm:$0xff] %v7634_v19  ;;  %v7671_v37 = vpack.c.bf16 %v2498_v45, %v2494_v48  ;;  %v2502_v27 = vld [vmem:[%s8707_s4 + $0x198] sm:$0xff]  ;;  %v7693_v48 = vpack.c.bf16 %v2495_v58, %v2491_v32  ;;  %v7695_v45 = vpack.c.bf16 %v2497_v14, %v2493_v22  ;;  %v2501_v32 = vld [vmem:[%s8707_s4 + $0x190] sm:$0xff]  ;;  %v2512_v14 = vld [vmem:[%s8707_s4 + $0x1e8] sm:$0xff] }
 0x43c   :  { %v5478_v16 = vpop.eup %5477 }
 0x43d   :  { %v5480_v11 = vpop.eup %5479  ;;  %v2187_v21 = vmul.f32 %v5478_v16, %v5476_v63  ;;  %4921 = vmatpush1.bf16.msra.mxu0 %v7620_v33  ;;  %4953 = vmatpush1.bf16.msra.mxu1 %v7622_v29  ;;  %8816 = vst [vmem:[#allocation20_spill] sm:$0xff] %v7671_v37  ;;  %v2506_v63 = vld [vmem:[%s8707_s4 + $0x1b8] sm:$0xff]  ;;  %8817 = vst [vmem:[#allocation21_spill] sm:$0xff] %v7695_v45  ;;  %v2499_v16 = vld [vmem:[%s8707_s4 + $0x180] sm:$0xff] }
 0x43e   :  { %v2186_v53 = vmul.f32 %v5480_v11, %v7113_v15  ;;  %4923 = vmatprep.subr.bf16.mxu0 %v7632_v7  ;;  %4955 = vmatprep.subr.bf16.mxu1 %v7634_v19  ;;  %v2500_v11 = vld [vmem:[%s8707_s4 + $0x188] sm:$0xff]  ;;  %v2503_v19 = vld [vmem:[%s8707_s4 + $0x1a0] sm:$0xff]  ;;  %v7708_v58 = vpack.c.bf16 %v2506_v63, %v2502_v27 }
 0x43f   :  { %v7735_v27 = vpack.c.bf16 %v2503_v19, %v2499_v16  ;;  %v2507_v63 = vld [vmem:[%s8707_s4 + $0x1c0] sm:$0xff]  ;;  %v2509_v19 = vld [vmem:[%s8707_s4 + $0x1d0] sm:$0xff] }
 0x440   :  { %v2188_v0 = vadd.f32 %v2187_v21, %v2186_v53  ;;  %v7706_v53 = vpack.c.bf16 %v2504_v9, %v2500_v11  ;;  %v2508_v21 = vld [vmem:[%s8707_s4 + $0x1c8] sm:$0xff]  ;;  %v2510_v11 = vld [vmem:[%s8707_s4 + $0x1d8] sm:$0xff]  ;;  %v2513_v16 = vld [vmem:[%s8707_s4 + $0x1f0] sm:$0xff] }
 0x441   :  { %4925 = vmatpush1.bf16.msra.mxu0 %v7656_v41  ;;  %4957 = vmatpush1.bf16.msra.mxu1 %v7658_v57  ;;  %v2514_v9 = vld [vmem:[%s8707_s4 + $0x1f8] sm:$0xff] }
 0x442   :  { %4927 = vmatprep.subr.bf16.mxu0 %v7669_v43  ;;  %4959 = vmatprep.subr.bf16.mxu1 %v7671_v37  ;;  %5483 = vtanh.f32 %v2188_v0  ;;  %v7722_v22 = vsel %vm4282_vm7, %v2188_v0, %v7113_v15  ;;  %v7737_v15 = vpack.c.bf16 %v2505_v46, %v2501_v32  ;;  %v7744_v0 = vpack.c.bf16 %v2512_v14, %v2508_v21 }
 0x443   :  { %v7746_v37 = vpack.c.bf16 %v2514_v9, %v2510_v11  ;;  %v7761_v46 = vpack.c.bf16 %v2513_v16, %v2509_v19  ;;  %v5482_v21 = vpop.eup %5481 }
 0x445   :  { %4929 = vmatpush1.bf16.msra.mxu0 %v7693_v48  ;;  %4961 = vmatpush1.bf16.msra.mxu1 %v7695_v45  ;;  %v2511_v45 = vld [vmem:[%s8707_s4 + $0x1e0] sm:$0xff] }
 0x446   :  { %4931 = vmatprep.subr.bf16.mxu0 %v7706_v53  ;;  %4963 = vmatprep.subr.bf16.mxu1 %v7708_v58  ;;  %v7759_v32 = vpack.c.bf16 %v2511_v45, %v2507_v63 }
 0x449   :  { %4933 = vmatpush1.bf16.msra.mxu0 %v7735_v27  ;;  %4965 = vmatpush1.bf16.msra.mxu1 %v7737_v15 }
 0x44a   :  { %4935 = vmatprep.subr.bf16.mxu0 %v7744_v0  ;;  %4967 = vmatprep.subr.bf16.mxu1 %v7746_v37 }
 0x44c   :  { %v5484_v14 = vpop.eup %5483 }
 0x44d   :  { %4937 = vmatpush1.bf16.msra.mxu0 %v7759_v32  ;;  %4969 = vmatpush1.bf16.msra.mxu1 %v7761_v46  ;;  %v2190_v11 = vmul.f32 %v5484_v14, %v5482_v21  ;;  %v4231_v21 = vld [vmem:[%s8705_s2 + $0xf8] sm:$0xff] }
 0x44e   :  { %4971 = vmatprep.subr.bf16.mxu0 %v7148_v38  ;;  %5003 = vmatprep.subr.bf16.mxu1 %v7159_v44  ;;  %v62_v38 = vld [vmem:[%s8704_s1 + $0x108] sm:$0xff] }
 0x44f   :  { %v7772_v45 = vsel %vm4282_vm7, %v2190_v11, %v7128_v42  ;;  %v2193_v9 = vsel %vm4282_vm7, %v2190_v11, 0.0  ;;  %v60_v42 = vld [vmem:[%s8704_s1 + $0x100] sm:$0xff]  ;;  %v4230_v11 = vld [vmem:[%s8705_s2 + $0xf0] sm:$0xff] }
 0x450   :  { %4286 = vst [vmem:[%s8709_s6 + $0x20] sm:$0xff] %v2193_v9  ;;  %2580 = vmatmul.mubr.f32.vlgmr.msra.gmra.mrb[18].mxu0 %v7772_v45  ;;  %2651 = vmatmul.mubr.f32.vlgmr.msra.gmra.mrb[18].mxu1 %v7772_v45 }
 0x451   :  { %4973 = vmatpush1.bf16.msra.mxu0 %v7161_v25  ;;  %5005 = vmatpush1.bf16.msra.mxu1 %v7170_v62 }
 0x452   :  { %4975 = vmatprep.subr.bf16.mxu0 %v7184_v30  ;;  %5007 = vmatprep.subr.bf16.mxu1 %v7195_v52 }
 0x453   :  { %2826 = vmatprep.mubr.f32.mxu0 %v8768_v24  ;;  %2897 = vmatprep.mubr.f32.mxu1 %v8768_v24 }
 0x455   :  { %4977 = vmatpush1.bf16.msra.mxu0 %v7197_v61  ;;  %5009 = vmatpush1.bf16.msra.mxu1 %v7206_v13 }
 0x456   :  { %4979 = vmatprep.subr.bf16.mxu0 %v7220_v23  ;;  %5011 = vmatprep.subr.bf16.mxu1 %v7231_v54  ;;  %v66_v54 = vld [vmem:[%s8704_s1 + $0x118] sm:$0xff] }
 0x459   :  { %4981 = vmatpush1.bf16.msra.mxu0 %v7233_v60  ;;  %5013 = vmatpush1.bf16.msra.mxu1 %v7242_v3  ;;  %v64_v3 = vld [vmem:[%s8704_s1 + $0x110] sm:$0xff] }
 0x45a   :  { %4983 = vmatprep.subr.bf16.mxu0 %v7256_v5  ;;  %5015 = vmatprep.subr.bf16.mxu1 %v7267_v2 }
 0x45d   :  { %4985 = vmatpush1.bf16.msra.mxu0 %v7269_v6  ;;  %5017 = vmatpush1.bf16.msra.mxu1 %v7278_v59 }
 0x45e   :  { %4987 = vmatprep.subr.bf16.mxu0 %v7292_v4  ;;  %5019 = vmatprep.subr.bf16.mxu1 %v7303_v20 }
 0x461   :  { %4989 = vmatpush1.bf16.msra.mxu0 %v7305_v50  ;;  %5021 = vmatpush1.bf16.msra.mxu1 %v7314_v1 }
 0x462   :  { %4991 = vmatprep.subr.bf16.mxu0 %v7331_v51  ;;  %5023 = vmatprep.subr.bf16.mxu1 %v7333_v26 }
 0x465   :  { %4993 = vmatpush1.bf16.msra.mxu0 %v7344_v47  ;;  %5025 = vmatpush1.bf16.msra.mxu1 %v7351_v55 }
 0x466   :  { %4995 = vmatprep.subr.bf16.mxu0 %v7363_v49  ;;  %5027 = vmatprep.subr.bf16.mxu1 %v7375_v36  ;;  %v4228_v36 = vld [vmem:[%s8705_s2 + $0xe0] sm:$0xff] }
 0x469   :  { %4997 = vmatpush1.bf16.msra.mxu0 %v7377_v39  ;;  %5029 = vmatpush1.bf16.msra.mxu1 %v7386_v34  ;;  %v4229_v39 = vld [vmem:[%s8705_s2 + $0xe8] sm:$0xff] }
 0x46a   :  { %4999 = vmatprep.subr.bf16.mxu0 %v7399_v35  ;;  %5031 = vmatprep.subr.bf16.mxu1 %v7411_v28 }
 0x46d   :  { %5001 = vmatpush1.bf16.msra.mxu0 %v7413_v12  ;;  %5033 = vmatpush1.bf16.msra.mxu1 %v7422_v31 }
 0x46e   :  { %5035 = vmatprep.subr.bf16.mxu0 %v7435_v17  ;;  %5067 = vmatprep.subr.bf16.mxu1 %v7441_v10 }
 0x503   :  { %v2334_v44 = vpop.f32.mrb[16].mxu0  ;;  %v2405_v25 = vpop.f32.mrb[16].mxu1 }
 0x504   :  { %v2410_v62 = vadd.f32 %v2334_v44, %v60_v42  ;;  %v2336_v30 = vpop.f32.mrb[17].mxu0  ;;  %v2407_v52 = vpop.f32.mrb[17].mxu1  ;;  %v2412_v2 = vadd.f32 %v2405_v25, %v64_v3  ;;  %v8822_v3 = vld [vmem:[#allocation10_spill] sm:$0xff] }
 0x505   :  { %v2411_v61 = vadd.f32 %v2336_v30, %v62_v38  ;;  %v2413_v60 = vadd.f32 %v2407_v52, %v66_v54  ;;  %v8820_v54 = vld [vmem:[#allocation12_spill] sm:$0xff] }
 0x506   :  { %v4288_v13 = vmul.f32 -1.442695, %v2410_v62 }
 0x507   :  { %v4289_v23 = vmul.f32 -1.442695, %v2411_v61  ;;  %v4290_v5 = vmul.f32 -1.442695, %v2413_v60  ;;  %v8821_v60 = vld [vmem:[#allocation9_spill] sm:$0xff] }
 0x508   :  { %5485 = vpow2.f32 %v4288_v13 }
 0x509   :  { %5487 = vpow2.f32 %v4289_v23  ;;  %v8819_v23 = vld [vmem:[#allocation8_spill] sm:$0xff] }
 0x50a   :  { %5489 = vpow2.f32 %v4290_v5  ;;  %v8823_v5 = vld [vmem:[#allocation13_spill] sm:$0xff] }
 0x50b   :  { %5491 = vtanh.f32 %v2412_v2  ;;  %v8824_v2 = vld [vmem:[#allocation14_spill] sm:$0xff] }
 0x512   :  { %v5486_v6 = vpop.eup %5485 }
 0x513   :  { %v5488_v59 = vpop.eup %5487  ;;  %v2417_v4 = vadd.f32 1.0, %v5486_v6  ;;  %v8826_v6 = vld [vmem:[#allocation16_spill] sm:$0xff] }
 0x514   :  { %v2423_v20 = vadd.f32 1.0, %v5488_v59  ;;  %v5490_v50 = vpop.eup %5489 }
 0x515   :  { %5493 = vrcp.f32 %v2417_v4  ;;  %v5492_v1 = vpop.eup %5491  ;;  %v2430_v55 = vadd.f32 1.0, %v5490_v50  ;;  %v8827_v4 = vld [vmem:[#allocation17_spill] sm:$0xff] }
 0x516   :  { %5495 = vrcp.f32 %v2423_v20  ;;  %v8828_v20 = vld [vmem:[#allocation18_spill] sm:$0xff] }
 0x517   :  { %5497 = vrcp.f32 %v2430_v55 }
 0x51f   :  { %v5494_v51 = vpop.eup %5493 }
 0x520   :  { %v5496_v26 = vpop.eup %5495  ;;  %v2434_v47 = vmul.f32 %v5494_v51, %v5492_v1 }
 0x521   :  { %v2433_v49 = vmul.f32 %v5496_v26, %v7468_v18  ;;  %v5498_v9 = vpop.eup %5497 }
 0x523   :  { %v2435_v34 = vadd.f32 %v2434_v47, %v2433_v49  ;;  %v2581_v35 = vpop.f32.mrb[18].mxu0  ;;  %v2652_v28 = vpop.f32.mrb[18].mxu1  ;;  %v8829_v49 = vld [vmem:[#allocation19_spill] sm:$0xff] }
 0x524   :  { %v2657_v12 = vadd.f32 %v4228_v36, %v2581_v35  ;;  %v2583_v31 = vpop.f32.mrb[19].mxu0  ;;  %v2654_v17 = vpop.f32.mrb[19].mxu1  ;;  %v2659_v44 = vadd.f32 %v4230_v11, %v2652_v28  ;;  %v3201_v28 = vld [vmem:[%s8706_s3 + $0x48] sm:$0xff]  ;;  %v3202_v11 = vld [vmem:[%s8706_s3 + $0x50] sm:$0xff] }
 0x525   :  { %v2658_v10 = vadd.f32 %v4229_v39, %v2583_v31  ;;  %5499 = vtanh.f32 %v2435_v34  ;;  %v7837_v63 = vsel %vm4282_vm7, %v2435_v34, %v7468_v18  ;;  %v2660_v14 = vadd.f32 %v4231_v21, %v2654_v17  ;;  %v8830_v39 = vld [vmem:[#allocation20_spill] sm:$0xff]  ;;  %v3198_v34 = vld [vmem:[%s8706_s3 + $0x30] sm:$0xff]  ;;  %v3203_v31 = vld [vmem:[%s8706_s3 + $0x58] sm:$0xff] }
 0x526   :  { %v4293_v19 = vmul.f32 -1.442695, %v2657_v12  ;;  %v3205_v12 = vld [vmem:[%s8706_s3 + $0x68] sm:$0xff] }
 0x527   :  { %v4294_v16 = vmul.f32 -1.442695, %v2658_v10  ;;  %v4295_v38 = vmul.f32 -1.442695, %v2660_v14  ;;  %v7954_v17 = vpack.c.bf16 %v3205_v12, %v3201_v28  ;;  %v3207_v10 = vld [vmem:[%s8706_s3 + $0x78] sm:$0xff]  ;;  %v3232_v28 = vld [vmem:[%s8706_s3 + $0x140] sm:$0xff] }
 0x528   :  { %5501 = vpow2.f32 %v4293_v19  ;;  %v3200_v19 = vld [vmem:[%s8706_s3 + $0x40] sm:$0xff]  ;;  %v7965_v21 = vpack.c.bf16 %v3207_v10, %v3203_v31  ;;  %v3234_v31 = vld [vmem:[%s8706_s3 + $0x150] sm:$0xff] }
 0x529   :  { %5503 = vpow2.f32 %v4294_v16  ;;  %v3204_v16 = vld [vmem:[%s8706_s3 + $0x60] sm:$0xff] }
 0x52a   :  { %5505 = vpow2.f32 %v4295_v38  ;;  %v7967_v14 = vpack.c.bf16 %v3204_v16, %v3200_v19  ;;  %v3209_v38 = vld [vmem:[%s8706_s3 + $0x88] sm:$0xff]  ;;  %v3236_v12 = vld [vmem:[%s8706_s3 + $0x160] sm:$0xff]  ;;  %v3238_v19 = vld [vmem:[%s8706_s3 + $0x170] sm:$0xff] }
 0x52b   :  { %5507 = vtanh.f32 %v2659_v44  ;;  %v3213_v44 = vld [vmem:[%s8706_s3 + $0xa8] sm:$0xff]  ;;  %v8114_v10 = vpack.c.bf16 %v3236_v12, %v3232_v28  ;;  %v8121_v16 = vpack.c.bf16 %v3238_v19, %v3234_v31  ;;  %v68_v28 = vld [vmem:[%s8704_s1 + $0x140] sm:$0xff] }
 0x52c   :  { %v70_v12 = vld [vmem:[%s8704_s1 + $0x148] sm:$0xff] }
 0x52f   :  { %v5500_v42 = vpop.eup %5499 }
 0x530   :  { %v2437_v25 = vmul.f32 %v5500_v42, %v5498_v9  ;;  %v3206_v9 = vld [vmem:[%s8706_s3 + $0x70] sm:$0xff] }
 0x531   :  { %v7976_v42 = vpack.c.bf16 %v3206_v9, %v3202_v11  ;;  %v3241_v11 = vld [vmem:[%s8706_s3 + $0x188] sm:$0xff] }
 0x532   :  { %v5502_v18 = vpop.eup %5501  ;;  %v7848_v62 = vsel %vm4282_vm7, %v2437_v25, %v7526_v56  ;;  %v2440_v30 = vsel %vm4282_vm7, %v2437_v25, 0.0  ;;  %v8818_v56 = vld [vmem:[#allocation11_spill] sm:$0xff]  ;;  %v3245_v9 = vld [vmem:[%s8706_s3 + $0x1a8] sm:$0xff] }
 0x533   :  { %v5504_v52 = vpop.eup %5503  ;;  %v2664_v61 = vadd.f32 1.0, %v5502_v18  ;;  %4291 = vst [vmem:[%s8708_s5 + $0x20] sm:$0xff] %v2440_v30  ;;  %2827 = vmatmul.mubr.f32.vlgmr.msra.gmra.mrb[20].mxu0 %v7848_v62  ;;  %2898 = vmatmul.mubr.f32.vlgmr.msra.gmra.mrb[20].mxu1 %v7848_v62  ;;  %v3211_v25 = vld [vmem:[%s8706_s3 + $0x98] sm:$0xff]  ;;  %v7990_v18 = vpack.c.bf16 %v3213_v44, %v3209_v38  ;;  %v8133_v44 = vpack.c.bf16 %v3245_v9, %v3241_v11 }
 0x534   :  { %v2670_v13 = vadd.f32 1.0, %v5504_v52  ;;  %5037 = vmatpush1.bf16.msra.mxu0 %v7500_v40  ;;  %5069 = vmatpush1.bf16.msra.mxu1 %v8818_v56  ;;  %v8825_v40 = vld [vmem:[#allocation15_spill] sm:$0xff]  ;;  %v5506_v59 = vpop.eup %5505  ;;  %v3208_v52 = vld [vmem:[%s8706_s3 + $0x80] sm:$0xff] }
 0x535   :  { %5509 = vrcp.f32 %v2664_v61  ;;  %5039 = vmatprep.subr.bf16.mxu0 %v8819_v23  ;;  %5071 = vmatprep.subr.bf16.mxu1 %v8820_v54  ;;  %v5508_v50 = vpop.eup %5507  ;;  %v2677_v47 = vadd.f32 1.0, %v5506_v59  ;;  %v3215_v30 = vld [vmem:[%s8706_s3 + $0xb8] sm:$0xff]  ;;  %v3212_v61 = vld [vmem:[%s8706_s3 + $0xa0] sm:$0xff]  ;;  %v3210_v23 = vld [vmem:[%s8706_s3 + $0x90] sm:$0xff] }
 0x536   :  { %5511 = vrcp.f32 %v2670_v13  ;;  %3073 = vmatprep.mubr.f32.mxu0 %v8768_v24  ;;  %3144 = vmatprep.mubr.f32.mxu1 %v8768_v24  ;;  %v8001_v13 = vpack.c.bf16 %v3215_v30, %v3211_v25  ;;  %v8003_v56 = vpack.c.bf16 %v3212_v61, %v3208_v52  ;;  %v3214_v54 = vld [vmem:[%s8706_s3 + $0xb0] sm:$0xff]  ;;  %v3216_v59 = vld [vmem:[%s8706_s3 + $0xc0] sm:$0xff]  ;;  %v3243_v38 = vld [vmem:[%s8706_s3 + $0x198] sm:$0xff] }
 0x537   :  { %5513 = vrcp.f32 %v2677_v47  ;;  %v3225_v47 = vld [vmem:[%s8706_s3 + $0x108] sm:$0xff]  ;;  %v3247_v25 = vld [vmem:[%s8706_s3 + $0x1b8] sm:$0xff]  ;;  %v3240_v30 = vld [vmem:[%s8706_s3 + $0x180] sm:$0xff] }
 0x538   :  { %5041 = vmatpush1.bf16.msra.mxu0 %v8821_v60  ;;  %5073 = vmatpush1.bf16.msra.mxu1 %v8822_v3  ;;  %v8012_v60 = vpack.c.bf16 %v3214_v54, %v3210_v23  ;;  %v3217_v3 = vld [vmem:[%s8706_s3 + $0xc8] sm:$0xff]  ;;  %v3244_v52 = vld [vmem:[%s8706_s3 + $0x1a0] sm:$0xff]  ;;  %v8145_v61 = vpack.c.bf16 %v3247_v25, %v3243_v38  ;;  %v3242_v54 = vld [vmem:[%s8706_s3 + $0x190] sm:$0xff] }
 0x539   :  { %5043 = vmatprep.subr.bf16.mxu0 %v8823_v5  ;;  %5075 = vmatprep.subr.bf16.mxu1 %v8824_v2  ;;  %v3221_v5 = vld [vmem:[%s8706_s3 + $0xe8] sm:$0xff]  ;;  %v3219_v2 = vld [vmem:[%s8706_s3 + $0xd8] sm:$0xff]  ;;  %v8147_v23 = vpack.c.bf16 %v3244_v52, %v3240_v30 }
 0x53c   :  { %5045 = vmatpush1.bf16.msra.mxu0 %v8825_v40  ;;  %5077 = vmatpush1.bf16.msra.mxu1 %v8826_v6  ;;  %v8026_v40 = vpack.c.bf16 %v3221_v5, %v3217_v3  ;;  %v3223_v6 = vld [vmem:[%s8706_s3 + $0xf8] sm:$0xff]  ;;  %v3246_v3 = vld [vmem:[%s8706_s3 + $0x1b0] sm:$0xff] }
 0x53d   :  { %5047 = vmatprep.subr.bf16.mxu0 %v8827_v4  ;;  %5079 = vmatprep.subr.bf16.mxu1 %v8828_v20  ;;  %v3220_v4 = vld [vmem:[%s8706_s3 + $0xe0] sm:$0xff]  ;;  %v8037_v20 = vpack.c.bf16 %v3223_v6, %v3219_v2  ;;  %v8156_v5 = vpack.c.bf16 %v3246_v3, %v3242_v54  ;;  %v3249_v2 = vld [vmem:[%s8706_s3 + $0x1c8] sm:$0xff]  ;;  %v74_v54 = vld [vmem:[%s8704_s1 + $0x158] sm:$0xff] }
 0x53e   :  { %v3253_v6 = vld [vmem:[%s8706_s3 + $0x1e8] sm:$0xff] }
 0x53f   :  { %v5510_v1 = vpop.eup %5509 }
 0x540   :  { %v5512_v51 = vpop.eup %5511  ;;  %v2681_v26 = vmul.f32 %v5510_v1, %v5508_v50  ;;  %5049 = vmatpush1.bf16.msra.mxu0 %v7620_v33  ;;  %5081 = vmatpush1.bf16.msra.mxu1 %v7622_v29  ;;  %v8039_v50 = vpack.c.bf16 %v3220_v4, %v3216_v59  ;;  %v3218_v1 = vld [vmem:[%s8706_s3 + $0xd0] sm:$0xff]  ;;  %v3251_v59 = vld [vmem:[%s8706_s3 + $0x1d8] sm:$0xff]  ;;  %v8169_v4 = vpack.c.bf16 %v3253_v6, %v3249_v2 }
 0x541   :  { %v2680_v55 = vmul.f32 %v5512_v51, %v7722_v22  ;;  %5051 = vmatprep.subr.bf16.mxu0 %v7632_v7  ;;  %5083 = vmatprep.subr.bf16.mxu1 %v8829_v49  ;;  %v8831_v7 = vld [vmem:[#allocation21_spill] sm:$0xff]  ;;  %v3222_v51 = vld [vmem:[%s8706_s3 + $0xf0] sm:$0xff]  ;;  %v3227_v49 = vld [vmem:[%s8706_s3 + $0x118] sm:$0xff] }
 0x542   :  { %v72_v2 = vld [vmem:[%s8704_s1 + $0x150] sm:$0xff] }
 0x543   :  { %v2682_v36 = vadd.f32 %v2681_v26, %v2680_v55  ;;  %v8048_v26 = vpack.c.bf16 %v3222_v51, %v3218_v1  ;;  %v3229_v55 = vld [vmem:[%s8706_s3 + $0x128] sm:$0xff]  ;;  %v3255_v1 = vld [vmem:[%s8706_s3 + $0x1f8] sm:$0xff]  ;;  %v3248_v51 = vld [vmem:[%s8706_s3 + $0x1c0] sm:$0xff] }
 0x544   :  { %5053 = vmatpush1.bf16.msra.mxu0 %v7656_v41  ;;  %5085 = vmatpush1.bf16.msra.mxu1 %v7658_v57  ;;  %v5514_v57 = vpop.eup %5513 }
 0x545   :  { %5055 = vmatprep.subr.bf16.mxu0 %v7669_v43  ;;  %5087 = vmatprep.subr.bf16.mxu1 %v8830_v39  ;;  %5515 = vtanh.f32 %v2682_v36  ;;  %v7883_v33 = vsel %vm4277_vm6, %v2682_v36, %v7722_v22  ;;  %v8062_v36 = vpack.c.bf16 %v3229_v55, %v3225_v47  ;;  %v3231_v39 = vld [vmem:[%s8706_s3 + $0x138] sm:$0xff]  ;;  %v3252_v47 = vld [vmem:[%s8706_s3 + $0x1e0] sm:$0xff]  ;;  %v8181_v55 = vpack.c.bf16 %v3255_v1, %v3251_v59 }
 0x548   :  { %5057 = vmatpush1.bf16.msra.mxu0 %v7693_v48  ;;  %5089 = vmatpush1.bf16.msra.mxu1 %v8831_v7  ;;  %v3224_v7 = vld [vmem:[%s8706_s3 + $0x100] sm:$0xff] }
 0x549   :  { %5059 = vmatprep.subr.bf16.mxu0 %v7706_v53  ;;  %5091 = vmatprep.subr.bf16.mxu1 %v7708_v58  ;;  %v3197_v53 = vld [vmem:[%s8706_s3 + $0x28] sm:$0xff]  ;;  %v3195_v58 = vld [vmem:[%s8706_s3 + $0x18] sm:$0xff] }
 0x54c   :  { %5061 = vmatpush1.bf16.msra.mxu0 %v7735_v27  ;;  %5093 = vmatpush1.bf16.msra.mxu1 %v7737_v15  ;;  %v3199_v27 = vld [vmem:[%s8706_s3 + $0x38] sm:$0xff]  ;;  %v3192_v15 = vld [vmem:[%s8706_s3] sm:$0xff] }
 0x54d   :  { %5063 = vmatprep.subr.bf16.mxu0 %v7744_v0  ;;  %5095 = vmatprep.subr.bf16.mxu1 %v7746_v37  ;;  %v3193_v37 = vld [vmem:[%s8706_s3 + $0x8] sm:$0xff]  ;;  %v3196_v0 = vld [vmem:[%s8706_s3 + $0x20] sm:$0xff] }
 0x54e   :  { %v7918_v22 = vpack.c.bf16 %v3197_v53, %v3193_v37  ;;  %v3230_v37 = vld [vmem:[%s8706_s3 + $0x130] sm:$0xff] }
 0x54f   :  { %v5516_v41 = vpop.eup %5515 }
 0x550   :  { %5065 = vmatpush1.bf16.msra.mxu0 %v7759_v32  ;;  %5097 = vmatpush1.bf16.msra.mxu1 %v7761_v46  ;;  %v2684_v29 = vmul.f32 %v5516_v41, %v5514_v57  ;;  %v7929_v32 = vpack.c.bf16 %v3199_v27, %v3195_v58  ;;  %v7931_v46 = vpack.c.bf16 %v3196_v0, %v3192_v15  ;;  %v3228_v57 = vld [vmem:[%s8706_s3 + $0x120] sm:$0xff]  ;;  %v3233_v58 = vld [vmem:[%s8706_s3 + $0x148] sm:$0xff]  ;;  %v3235_v15 = vld [vmem:[%s8706_s3 + $0x158] sm:$0xff] }
 0x551   :  { %5099 = vmatprep.subr.bf16.mxu0 %v7918_v22  ;;  %v8073_v41 = vpack.c.bf16 %v3231_v39, %v3227_v49  ;;  %v3237_v27 = vld [vmem:[%s8706_s3 + $0x168] sm:$0xff]  ;;  %v3239_v0 = vld [vmem:[%s8706_s3 + $0x178] sm:$0xff]  ;;  %v8183_v49 = vpack.c.bf16 %v3252_v47, %v3248_v51  ;;  %v3250_v39 = vld [vmem:[%s8706_s3 + $0x1d0] sm:$0xff] }
 0x552   :  { %v7898_v43 = vsel %vm4277_vm6, %v2684_v29, %v7772_v45  ;;  %v2687_v48 = vsel %vm4277_vm6, %v2684_v29, 0.0  ;;  %v3194_v45 = vld [vmem:[%s8706_s3 + $0x10] sm:$0xff]  ;;  %5131 = vmatprep.subr.bf16.mxu1 %v7929_v32  ;;  %v8075_v29 = vpack.c.bf16 %v3228_v57, %v3224_v7 }
 0x553   :  { %4296 = vst [vmem:[%s8709_s6 + $0x18] sm:$0xff] %v2687_v48  ;;  %3074 = vmatmul.mubr.f32.vlgmr.msra.gmra.mrb[22].mxu0 %v7898_v43  ;;  %3145 = vmatmul.mubr.f32.vlgmr.msra.gmra.mrb[22].mxu1 %v7898_v43  ;;  %v7940_v35 = vpack.c.bf16 %v3198_v34, %v3194_v45  ;;  %v3226_v48 = vld [vmem:[%s8706_s3 + $0x110] sm:$0xff]  ;;  %v8101_v45 = vpack.c.bf16 %v3237_v27, %v3233_v58  ;;  %v3442_v58 = vld [vmem:[%s8707_s4 + $0x18] sm:$0xff] }
 0x554   :  { %3320 = vmatprep.mubr.f32.mxu0 %v8768_v24  ;;  %3391 = vmatprep.mubr.f32.mxu1 %v8768_v24  ;;  %v8084_v53 = vpack.c.bf16 %v3230_v37, %v3226_v48  ;;  %v8103_v34 = vpack.c.bf16 %v3239_v0, %v3235_v15  ;;  %v3254_v7 = vld [vmem:[%s8706_s3 + $0x1f0] sm:$0xff]  ;;  %v3440_v48 = vld [vmem:[%s8707_s4 + $0x8] sm:$0xff]  ;;  %v3446_v15 = vld [vmem:[%s8707_s4 + $0x38] sm:$0xff] }
 0x555   :  { %5101 = vmatpush1.bf16.msra.mxu0 %v7931_v46  ;;  %5133 = vmatpush1.bf16.msra.mxu1 %v7940_v35  ;;  %v8192_v57 = vpack.c.bf16 %v3254_v7, %v3250_v39  ;;  %v3444_v37 = vld [vmem:[%s8707_s4 + $0x28] sm:$0xff]  ;;  %v8211_v0 = vpack.c.bf16 %v3446_v15, %v3442_v58 }
 0x556   :  { %5103 = vmatprep.subr.bf16.mxu0 %v7954_v17  ;;  %5135 = vmatprep.subr.bf16.mxu1 %v7965_v21  ;;  %v8205_v27 = vpack.c.bf16 %v3444_v37, %v3440_v48 }
 0x559   :  { %5105 = vmatpush1.bf16.msra.mxu0 %v7967_v14  ;;  %5137 = vmatpush1.bf16.msra.mxu1 %v7976_v42 }
 0x55a   :  { %5107 = vmatprep.subr.bf16.mxu0 %v7990_v18  ;;  %5139 = vmatprep.subr.bf16.mxu1 %v8001_v13 }
 0x55d   :  { %5109 = vmatpush1.bf16.msra.mxu0 %v8003_v56  ;;  %5141 = vmatpush1.bf16.msra.mxu1 %v8012_v60 }
 0x55e   :  { %5111 = vmatprep.subr.bf16.mxu0 %v8026_v40  ;;  %5143 = vmatprep.subr.bf16.mxu1 %v8037_v20 }
 0x561   :  { %5113 = vmatpush1.bf16.msra.mxu0 %v8039_v50  ;;  %5145 = vmatpush1.bf16.msra.mxu1 %v8048_v26 }
 0x562   :  { %5115 = vmatprep.subr.bf16.mxu0 %v8062_v36  ;;  %5147 = vmatprep.subr.bf16.mxu1 %v8073_v41 }
 0x565   :  { %5117 = vmatpush1.bf16.msra.mxu0 %v8075_v29  ;;  %5149 = vmatpush1.bf16.msra.mxu1 %v8084_v53 }
 0x566   :  { %5119 = vmatprep.subr.bf16.mxu0 %v8101_v45  ;;  %5151 = vmatprep.subr.bf16.mxu1 %v8103_v34 }
 0x569   :  { %5121 = vmatpush1.bf16.msra.mxu0 %v8114_v10  ;;  %5153 = vmatpush1.bf16.msra.mxu1 %v8121_v16 }
 0x56a   :  { %5123 = vmatprep.subr.bf16.mxu0 %v8133_v44  ;;  %5155 = vmatprep.subr.bf16.mxu1 %v8145_v61 }
 0x56d   :  { %5125 = vmatpush1.bf16.msra.mxu0 %v8147_v23  ;;  %5157 = vmatpush1.bf16.msra.mxu1 %v8156_v5 }
 0x56e   :  { %5127 = vmatprep.subr.bf16.mxu0 %v8169_v4  ;;  %5159 = vmatprep.subr.bf16.mxu1 %v8181_v55 }
 0x571   :  { %5129 = vmatpush1.bf16.msra.mxu0 %v8183_v49  ;;  %5161 = vmatpush1.bf16.msra.mxu1 %v8192_v57 }
 0x572   :  { %5163 = vmatprep.subr.bf16.mxu0 %v8205_v27  ;;  %5195 = vmatprep.subr.bf16.mxu1 %v8211_v0 }
 0x606   :  { %v2828_v31 = vpop.f32.mrb[20].mxu0  ;;  %v2899_v19 = vpop.f32.mrb[20].mxu1 }
 0x607   :  { %v2904_v11 = vadd.f32 %v2828_v31, %v68_v28  ;;  %v2830_v9 = vpop.f32.mrb[21].mxu0  ;;  %v2901_v38 = vpop.f32.mrb[21].mxu1  ;;  %v2906_v59 = vadd.f32 %v2899_v19, %v72_v2  ;;  %v4224_v31 = vld [vmem:[%s8705_s2 + $0xa0] sm:$0xff]  ;;  %v4225_v19 = vld [vmem:[%s8705_s2 + $0xa8] sm:$0xff] }
 0x608   :  { %v2905_v25 = vadd.f32 %v2830_v9, %v70_v12  ;;  %v2907_v3 = vadd.f32 %v2901_v38, %v74_v54 }
 0x609   :  { %v4298_v30 = vmul.f32 -1.442695, %v2904_v11 }
 0x60a   :  { %v4299_v52 = vmul.f32 -1.442695, %v2905_v25  ;;  %v4300_v6 = vmul.f32 -1.442695, %v2907_v3 }
 0x60b   :  { %5517 = vpow2.f32 %v4298_v30 }
 0x60c   :  { %5519 = vpow2.f32 %v4299_v52 }
 0x60d   :  { %5521 = vpow2.f32 %v4300_v6 }
 0x60e   :  { %5523 = vtanh.f32 %v2906_v59  ;;  %v4227_v59 = vld [vmem:[%s8705_s2 + $0xb8] sm:$0xff] }
 0x615   :  { %v5518_v1 = vpop.eup %5517 }
 0x616   :  { %v5520_v51 = vpop.eup %5519  ;;  %v2911_v47 = vadd.f32 1.0, %v5518_v1 }
 0x617   :  { %v2917_v39 = vadd.f32 1.0, %v5520_v51  ;;  %v5522_v7 = vpop.eup %5521  ;;  %v4226_v51 = vld [vmem:[%s8705_s2 + $0xb0] sm:$0xff] }
 0x618   :  { %5525 = vrcp.f32 %v2911_v47  ;;  %v5524_v48 = vpop.eup %5523  ;;  %v2924_v28 = vadd.f32 1.0, %v5522_v7  ;;  %v3439_v47 = vld [vmem:[%s8707_s4] sm:$0xff]  ;;  %v3445_v7 = vld [vmem:[%s8707_s4 + $0x30] sm:$0xff] }
 0x619   :  { %5527 = vrcp.f32 %v2917_v39  ;;  %v3441_v39 = vld [vmem:[%s8707_s4 + $0x10] sm:$0xff] }
 0x61a   :  { %5529 = vrcp.f32 %v2924_v28  ;;  %v3454_v28 = vld [vmem:[%s8707_s4 + $0x78] sm:$0xff] }
 0x622   :  { %v5526_v37 = vpop.eup %5525 }
 0x623   :  { %v5528_v58 = vpop.eup %5527  ;;  %v2928_v15 = vmul.f32 %v5526_v37, %v5524_v48  ;;  %v3448_v48 = vld [vmem:[%s8707_s4 + $0x48] sm:$0xff] }
 0x624   :  { %v2927_v12 = vmul.f32 %v5528_v58, %v7837_v63  ;;  %v5530_v37 = vpop.eup %5529  ;;  %v3452_v58 = vld [vmem:[%s8707_s4 + $0x68] sm:$0xff] }
 0x626   :  { %v2929_v11 = vadd.f32 %v2928_v15, %v2927_v12  ;;  %v3075_v9 = vpop.f32.mrb[22].mxu0  ;;  %v3146_v38 = vpop.f32.mrb[22].mxu1  ;;  %v3450_v15 = vld [vmem:[%s8707_s4 + $0x58] sm:$0xff] }
 0x627   :  { %v3151_v25 = vadd.f32 %v4224_v31, %v3075_v9  ;;  %v3077_v30 = vpop.f32.mrb[23].mxu0  ;;  %v3148_v52 = vpop.f32.mrb[23].mxu1 }
 0x628   :  { %v3152_v54 = vadd.f32 %v4225_v19, %v3077_v30  ;;  %5531 = vtanh.f32 %v2929_v11  ;;  %v8237_v3 = vsel %vm4272_vm5, %v2929_v11, %v7837_v63  ;;  %v3154_v1 = vadd.f32 %v4227_v59, %v3148_v52  ;;  %v3443_v63 = vld [vmem:[%s8707_s4 + $0x20] sm:$0xff]  ;;  %v3456_v59 = vld [vmem:[%s8707_s4 + $0x88] sm:$0xff] }
 0x629   :  { %v4303_v2 = vmul.f32 -1.442695, %v3151_v25  ;;  %v3153_v19 = vadd.f32 %v4226_v51, %v3146_v38  ;;  %v8269_v9 = vpack.c.bf16 %v3443_v63, %v3439_v47  ;;  %v8271_v25 = vpack.c.bf16 %v3445_v7, %v3441_v39  ;;  %v3447_v30 = vld [vmem:[%s8707_s4 + $0x40] sm:$0xff]  ;;  %v3449_v38 = vld [vmem:[%s8707_s4 + $0x50] sm:$0xff]  ;;  %v3460_v63 = vld [vmem:[%s8707_s4 + $0xa8] sm:$0xff] }
 0x62a   :  { %v4304_v6 = vmul.f32 -1.442695, %v3152_v54  ;;  %v4305_v31 = vmul.f32 -1.442695, %v3154_v1  ;;  %v3451_v52 = vld [vmem:[%s8707_s4 + $0x60] sm:$0xff]  ;;  %v8279_v54 = vpack.c.bf16 %v3452_v58, %v3448_v48  ;;  %v3458_v39 = vld [vmem:[%s8707_s4 + $0x98] sm:$0xff] }
 0x62b   :  { %5533 = vpow2.f32 %v4303_v2  ;;  %8832 = vst [vmem:[#allocation11_spill] sm:$0xff] %v8271_v25  ;;  %v8281_v2 = vpack.c.bf16 %v3454_v28, %v3450_v15  ;;  %v3462_v7 = vld [vmem:[%s8707_s4 + $0xb8] sm:$0xff]  ;;  %v8315_v58 = vpack.c.bf16 %v3451_v52, %v3447_v30  ;;  %v3455_v28 = vld [vmem:[%s8707_s4 + $0x80] sm:$0xff]  ;;  %v3461_v30 = vld [vmem:[%s8707_s4 + $0xb0] sm:$0xff] }
 0x62c   :  { %5535 = vpow2.f32 %v4304_v6  ;;  %8833 = vst [vmem:[#allocation8_spill] sm:$0xff] %v8279_v54  ;;  %v3453_v6 = vld [vmem:[%s8707_s4 + $0x70] sm:$0xff]  ;;  %v3464_v52 = vld [vmem:[%s8707_s4 + $0xc8] sm:$0xff] }
 0x62d   :  { %8834 = vst [vmem:[#allocation12_spill] sm:$0xff] %v8281_v2  ;;  %5537 = vpow2.f32 %v4305_v31  ;;  %8835 = vst [vmem:[#allocation9_spill] sm:$0xff] %v8315_v58  ;;  %v8317_v15 = vpack.c.bf16 %v3453_v6, %v3449_v38  ;;  %v8327_v31 = vpack.c.bf16 %v3460_v63, %v3456_v59  ;;  %v3468_v38 = vld [vmem:[%s8707_s4 + $0xe8] sm:$0xff]  ;;  %v3466_v6 = vld [vmem:[%s8707_s4 + $0xd8] sm:$0xff] }
 0x62e   :  { %5539 = vtanh.f32 %v3153_v19  ;;  %v8329_v19 = vpack.c.bf16 %v3462_v7, %v3458_v39  ;;  %v3470_v59 = vld [vmem:[%s8707_s4 + $0xf8] sm:$0xff]  ;;  %v3463_v63 = vld [vmem:[%s8707_s4 + $0xc0] sm:$0xff]  ;;  %v8365_v7 = vpack.c.bf16 %v3468_v38, %v3464_v52 }
 0x62f   :  { %8836 = vst [vmem:[#allocation10_spill] sm:$0xff] %v8317_v15  ;;  %8837 = vst [vmem:[#allocation13_spill] sm:$0xff] %v8327_v31  ;;  %v3467_v39 = vld [vmem:[%s8707_s4 + $0xe0] sm:$0xff] }
 0x630   :  { %8838 = vst [vmem:[#allocation14_spill] sm:$0xff] %v8329_v19  ;;  %8841 = vst [vmem:[#allocation17_spill] sm:$0xff] %v8365_v7  ;;  %v8389_v52 = vpack.c.bf16 %v3467_v39, %v3463_v63  ;;  %v3473_v63 = vld [vmem:[%s8707_s4 + $0x110] sm:$0xff] }
 0x631   :  { %v3477_v39 = vld [vmem:[%s8707_s4 + $0x130] sm:$0xff] }
 0x632   :  { %v5532_v12 = vpop.eup %5531 }
 0x633   :  { %v2931_v11 = vmul.f32 %v5532_v12, %v5530_v37  ;;  %v3459_v12 = vld [vmem:[%s8707_s4 + $0xa0] sm:$0xff] }
 0x635   :  { %v5534_v1 = vpop.eup %5533  ;;  %v8295_v51 = vsel %vm4272_vm5, %v2931_v11, %v7848_v62  ;;  %v2934_v47 = vsel %vm4272_vm5, %v2931_v11, 0.0  ;;  %v3457_v11 = vld [vmem:[%s8707_s4 + $0x90] sm:$0xff] }
 0x636   :  { %v5536_v48 = vpop.eup %5535  ;;  %v3158_v37 = vadd.f32 1.0, %v5534_v1  ;;  %4301 = vst [vmem:[%s8708_s5 + $0x28] sm:$0xff] %v2934_v47  ;;  %3321 = vmatmul.mubr.f32.vlgmr.msra.gmra.mrb[24].mxu0 %v8295_v51  ;;  %3392 = vmatmul.mubr.f32.vlgmr.msra.gmra.mrb[24].mxu1 %v8295_v51  ;;  %v8353_v1 = vpack.c.bf16 %v3459_v12, %v3455_v28  ;;  %v8355_v47 = vpack.c.bf16 %v3461_v30, %v3457_v11  ;;  %v3472_v28 = vld [vmem:[%s8707_s4 + $0x108] sm:$0xff]  ;;  %v3474_v11 = vld [vmem:[%s8707_s4 + $0x118] sm:$0xff] }
 0x637   :  { %v3164_v62 = vadd.f32 1.0, %v5536_v48  ;;  %5165 = vmatpush1.bf16.msra.mxu0 %v8269_v9  ;;  %5197 = vmatpush1.bf16.msra.mxu1 %v8271_v25  ;;  %v8367_v48 = vpack.c.bf16 %v3470_v59, %v3466_v6  ;;  %v3476_v12 = vld [vmem:[%s8707_s4 + $0x128] sm:$0xff]  ;;  %v3478_v30 = vld [vmem:[%s8707_s4 + $0x138] sm:$0xff]  ;;  %v3471_v6 = vld [vmem:[%s8707_s4 + $0x100] sm:$0xff] }
 0x638   :  { %5541 = vrcp.f32 %v3158_v37  ;;  %5167 = vmatprep.subr.bf16.mxu0 %v8279_v54  ;;  %5199 = vmatprep.subr.bf16.mxu1 %v8281_v2  ;;  %8839 = vst [vmem:[#allocation15_spill] sm:$0xff] %v8353_v1  ;;  %8840 = vst [vmem:[#allocation16_spill] sm:$0xff] %v8355_v47  ;;  %v3465_v37 = vld [vmem:[%s8707_s4 + $0xd0] sm:$0xff]  ;;  %v3475_v59 = vld [vmem:[%s8707_s4 + $0x120] sm:$0xff] }
 0x639   :  { %5543 = vrcp.f32 %v3164_v62  ;;  %3567 = vmatprep.mubr.f32.mxu0 %v8768_v24  ;;  %3638 = vmatprep.mubr.f32.mxu1 %v8768_v24  ;;  %8842 = vst [vmem:[#allocation18_spill] sm:$0xff] %v8367_v48  ;;  %v3469_v62 = vld [vmem:[%s8707_s4 + $0xf0] sm:$0xff]  ;;  %v3479_v2 = vld [vmem:[%s8707_s4 + $0x140] sm:$0xff] }
 0x63a   :  { %v8391_v38 = vpack.c.bf16 %v3469_v62, %v3465_v37  ;;  %v3480_v37 = vld [vmem:[%s8707_s4 + $0x148] sm:$0xff]  ;;  %v3483_v54 = vld [vmem:[%s8707_s4 + $0x160] sm:$0xff] }
 0x63b   :  { %5169 = vmatpush1.bf16.msra.mxu0 %v8315_v58  ;;  %5201 = vmatpush1.bf16.msra.mxu1 %v8317_v15  ;;  %v8425_v15 = vpack.c.bf16 %v3475_v59, %v3471_v6  ;;  %v8427_v58 = vpack.c.bf16 %v3477_v39, %v3473_v63  ;;  %v3481_v59 = vld [vmem:[%s8707_s4 + $0x150] sm:$0xff]  ;;  %v3492_v39 = vld [vmem:[%s8707_s4 + $0x1a8] sm:$0xff] }
 0x63c   :  { %5171 = vmatprep.subr.bf16.mxu0 %v8327_v31  ;;  %5203 = vmatprep.subr.bf16.mxu1 %v8329_v19  ;;  %v5538_v19 = vpop.eup %5537  ;;  %v3485_v63 = vld [vmem:[%s8707_s4 + $0x170] sm:$0xff] }
 0x63d   :  { %v5540_v62 = vpop.eup %5539  ;;  %v3171_v31 = vadd.f32 1.0, %v5538_v19 }
 0x63f   :  { %5173 = vmatpush1.bf16.msra.mxu0 %v8353_v1  ;;  %5205 = vmatpush1.bf16.msra.mxu1 %v8355_v47  ;;  %v8401_v1 = vpack.c.bf16 %v3476_v12, %v3472_v28  ;;  %v8403_v47 = vpack.c.bf16 %v3478_v30, %v3474_v11  ;;  %v3484_v28 = vld [vmem:[%s8707_s4 + $0x168] sm:$0xff]  ;;  %v3482_v12 = vld [vmem:[%s8707_s4 + $0x158] sm:$0xff]  ;;  %5545 = vrcp.f32 %v3171_v31 }
 0x640   :  { %5175 = vmatprep.subr.bf16.mxu0 %v8365_v7  ;;  %5207 = vmatprep.subr.bf16.mxu1 %v8367_v48  ;;  %v3486_v11 = vld [vmem:[%s8707_s4 + $0x178] sm:$0xff]  ;;  %v8438_v19 = vpack.c.bf16 %v3484_v28, %v3480_v37 }
 0x641   :  { %8843 = vst [vmem:[#allocation19_spill] sm:$0xff] %v8403_v47  ;;  %v8440_v6 = vpack.c.bf16 %v3486_v11, %v3482_v12  ;;  %v3490_v37 = vld [vmem:[%s8707_s4 + $0x198] sm:$0xff]  ;;  %v8462_v12 = vpack.c.bf16 %v3483_v54, %v3479_v2  ;;  %v8464_v11 = vpack.c.bf16 %v3485_v63, %v3481_v59  ;;  %v3489_v54 = vld [vmem:[%s8707_s4 + $0x190] sm:$0xff]  ;;  %v3500_v63 = vld [vmem:[%s8707_s4 + $0x1e8] sm:$0xff] }
 0x642   :  { %v5542_v30 = vpop.eup %5541  ;;  %v3493_v2 = vld [vmem:[%s8707_s4 + $0x1b0] sm:$0xff] }
 0x643   :  { %v5544_v48 = vpop.eup %5543  ;;  %v3175_v7 = vmul.f32 %v5542_v30, %v5540_v62  ;;  %5177 = vmatpush1.bf16.msra.mxu0 %v8389_v52  ;;  %5209 = vmatpush1.bf16.msra.mxu1 %v8391_v38  ;;  %8844 = vst [vmem:[#allocation20_spill] sm:$0xff] %v8440_v6  ;;  %v3494_v62 = vld [vmem:[%s8707_s4 + $0x1b8] sm:$0xff]  ;;  %8845 = vst [vmem:[#allocation21_spill] sm:$0xff] %v8464_v11  ;;  %v3487_v30 = vld [vmem:[%s8707_s4 + $0x180] sm:$0xff] }
 0x644   :  { %v3174_v25 = vmul.f32 %v5544_v48, %v7883_v33  ;;  %5179 = vmatprep.subr.bf16.mxu0 %v8401_v1  ;;  %5211 = vmatprep.subr.bf16.mxu1 %v8403_v47  ;;  %v3488_v48 = vld [vmem:[%s8707_s4 + $0x188] sm:$0xff]  ;;  %v3491_v47 = vld [vmem:[%s8707_s4 + $0x1a0] sm:$0xff]  ;;  %v8476_v31 = vpack.c.bf16 %v3494_v62, %v3490_v37 }
 0x645   :  { %v8503_v37 = vpack.c.bf16 %v3491_v47, %v3487_v30  ;;  %v3495_v62 = vld [vmem:[%s8707_s4 + $0x1c0] sm:$0xff]  ;;  %v3497_v47 = vld [vmem:[%s8707_s4 + $0x1d0] sm:$0xff] }
 0x646   :  { %v3176_v28 = vadd.f32 %v3175_v7, %v3174_v25  ;;  %v8474_v25 = vpack.c.bf16 %v3492_v39, %v3488_v48  ;;  %v3496_v7 = vld [vmem:[%s8707_s4 + $0x1c8] sm:$0xff]  ;;  %v3498_v48 = vld [vmem:[%s8707_s4 + $0x1d8] sm:$0xff]  ;;  %v3501_v30 = vld [vmem:[%s8707_s4 + $0x1f0] sm:$0xff] }
 0x647   :  { %5181 = vmatpush1.bf16.msra.mxu0 %v8425_v15  ;;  %5213 = vmatpush1.bf16.msra.mxu1 %v8427_v58  ;;  %v3502_v39 = vld [vmem:[%s8707_s4 + $0x1f8] sm:$0xff] }
 0x648   :  { %5183 = vmatprep.subr.bf16.mxu0 %v8438_v19  ;;  %5215 = vmatprep.subr.bf16.mxu1 %v8440_v6  ;;  %5547 = vtanh.f32 %v3176_v28  ;;  %v8490_v59 = vsel %vm4267_vm4, %v3176_v28, %v7883_v33  ;;  %v8505_v33 = vpack.c.bf16 %v3493_v2, %v3489_v54  ;;  %v8512_v28 = vpack.c.bf16 %v3500_v63, %v3496_v7 }
 0x649   :  { %v8514_v6 = vpack.c.bf16 %v3502_v39, %v3498_v48  ;;  %v8529_v2 = vpack.c.bf16 %v3501_v30, %v3497_v47  ;;  %v5546_v7 = vpop.eup %5545 }
 0x64b   :  { %5185 = vmatpush1.bf16.msra.mxu0 %v8462_v12  ;;  %5217 = vmatpush1.bf16.msra.mxu1 %v8464_v11  ;;  %v3499_v11 = vld [vmem:[%s8707_s4 + $0x1e0] sm:$0xff] }
 0x64c   :  { %5187 = vmatprep.subr.bf16.mxu0 %v8474_v25  ;;  %5219 = vmatprep.subr.bf16.mxu1 %v8476_v31  ;;  %v8527_v54 = vpack.c.bf16 %v3499_v11, %v3495_v62 }
 0x64f   :  { %5189 = vmatpush1.bf16.msra.mxu0 %v8503_v37  ;;  %5221 = vmatpush1.bf16.msra.mxu1 %v8505_v33 }
 0x650   :  { %5191 = vmatprep.subr.bf16.mxu0 %v8512_v28  ;;  %5223 = vmatprep.subr.bf16.mxu1 %v8514_v6 }
 0x652   :  { %v5548_v63 = vpop.eup %5547 }
 0x653   :  { %5193 = vmatpush1.bf16.msra.mxu0 %v8527_v54  ;;  %5225 = vmatpush1.bf16.msra.mxu1 %v8529_v2  ;;  %v3178_v48 = vmul.f32 %v5548_v63, %v5546_v7  ;;  %v4223_v7 = vld [vmem:[%s8705_s2 + $0x78] sm:$0xff] }
 0x654   :  { %5227 = vmatprep.subr.bf16.mxu0 %v7918_v22  ;;  %5259 = vmatprep.subr.bf16.mxu1 %v7929_v32  ;;  %v78_v22 = vld [vmem:[%s8704_s1 + $0x188] sm:$0xff] }
 0x655   :  { %v8540_v11 = vsel %vm4267_vm4, %v3178_v48, %v7898_v43  ;;  %v3181_v39 = vsel %vm4267_vm4, %v3178_v48, 0.0  ;;  %v76_v43 = vld [vmem:[%s8704_s1 + $0x180] sm:$0xff]  ;;  %v4222_v48 = vld [vmem:[%s8705_s2 + $0x70] sm:$0xff] }
 0x656   :  { %4306 = vst [vmem:[%s8709_s6 + $0x10] sm:$0xff] %v3181_v39  ;;  %3568 = vmatmul.mubr.f32.vlgmr.msra.gmra.mrb[26].mxu0 %v8540_v11  ;;  %3639 = vmatmul.mubr.f32.vlgmr.msra.gmra.mrb[26].mxu1 %v8540_v11 }
 0x657   :  { %5229 = vmatpush1.bf16.msra.mxu0 %v7931_v46  ;;  %5261 = vmatpush1.bf16.msra.mxu1 %v7940_v35 }
 0x658   :  { %5231 = vmatprep.subr.bf16.mxu0 %v7954_v17  ;;  %5263 = vmatprep.subr.bf16.mxu1 %v7965_v21 }
 0x659   :  { %3814 = vmatprep.mubr.f32.mxu0 %v8768_v24  ;;  %3885 = vmatprep.mubr.f32.mxu1 %v8768_v24 }
 0x65b   :  { %5233 = vmatpush1.bf16.msra.mxu0 %v7967_v14  ;;  %5265 = vmatpush1.bf16.msra.mxu1 %v7976_v42 }
 0x65c   :  { %5235 = vmatprep.subr.bf16.mxu0 %v7990_v18  ;;  %5267 = vmatprep.subr.bf16.mxu1 %v8001_v13  ;;  %v82_v13 = vld [vmem:[%s8704_s1 + $0x198] sm:$0xff] }
 0x65f   :  { %5237 = vmatpush1.bf16.msra.mxu0 %v8003_v56  ;;  %5269 = vmatpush1.bf16.msra.mxu1 %v8012_v60  ;;  %v80_v60 = vld [vmem:[%s8704_s1 + $0x190] sm:$0xff] }
 0x660   :  { %5239 = vmatprep.subr.bf16.mxu0 %v8026_v40  ;;  %5271 = vmatprep.subr.bf16.mxu1 %v8037_v20 }
 0x663   :  { %5241 = vmatpush1.bf16.msra.mxu0 %v8039_v50  ;;  %5273 = vmatpush1.bf16.msra.mxu1 %v8048_v26 }
 0x664   :  { %5243 = vmatprep.subr.bf16.mxu0 %v8062_v36  ;;  %5275 = vmatprep.subr.bf16.mxu1 %v8073_v41 }
 0x667   :  { %5245 = vmatpush1.bf16.msra.mxu0 %v8075_v29  ;;  %5277 = vmatpush1.bf16.msra.mxu1 %v8084_v53 }
 0x668   :  { %5247 = vmatprep.subr.bf16.mxu0 %v8101_v45  ;;  %5279 = vmatprep.subr.bf16.mxu1 %v8103_v34 }
 0x66b   :  { %5249 = vmatpush1.bf16.msra.mxu0 %v8114_v10  ;;  %5281 = vmatpush1.bf16.msra.mxu1 %v8121_v16 }
 0x66c   :  { %5251 = vmatprep.subr.bf16.mxu0 %v8133_v44  ;;  %5283 = vmatprep.subr.bf16.mxu1 %v8145_v61  ;;  %v4220_v61 = vld [vmem:[%s8705_s2 + $0x60] sm:$0xff] }
 0x66f   :  { %5253 = vmatpush1.bf16.msra.mxu0 %v8147_v23  ;;  %5285 = vmatpush1.bf16.msra.mxu1 %v8156_v5  ;;  %v4221_v23 = vld [vmem:[%s8705_s2 + $0x68] sm:$0xff] }
 0x670   :  { %5255 = vmatprep.subr.bf16.mxu0 %v8169_v4  ;;  %5287 = vmatprep.subr.bf16.mxu1 %v8181_v55 }
 0x673   :  { %5257 = vmatpush1.bf16.msra.mxu0 %v8183_v49  ;;  %5289 = vmatpush1.bf16.msra.mxu1 %v8192_v57 }
 0x674   :  { %5291 = vmatprep.subr.bf16.mxu0 %v8205_v27  ;;  %5323 = vmatprep.subr.bf16.mxu1 %v8211_v0 }
 0x709   :  { %v3322_v32 = vpop.f32.mrb[24].mxu0  ;;  %v3393_v46 = vpop.f32.mrb[24].mxu1 }
 0x70a   :  { %v3398_v35 = vadd.f32 %v3322_v32, %v76_v43  ;;  %v3324_v17 = vpop.f32.mrb[25].mxu0  ;;  %v3395_v21 = vpop.f32.mrb[25].mxu1  ;;  %v3400_v20 = vadd.f32 %v3393_v46, %v80_v60  ;;  %v8850_v60 = vld [vmem:[#allocation10_spill] sm:$0xff] }
 0x70b   :  { %v3399_v14 = vadd.f32 %v3324_v17, %v78_v22  ;;  %v3401_v56 = vadd.f32 %v3395_v21, %v82_v13  ;;  %v8848_v13 = vld [vmem:[#allocation12_spill] sm:$0xff] }
 0x70c   :  { %v4308_v42 = vmul.f32 -1.442695, %v3398_v35 }
 0x70d   :  { %v4309_v18 = vmul.f32 -1.442695, %v3399_v14  ;;  %v4310_v40 = vmul.f32 -1.442695, %v3401_v56  ;;  %v8849_v56 = vld [vmem:[#allocation9_spill] sm:$0xff] }
 0x70e   :  { %5549 = vpow2.f32 %v4308_v42 }
 0x70f   :  { %5551 = vpow2.f32 %v4309_v18  ;;  %v8846_v18 = vld [vmem:[#allocation11_spill] sm:$0xff] }
 0x710   :  { %5553 = vpow2.f32 %v4310_v40  ;;  %v8851_v40 = vld [vmem:[#allocation13_spill] sm:$0xff] }
 0x711   :  { %5555 = vtanh.f32 %v3400_v20  ;;  %v8852_v20 = vld [vmem:[#allocation14_spill] sm:$0xff] }
 0x718   :  { %v5550_v50 = vpop.eup %5549 }
 0x719   :  { %v5552_v26 = vpop.eup %5551  ;;  %v3405_v36 = vadd.f32 1.0, %v5550_v50  ;;  %v8854_v50 = vld [vmem:[#allocation16_spill] sm:$0xff] }
 0x71a   :  { %v3411_v41 = vadd.f32 1.0, %v5552_v26  ;;  %v5554_v29 = vpop.eup %5553 }
 0x71b   :  { %5557 = vrcp.f32 %v3405_v36  ;;  %v5556_v53 = vpop.eup %5555  ;;  %v3418_v16 = vadd.f32 1.0, %v5554_v29  ;;  %v8855_v36 = vld [vmem:[#allocation17_spill] sm:$0xff] }
 0x71c   :  { %5559 = vrcp.f32 %v3411_v41  ;;  %v8856_v41 = vld [vmem:[#allocation18_spill] sm:$0xff] }
 0x71d   :  { %5561 = vrcp.f32 %v3418_v16  ;;  %v8857_v16 = vld [vmem:[#allocation19_spill] sm:$0xff] }
 0x725   :  { %v5558_v45 = vpop.eup %5557 }
 0x726   :  { %v5560_v34 = vpop.eup %5559  ;;  %v3422_v10 = vmul.f32 %v5558_v45, %v5556_v53 }
 0x727   :  { %v3421_v44 = vmul.f32 %v5560_v34, %v8237_v3  ;;  %v5562_v39 = vpop.eup %5561 }
 0x729   :  { %v3423_v5 = vadd.f32 %v3422_v10, %v3421_v44  ;;  %v3569_v4 = vpop.f32.mrb[26].mxu0  ;;  %v3640_v55 = vpop.f32.mrb[26].mxu1 }
 0x72a   :  { %v3645_v49 = vadd.f32 %v4220_v61, %v3569_v4  ;;  %v3571_v57 = vpop.f32.mrb[27].mxu0  ;;  %v3642_v27 = vpop.f32.mrb[27].mxu1  ;;  %v3647_v32 = vadd.f32 %v4222_v48, %v3640_v55  ;;  %v8858_v61 = vld [vmem:[#allocation20_spill] sm:$0xff]  ;;  %v88_v4 = vld [vmem:[%s8704_s1 + $0x1d0] sm:$0xff] }
 0x72b   :  { %v3646_v0 = vadd.f32 %v4221_v23, %v3571_v57  ;;  %5563 = vtanh.f32 %v3423_v5  ;;  %v8605_v62 = vsel %vm4262_vm3, %v3423_v5, %v8237_v3  ;;  %v3648_v63 = vadd.f32 %v4223_v7, %v3642_v27  ;;  %v90_v23 = vld [vmem:[%s8704_s1 + $0x1d8] sm:$0xff] }
 0x72c   :  { %v4313_v47 = vmul.f32 -1.442695, %v3645_v49 }
 0x72d   :  { %v4314_v30 = vmul.f32 -1.442695, %v3646_v0  ;;  %v4315_v22 = vmul.f32 -1.442695, %v3648_v63 }
 0x72e   :  { %5565 = vpow2.f32 %v4313_v47 }
 0x72f   :  { %5567 = vpow2.f32 %v4314_v30 }
 0x730   :  { %5569 = vpow2.f32 %v4315_v22 }
 0x731   :  { %5571 = vtanh.f32 %v3647_v32  ;;  %v4216_v32 = vld [vmem:[%s8705_s2 + $0x20] sm:$0xff] }
 0x735   :  { %v5564_v43 = vpop.eup %5563 }
 0x736   :  { %v3425_v46 = vmul.f32 %v5564_v43, %v5562_v39 }
 0x738   :  { %v5566_v3 = vpop.eup %5565  ;;  %v3426_v35 = vsel %vm4262_vm3, %v3425_v46, %v8295_v51  ;;  %v3428_v17 = vsel %vm4262_vm3, %v3425_v46, 0.0  ;;  %v8847_v51 = vld [vmem:[#allocation8_spill] sm:$0xff]  ;;  %v4217_v46 = vld [vmem:[%s8705_s2 + $0x28] sm:$0xff] }
 0x739   :  { %v5568_v21 = vpop.eup %5567  ;;  %v3652_v14 = vadd.f32 1.0, %v5566_v3  ;;  %4311 = vst [vmem:[%s8708_s5 + $0x30] sm:$0xff] %v3428_v17  ;;  %3815 = vmatmul.mubr.f32.vlgmr.msra.gmra.mrb[28].mxu0 %v3426_v35  ;;  %3886 = vmatmul.mubr.f32.vlgmr.msra.gmra.mrb[28].mxu1 %v3426_v35 }
 0x73a   :  { %v3658_v42 = vadd.f32 1.0, %v5568_v21  ;;  %5293 = vmatpush1.bf16.msra.mxu0 %v8269_v9  ;;  %5325 = vmatpush1.bf16.msra.mxu1 %v8846_v18  ;;  %v8853_v9 = vld [vmem:[#allocation15_spill] sm:$0xff]  ;;  %v5570_v26 = vpop.eup %5569 }
 0x73b   :  { %5573 = vrcp.f32 %v3652_v14  ;;  %5295 = vmatprep.subr.bf16.mxu0 %v8847_v51  ;;  %5327 = vmatprep.subr.bf16.mxu1 %v8848_v13  ;;  %v5572_v29 = vpop.eup %5571  ;;  %v3665_v34 = vadd.f32 1.0, %v5570_v26 }
 0x73c   :  { %5575 = vrcp.f32 %v3658_v42  ;;  %4060 = vmatprep.mubr.f32.mxu0 %v8768_v24  ;;  %4131 = vmatprep.mubr.f32.mxu1 %v8768_v24 }
 0x73d   :  { %5577 = vrcp.f32 %v3665_v34 }
 0x73e   :  { %5297 = vmatpush1.bf16.msra.mxu0 %v8849_v56  ;;  %5329 = vmatpush1.bf16.msra.mxu1 %v8850_v60  ;;  %v4218_v60 = vld [vmem:[%s8705_s2 + $0x30] sm:$0xff] }
 0x73f   :  { %5299 = vmatprep.subr.bf16.mxu0 %v8851_v40  ;;  %5331 = vmatprep.subr.bf16.mxu1 %v8852_v20 }
 0x742   :  { %5301 = vmatpush1.bf16.msra.mxu0 %v8853_v9  ;;  %5333 = vmatpush1.bf16.msra.mxu1 %v8854_v50 }
 0x743   :  { %5303 = vmatprep.subr.bf16.mxu0 %v8855_v36  ;;  %5335 = vmatprep.subr.bf16.mxu1 %v8856_v41 }
 0x745   :  { %v5574_v53 = vpop.eup %5573 }
 0x746   :  { %v5576_v24 = vpop.eup %5575  ;;  %v3669_v45 = vmul.f32 %v5574_v53, %v5572_v29  ;;  %5305 = vmatpush1.bf16.msra.mxu0 %v8389_v52  ;;  %5337 = vmatpush1.bf16.msra.mxu1 %v8391_v38 }
 0x747   :  { %v3668_v10 = vmul.f32 %v5576_v24, %v8490_v59  ;;  %5307 = vmatprep.subr.bf16.mxu0 %v8401_v1  ;;  %5339 = vmatprep.subr.bf16.mxu1 %v8857_v16  ;;  %v8859_v1 = vld [vmem:[#allocation21_spill] sm:$0xff] }
 0x749   :  { %v3670_v44 = vadd.f32 %v3669_v45, %v3668_v10 }
 0x74a   :  { %5309 = vmatpush1.bf16.msra.mxu0 %v8425_v15  ;;  %5341 = vmatpush1.bf16.msra.mxu1 %v8427_v58  ;;  %v5578_v58 = vpop.eup %5577 }
 0x74b   :  { %5311 = vmatprep.subr.bf16.mxu0 %v8438_v19  ;;  %5343 = vmatprep.subr.bf16.mxu1 %v8858_v61  ;;  %5579 = vtanh.f32 %v3670_v44  ;;  %v8647_v52 = vsel %vm4257_vm2, %v3670_v44, %v8490_v59 }
 0x74e   :  { %5313 = vmatpush1.bf16.msra.mxu0 %v8462_v12  ;;  %5345 = vmatpush1.bf16.msra.mxu1 %v8859_v1 }
 0x74f   :  { %5315 = vmatprep.subr.bf16.mxu0 %v8474_v25  ;;  %5347 = vmatprep.subr.bf16.mxu1 %v8476_v31  ;;  %v86_v25 = vld [vmem:[%s8704_s1 + $0x1c8] sm:$0xff] }
 0x752   :  { %5317 = vmatpush1.bf16.msra.mxu0 %v8503_v37  ;;  %5349 = vmatpush1.bf16.msra.mxu1 %v8505_v33 }
 0x753   :  { %5319 = vmatprep.subr.bf16.mxu0 %v8512_v28  ;;  %5351 = vmatprep.subr.bf16.mxu1 %v8514_v6  ;;  %v84_v6 = vld [vmem:[%s8704_s1 + $0x1c0] sm:$0xff] }
 0x755   :  { %v5580_v15 = vpop.eup %5579 }
 0x756   :  { %5321 = vmatpush1.bf16.msra.mxu0 %v8527_v54  ;;  %5353 = vmatpush1.bf16.msra.mxu1 %v8529_v2  ;;  %v3672_v38 = vmul.f32 %v5580_v15, %v5578_v58 }
 0x758   :  { %v3673_v19 = vsel %vm4257_vm2, %v3672_v38, %v8540_v11  ;;  %v3675_v12 = vsel %vm4257_vm2, %v3672_v38, 0.0 }
 0x759   :  { %4316 = vst [vmem:[%s8709_s6 + $0x8] sm:$0xff] %v3675_v12  ;;  %4061 = vmatmul.mubr.f32.vlgmr.msra.gmra.mrb[30].mxu0 %v3673_v19  ;;  %4132 = vmatmul.mubr.f32.vlgmr.msra.gmra.mrb[30].mxu1 %v3673_v19 }
 0x80c   :  { %v3816_v31 = vpop.f32.mrb[28].mxu0  ;;  %v3887_v59 = vpop.f32.mrb[28].mxu1 }
 0x80d   :  { %v3892_v37 = vadd.f32 %v3816_v31, %v84_v6  ;;  %v3818_v33 = vpop.f32.mrb[29].mxu0  ;;  %v3889_v28 = vpop.f32.mrb[29].mxu1  ;;  %v3894_v49 = vadd.f32 %v3887_v59, %v88_v4 }
 0x80e   :  { %v3893_v54 = vadd.f32 %v3818_v33, %v86_v25  ;;  %v3895_v5 = vadd.f32 %v3889_v28, %v90_v23 }
 0x80f   :  { %v4318_v2 = vmul.f32 -1.442695, %v3892_v37 }
 0x810   :  { %v4319_v11 = vmul.f32 -1.442695, %v3893_v54  ;;  %v4320_v55 = vmul.f32 -1.442695, %v3895_v5 }
 0x811   :  { %5581 = vpow2.f32 %v4318_v2 }
 0x812   :  { %5583 = vpow2.f32 %v4319_v11 }
 0x813   :  { %5585 = vpow2.f32 %v4320_v55 }
 0x814   :  { %5587 = vtanh.f32 %v3894_v49 }
 0x81b   :  { %v5582_v57 = vpop.eup %5581 }
 0x81c   :  { %v5584_v27 = vpop.eup %5583  ;;  %v3899_v0 = vadd.f32 1.0, %v5582_v57 }
 0x81d   :  { %v3905_v47 = vadd.f32 1.0, %v5584_v27  ;;  %v5586_v30 = vpop.eup %5585 }
 0x81e   :  { %5589 = vrcp.f32 %v3899_v0  ;;  %v5588_v7 = vpop.eup %5587  ;;  %v3912_v43 = vadd.f32 1.0, %v5586_v30 }
 0x81f   :  { %5591 = vrcp.f32 %v3905_v47 }
 0x820   :  { %5593 = vrcp.f32 %v3912_v43 }
 0x828   :  { %v5590_v63 = vpop.eup %5589 }
 0x829   :  { %v5592_v48 = vpop.eup %5591  ;;  %v3916_v39 = vmul.f32 %v5590_v63, %v5588_v7 }
 0x82a   :  { %v3915_v22 = vmul.f32 %v5592_v48, %v8605_v62  ;;  %v4219_v62 = vld [vmem:[%s8705_s2 + $0x38] sm:$0xff]  ;;  %v5594_v40 = vpop.eup %5593 }
 0x82c   :  { %v3917_v3 = vadd.f32 %v3916_v39, %v3915_v22  ;;  %v4062_v35 = vpop.f32.mrb[30].mxu0  ;;  %v4133_v17 = vpop.f32.mrb[30].mxu1 }
 0x82d   :  { %v4138_v21 = vadd.f32 %v4216_v32, %v4062_v35  ;;  %v4064_v14 = vpop.f32.mrb[31].mxu0  ;;  %v4135_v42 = vpop.f32.mrb[31].mxu1  ;;  %v4140_v26 = vadd.f32 %v4218_v60, %v4133_v17 }
 0x82e   :  { %5595 = vtanh.f32 %v3917_v3  ;;  %v4139_v18 = vadd.f32 %v4217_v46, %v4064_v14  ;;  %v4141_v56 = vadd.f32 %v4219_v62, %v4135_v42 }
 0x82f   :  { %v4323_v51 = vmul.f32 -1.442695, %v4138_v21 }
 0x830   :  { %v4324_v13 = vmul.f32 -1.442695, %v4139_v18  ;;  %v4325_v9 = vmul.f32 -1.442695, %v4141_v56 }
 0x831   :  { %5597 = vpow2.f32 %v4323_v51 }
 0x832   :  { %5599 = vpow2.f32 %v4324_v13 }
 0x833   :  { %5601 = vpow2.f32 %v4325_v9 }
 0x834   :  { %5603 = vtanh.f32 %v4140_v26 }
 0x838   :  { %v5596_v20 = vpop.eup %5595 }
 0x839   :  { %v3919_v50 = vmul.f32 %v5596_v20, %v5594_v40 }
 0x83b   :  { %v5598_v36 = vpop.eup %5597  ;;  %v3922_v41 = vsel %vm4252_vm1, %v3919_v50, 0.0 }
 0x83c   :  { %v5600_v29 = vpop.eup %5599  ;;  %4321 = vst [vmem:[%s8708_s5 + $0x38] sm:$0xff] %v3922_v41  ;;  %v4145_v53 = vadd.f32 1.0, %v5598_v36 }
 0x83d   :  { %v4151_v24 = vadd.f32 1.0, %v5600_v29  ;;  %v5602_v45 = vpop.eup %5601 }
 0x83e   :  { %5605 = vrcp.f32 %v4145_v53  ;;  %v5604_v34 = vpop.eup %5603  ;;  %v4158_v61 = vadd.f32 1.0, %v5602_v45 }
 0x83f   :  { %5607 = vrcp.f32 %v4151_v24 }
 0x840   :  { %5609 = vrcp.f32 %v4158_v61 }
 0x848   :  { %v5606_v10 = vpop.eup %5605 }
 0x849   :  { %v5608_v16 = vpop.eup %5607  ;;  %v4162_v44 = vmul.f32 %v5606_v10, %v5604_v34 }
 0x84a   :  { %v4161_v1 = vmul.f32 %v5608_v16, %v8647_v52  ;;  %v5610_v15 = vpop.eup %5609 }
 0x84c   :  { %v4163_v58 = vadd.f32 %v4162_v44, %v4161_v1 }
 0x84e   :  { %5611 = vtanh.f32 %v4163_v58 }
 0x858   :  { %v5612_v38 = vpop.eup %5611 }
 0x859   :  { %v4165_v19 = vmul.f32 %v5612_v38, %v5610_v15 }
 0x85b   :  { %v4168_v12 = vsel %vm4248_vm0, %v4165_v19, 0.0 }
 0x85c   :  { %4169 = vst [vmem:[%s8709_s6] sm:$0xff] %v4168_v12 }

</bundles_post_ra>
